<compile_context>
chip_gen: v6e
topology: v6e:2x2x1
jax: 0.10.0
libtpu: 0.0.40
codegen_flags: <defaults>
</compile_context>

<pallas_src>
import functools

import jax
import jax.numpy as jnp
from jax.experimental import pallas as pl
from jax.experimental.pallas import tpu as pltpu

_EPS = 1e-5
_SLOPE = 0.2
_LANE = 128
_DEFAULT_TM = 512


def _round_up(x, m):
    return (x + m - 1) // m * m


def _cdiv(a, b):
    return (a + b - 1) // b


def _pick_tm(m):
    # Balanced tiles: M=768 -> 2x384 instead of 2x512 (no 33% zero-row work).
    nt = max(1, _cdiv(m, _DEFAULT_TM))
    return max(_round_up(_cdiv(m, nt), 8), 8)


def _vmem_limit(tm, k, cp):
    # Explicit per-layer VMEM budget (v5e scoped default is only 16 MiB;
    # clamp to 64 MiB = v7x physical per-TC VMEM).
    need = (2 * tm * k * 2        # bf16 patch tiles, double-buffered
            + 2 * k * cp * 2      # bf16 resident weight (double-buffered)
            + 2 * tm * cp * 2     # bf16 output tiles
            + 2 * 8 * cp * 4      # packed stats tiles
            + 8 * cp * 4          # gamma/beta rows
            + (4 << 20))          # headroom / compiler scratch
    return int(min(max(need, 16 << 20), 64 << 20))


def _cparams(tm, k, cp):
    return pltpu.CompilerParams(
        dimension_semantics=("parallel",),     # M tiles independent -> megacore
        vmem_limit_bytes=_vmem_limit(tm, k, cp),
    )


# ----------------------------- Pallas kernels ------------------------------ #

def _matmul_lrelu_kernel(p_ref, w_ref, o_ref, *, slope):
    # bf16 x bf16 -> f32 on the MXU; f32 epilogue (no bf16 VPU on v5e); bf16 store.
    y = jnp.dot(p_ref[...], w_ref[...], preferred_element_type=jnp.float32)
    y = jnp.where(y > 0.0, y, slope * y)
    o_ref[...] = y.astype(o_ref.dtype)


def _matmul_bn_lrelu_kernel(p_ref, w_ref, g_ref, b_ref, o_ref, *,
                            slope, eps, m_rows):
    # Single-tile fast path: tile stats == global BatchNorm stats, so fuse
    # conv + BN + LeakyReLU in one pass (no second HBM round trip of y).
    y = jnp.dot(p_ref[...], w_ref[...], preferred_element_type=jnp.float32)
    inv_m = 1.0 / m_rows
    mean = jnp.sum(y, axis=0, keepdims=True) * inv_m
    var = jnp.maximum(jnp.sum(y * y, axis=0, keepdims=True) * inv_m
                      - mean * mean, 0.0)
    scale = g_ref[...] * jax.lax.rsqrt(var + eps)   # gamma folded into scale
    shift = b_ref[...] - mean * scale
    z = y * scale + shift
    z = jnp.where(z > 0.0, z, slope * z)
    # NOTE: zero-padded output channels get var=0 -> huge scale, but y==0 and
    # shift==0 there, so z stays 0 and those lanes are sliced off anyway.
    o_ref[...] = z.astype(o_ref.dtype)


def _matmul_stats_kernel(p_ref, w_ref, y_ref, st_ref):
    # BN pass 1 (multi-tile): pre-BN y (bf16) + per-tile partial sum /
    # sum-of-squares packed into ONE (8, Cp) block (sublanes 0-3 = sum,
    # sublanes 4-7 = sum of squares) -> a single extra store stream.
    y = jnp.dot(p_ref[...], w_ref[...], preferred_element_type=jnp.float32)
    y_ref[...] = y.astype(y_ref.dtype)
    cp = y.shape[1]
    s = jnp.broadcast_to(jnp.sum(y, axis=0, keepdims=True), (8, cp))
    ss = jnp.broadcast_to(jnp.sum(y * y, axis=0, keepdims=True), (8, cp))
    row = jax.lax.broadcasted_iota(jnp.int32, (8, cp), 0)
    st_ref[...] = jnp.where(row < 4, s, ss)


# --------------------------- pallas_call wrappers --------------------------- #

def _conv_nobn_block(patches, w, *, tm):
    mp, k = patches.shape
    cp = w.shape[1]
    return pl.pallas_call(
        functools.partial(_matmul_lrelu_kernel, slope=_SLOPE),
        out_shape=jax.ShapeDtypeStruct((mp, cp), jnp.bfloat16),
        grid=(mp // tm,),
        in_specs=[
            pl.BlockSpec((tm, k), lambda i: (i, 0)),     # pipelined patch tiles
            pl.BlockSpec((k, cp), lambda i: (0, 0)),     # resident weight
        ],
        out_specs=pl.BlockSpec((tm, cp), lambda i: (i, 0)),
        compiler_params=_cparams(tm, k, cp),
    )(patches, w)


def _conv_bn_fused_block(patches, w, gamma, beta, *, m_rows):
    mp, k = patches.shape
    cp = w.shape[1]
    return pl.pallas_call(
        functools.partial(_matmul_bn_lrelu_kernel, slope=_SLOPE, eps=_EPS,
                          m_rows=float(m_rows)),
        out_shape=jax.ShapeDtypeStruct((mp, cp), jnp.bfloat16),
        grid=(1,),
        in_specs=[
            pl.BlockSpec((mp, k), lambda i: (0, 0)),
            pl.BlockSpec((k, cp), lambda i: (0, 0)),
            pl.BlockSpec((1, cp), lambda i: (0, 0)),
            pl.BlockSpec((1, cp), lambda i: (0, 0)),
        ],
        out_specs=pl.BlockSpec((mp, cp), lambda i: (0, 0)),
        compiler_params=_cparams(mp, k, cp),
    )(patches, w, gamma, beta)


def _conv_stats_block(patches, w, *, tm):
    mp, k = patches.shape
    cp = w.shape[1]
    nt = mp // tm
    return pl.pallas_call(
        _matmul_stats_kernel,
        out_shape=(
            jax.ShapeDtypeStruct((mp, cp), jnp.bfloat16),     # pre-BN y (bf16)
            jax.ShapeDtypeStruct((nt * 8, cp), jnp.float32),  # packed partials
        ),
        grid=(nt,),
        in_specs=[
            pl.BlockSpec((tm, k), lambda i: (i, 0)),
            pl.BlockSpec((k, cp), lambda i: (0, 0)),
        ],
        out_specs=(
            pl.BlockSpec((tm, cp), lambda i: (i, 0)),
            pl.BlockSpec((8, cp), lambda i: (i, 0)),
        ),
        compiler_params=_cparams(tm, k, cp),
    )(patches, w)


# ------------------------------- JAX glue ----------------------------------- #

def _im2col(x_nhwc, k, stride, pad):
    """Extract conv patches. Returns (N*Ho*Wo, k*k*C), Ho, Wo."""
    if pad > 0:
        x_nhwc = jnp.pad(x_nhwc, ((0, 0), (pad, pad), (pad, pad), (0, 0)))
    n, h, w, c = x_nhwc.shape
    ho = (h - k) // stride + 1
    wo = (w - k) // stride + 1
    pieces = []
    for i in range(k):
        for j in range(k):
            pieces.append(
                x_nhwc[:, i:i + stride * ho:stride, j:j + stride * wo:stride, :]
            )
    p = jnp.stack(pieces, axis=3)                       # (N, Ho, Wo, k*k, C)
    return p.reshape(n * ho * wo, k * k * c), ho, wo


def _spectral_normalize(w_flat, u, n_iter=1, eps=1e-12):
    """PyTorch-style spectral norm on (C_out, K) matrix: W / sigma."""
    v = None
    for _ in range(n_iter):
        v = w_flat.T @ u
        v = v / (jnp.linalg.norm(v) + eps)
        u = w_flat @ v
        u = u / (jnp.linalg.norm(u) + eps)
    sigma = u @ (w_flat @ v)
    return w_flat / sigma


def _make_params(key, feature_maps, image_channels):
    """Deterministic synthetic weights (DCGAN-style N(0, 0.02) init)."""
    cfg = [
        # (C_in, C_out, k, stride, pad, use_bn)
        (image_channels,   feature_maps,     4, 2, 1, False),
        (feature_maps,     feature_maps * 2, 4, 2, 1, True),
        (feature_maps * 2, feature_maps * 4, 4, 2, 1, True),
        (feature_maps * 4, feature_maps * 8, 4, 2, 1, True),
        (feature_maps * 8, 1,                4, 1, 0, False),   # sigmoid head
    ]
    params = []
    for li, (cin, cout, k, s, p, bn) in enumerate(cfg):
        w_key, u_key = jax.random.split(jax.random.fold_in(key, li))
        w = 0.02 * jax.random.normal(w_key, (cout, cin, k, k), jnp.float32)
        u = jax.random.normal(u_key, (cout,), jnp.float32)
        # (C_out, kh, kw, C_in) flatten matches the patch (kh, kw, c) ordering.
        w_flat = jnp.transpose(w, (0, 2, 3, 1)).reshape(cout, k * k * cin)
        w_sn = _spectral_normalize(w_flat, u, n_iter=1)
        w_kc = w_sn.T                                    # (K, C_out)
        if li == len(cfg) - 1:
            params.append(dict(kind="head", w_kc_f32=w_kc, k=k, stride=s,
                               pad=p, cout=cout))
            continue
        cp = _round_up(cout, _LANE)                      # lane-dense output width
        w_pad = jnp.pad(w_kc, ((0, 0), (0, cp - cout)))
        params.append(dict(kind="conv",
                           w_kc_bf16=w_pad.astype(jnp.bfloat16),
                           gamma=jnp.ones((cp,), jnp.float32),   # BN affine defaults
                           beta=jnp.zeros((cp,), jnp.float32),
                           k=k, stride=s, pad=p, use_bn=bn, cout=cout, cp=cp))
    return params


def _run_conv_block(x_nhwc, layer, *, n):
    patches, ho, wo = _im2col(x_nhwc, layer["k"], layer["stride"], layer["pad"])
    m_true = patches.shape[0]
    tm = _pick_tm(m_true)
    mp = _round_up(m_true, tm)
    if mp != m_true:
        # Zero rows contribute nothing to the matmul or the BN sums.
        patches = jnp.pad(patches, ((0, mp - m_true), (0, 0)))
    w = layer["w_kc_bf16"]
    cout, cp = layer["cout"], layer["cp"]

    if not layer["use_bn"]:
        y = _conv_nobn_block(patches, w, tm=tm)
    elif mp == tm and mp == m_true:
        # Single tile, no padding: conv + BN + LeakyReLU fused in one kernel.
        y = _conv_bn_fused_block(patches, w,
                                 layer["gamma"].reshape(1, cp),
                                 layer["beta"].reshape(1, cp),
                                 m_rows=m_true)
    else:
        # Multi-tile: Pallas matmul + packed partial stats; BN apply + LeakyReLU
        # in plain JAX so XLA fuses it into the next layer's im2col/bf16 cast.
        y, st = _conv_stats_block(patches, w, tm=tm)
        st = st.reshape(-1, 8, cp)
        tot = jnp.sum(st[:, 0, :], axis=0)               # sublane 0 = sum
        tot_sq = jnp.sum(st[:, 7, :], axis=0)            # sublane 7 = sum of squares
        mean = tot / m_true                               # global M, not per-tile
        var = jnp.maximum(tot_sq / m_true - mean * mean, 0.0)   # biased variance
        scale = layer["gamma"] * jax.lax.rsqrt(var + _EPS)      # gamma folded in
        shift = layer["beta"] - mean * scale
        z = y.astype(jnp.float32) * scale[None, :] + shift[None, :]
        y = jnp.where(z > 0.0, z, _SLOPE * z).astype(jnp.bfloat16)

    y = y[:m_true, :cout]
    return y.reshape(n, ho, wo, cout)


def _head_forward(x_nhwc, layer):
    # Final Cout=1, 4x4 valid conv + sigmoid == (N, K) @ (K, 1); kept in plain
    # JAX (a Pallas call here is pure launch overhead, ~0% MXU fill).
    n = x_nhwc.shape[0]
    flat = x_nhwc.reshape(n, -1).astype(jnp.float32)   # (h, w, c) order matches weight
    logits = flat @ layer["w_kc_f32"]                  # (N, 1)
    return jax.nn.sigmoid(logits).reshape(-1)          # .view(-1, 1).squeeze(1)


def discriminator_forward(x_nchw, params):
    """x_nchw: (N, C, H, W) float32 -> (N,) float32 (sigmoid scores)."""
    n = x_nchw.shape[0]
    # bf16 activations end-to-end: cast BEFORE im2col (review item).
    x = jnp.transpose(x_nchw, (0, 2, 3, 1)).astype(jnp.bfloat16)   # NHWC
    for layer in params[:-1]:
        x = _run_conv_block(x, layer, n=n)
    return _head_forward(x, params[-1])


# ---------------------------------- main ------------------------------------ #

if __name__ == "__main__":
    feature_maps = 8
    image_channels = 3
    batch = 2
    H = W = 64   # DCGAN geometry: 64 -> 32 -> 16 -> 8 -> 4 -> 1

    root = jax.random.PRNGKey(0)
    x_key, p_key = jax.random.split(root)
    x = jax.random.normal(x_key, (batch, image_channels, H, W), jnp.float32)

    params = _make_params(p_key, feature_maps, image_channels)

    # jit the whole forward (params closed over as constants) so the im2col /
    # cast / BN-finish glue fuses and eager dispatch overhead disappears.
    forward = jax.jit(functools.partial(discriminator_forward, params=params))
    out = jax.block_until_ready(forward(x))

    assert out.shape == (batch,), out.shape
    assert bool(jnp.all(jnp.isfinite(out)))
    print("KERNEL_OK")
</pallas_src>

<mosaic_0001>
module attributes {stable_mosaic.version = 11 : i64} {
  func.func @_matmul_lrelu_kernel(%arg0: i32, %arg1: memref<512x48xbf16, #tpu.memory_space<vmem>>, %arg2: memref<48x128xbf16, #tpu.memory_space<vmem>>, %arg3: memref<512x128xbf16, #tpu.memory_space<vmem>>) attributes {dimension_semantics = [#tpu.dimension_semantics<parallel>], iteration_bounds = array<i64: 4>, scalar_prefetch = 0 : i64, scratch_operands = 0 : i64, tpu.core_type = #tpu.core_type<tc>, window_params = [{transform_indices = @transform_0, window_bounds = array<i64: 512, 48>}, {pipeline_mode = #tpu.pipeline_mode<synchronous>, transform_indices = @transform_1, window_bounds = array<i64: 48, 128>}, {transform_indices = @transform_2, window_bounds = array<i64: 512, 128>}]} {
    %c0 = arith.constant 0 : index
    %c0_0 = arith.constant 0 : index
    %0 = vector.load %arg1[%c0, %c0_0] : memref<512x48xbf16, #tpu.memory_space<vmem>>, vector<512x48xbf16>
    %c0_1 = arith.constant 0 : index
    %c0_2 = arith.constant 0 : index
    %1 = vector.load %arg2[%c0_1, %c0_2] : memref<48x128xbf16, #tpu.memory_space<vmem>>, vector<48x128xbf16>
    %cst = arith.constant dense<0.000000e+00> : vector<512x128xf32>
    %2 = tpu.matmul %0, %1, %cst {dimension_numbers = #tpu.dot_dimension_numbers<[1], [0], [0], [1], [0, 0, 1, 1], [], []>} : vector<512x48xbf16>, vector<48x128xbf16>, vector<512x128xf32> -> vector<512x128xf32>
    %cst_3 = arith.constant 0.000000e+00 : f32
    %3 = vector.broadcast %cst_3 : f32 to vector<512x128xf32>
    %4 = arith.cmpf ogt, %2, %3 : vector<512x128xf32>
    %cst_4 = arith.constant 2.000000e-01 : f32
    %5 = vector.broadcast %cst_4 : f32 to vector<512x128xf32>
    %6 = arith.mulf %5, %2 : vector<512x128xf32>
    %7 = arith.select %4, %2, %6 : vector<512x128xi1>, vector<512x128xf32>
    %8 = arith.truncf %7 : vector<512x128xf32> to vector<512x128xbf16>
    %c0_5 = arith.constant 0 : index
    %c0_6 = arith.constant 0 : index
    %9 = vector.load %arg3[%c0_5, %c0_6] : memref<512x128xbf16, #tpu.memory_space<vmem>>, vector<512x128xbf16>
    tpu.vector_store %arg3[%c0_5, %c0_6], %8 {strides = array<i32>} : memref<512x128xbf16, #tpu.memory_space<vmem>>, vector<512x128xbf16>,
    return
  }
  func.func @transform_0(%arg0: i32) -> (i32, i32) {
    %c0_i32 = arith.constant 0 : i32
    %c0_i32_0 = arith.constant 0 : i32
    return %arg0, %c0_i32 : i32, i32
  }
  func.func @transform_1(%arg0: i32) -> (i32, i32) {
    %c0_i32 = arith.constant 0 : i32
    %c0_i32_0 = arith.constant 0 : i32
    %c0_i32_1 = arith.constant 0 : i32
    return %c0_i32, %c0_i32_0 : i32, i32
  }
  func.func @transform_2(%arg0: i32) -> (i32, i32) {
    %c0_i32 = arith.constant 0 : i32
    %c0_i32_0 = arith.constant 0 : i32
    return %arg0, %c0_i32 : i32, i32
  }
}

module attributes {stable_mosaic.version = 11 : i64} {
  func.func @_matmul_bn_lrelu_kernel(%arg0: i32, %arg1: memref<512x128xbf16, #tpu.memory_space<vmem>>, %arg2: memref<128x128xbf16, #tpu.memory_space<vmem>>, %arg3: memref<1x128xf32, #tpu.memory_space<vmem>>, %arg4: memref<1x128xf32, #tpu.memory_space<vmem>>, %arg5: memref<512x128xbf16, #tpu.memory_space<vmem>>) attributes {dimension_semantics = [#tpu.dimension_semantics<parallel>], iteration_bounds = array<i64: 1>, scalar_prefetch = 0 : i64, scratch_operands = 0 : i64, tpu.core_type = #tpu.core_type<tc>, window_params = [{pipeline_mode = #tpu.pipeline_mode<synchronous>, transform_indices = @transform_0, window_bounds = array<i64: 512, 128>}, {pipeline_mode = #tpu.pipeline_mode<synchronous>, transform_indices = @transform_1, window_bounds = array<i64: 128, 128>}, {pipeline_mode = #tpu.pipeline_mode<synchronous>, transform_indices = @transform_2, window_bounds = array<i64: 1, 128>}, {pipeline_mode = #tpu.pipeline_mode<synchronous>, transform_indices = @transform_3, window_bounds = array<i64: 1, 128>}, {pipeline_mode = #tpu.pipeline_mode<synchronous>, transform_indices = @transform_4, window_bounds = array<i64: 512, 128>}]} {
    %c0 = arith.constant 0 : index
    %c0_0 = arith.constant 0 : index
    %0 = vector.load %arg1[%c0, %c0_0] : memref<512x128xbf16, #tpu.memory_space<vmem>>, vector<512x128xbf16>
    %c0_1 = arith.constant 0 : index
    %c0_2 = arith.constant 0 : index
    %1 = vector.load %arg2[%c0_1, %c0_2] : memref<128x128xbf16, #tpu.memory_space<vmem>>, vector<128x128xbf16>
    %cst = arith.constant dense<0.000000e+00> : vector<512x128xf32>
    %2 = tpu.matmul %0, %1, %cst {dimension_numbers = #tpu.dot_dimension_numbers<[1], [0], [0], [1], [0, 0, 1, 1], [], []>} : vector<512x128xbf16>, vector<128x128xbf16>, vector<512x128xf32> -> vector<512x128xf32>
    %cst_3 = arith.constant dense<0.000000e+00> : vector<128xf32>
    %3 = vector.multi_reduction <add>, %2, %cst_3 [0] : vector<512x128xf32> to vector<128xf32>
    %4 = vector.shape_cast %3 : vector<128xf32> to vector<1x128xf32>
    %cst_4 = arith.constant 0.001953125 : f32
    %5 = vector.broadcast %cst_4 : f32 to vector<1x128xf32>
    %6 = arith.mulf %4, %5 : vector<1x128xf32>
    %7 = arith.mulf %2, %2 : vector<512x128xf32>
    %cst_5 = arith.constant dense<0.000000e+00> : vector<128xf32>
    %8 = vector.multi_reduction <add>, %7, %cst_5 [0] : vector<512x128xf32> to vector<128xf32>
    %9 = vector.shape_cast %8 : vector<128xf32> to vector<1x128xf32>
    %cst_6 = arith.constant 0.001953125 : f32
    %10 = vector.broadcast %cst_6 : f32 to vector<1x128xf32>
    %11 = arith.mulf %9, %10 : vector<1x128xf32>
    %12 = arith.mulf %6, %6 : vector<1x128xf32>
    %13 = arith.subf %11, %12 : vector<1x128xf32>
    %cst_7 = arith.constant 0.000000e+00 : f32
    %14 = vector.broadcast %cst_7 : f32 to vector<1x128xf32>
    %15 = arith.maximumf %13, %14 : vector<1x128xf32>
    %c0_8 = arith.constant 0 : index
    %c0_9 = arith.constant 0 : index
    %16 = vector.load %arg3[%c0_8, %c0_9] : memref<1x128xf32, #tpu.memory_space<vmem>>, vector<1x128xf32>
    %cst_10 = arith.constant 9.99999974E-6 : f32
    %17 = vector.broadcast %cst_10 : f32 to vector<1x128xf32>
    %18 = arith.addf %15, %17 : vector<1x128xf32>
    %19 = math.rsqrt %18 : vector<1x128xf32>
    %20 = arith.mulf %16, %19 : vector<1x128xf32>
    %c0_11 = arith.constant 0 : index
    %c0_12 = arith.constant 0 : index
    %21 = vector.load %arg4[%c0_11, %c0_12] : memref<1x128xf32, #tpu.memory_space<vmem>>, vector<1x128xf32>
    %22 = arith.mulf %6, %20 : vector<1x128xf32>
    %23 = arith.subf %21, %22 : vector<1x128xf32>
    %24 = vector.broadcast %20 : vector<1x128xf32> to vector<512x128xf32>
    %25 = arith.mulf %2, %24 : vector<512x128xf32>
    %26 = vector.broadcast %23 : vector<1x128xf32> to vector<512x128xf32>
    %27 = arith.addf %25, %26 : vector<512x128xf32>
    %cst_13 = arith.constant 0.000000e+00 : f32
    %28 = vector.broadcast %cst_13 : f32 to vector<512x128xf32>
    %29 = arith.cmpf ogt, %27, %28 : vector<512x128xf32>
    %cst_14 = arith.constant 2.000000e-01 : f32
    %30 = vector.broadcast %cst_14 : f32 to vector<512x128xf32>
    %31 = arith.mulf %30, %27 : vector<512x128xf32>
    %32 = arith.select %29, %27, %31 : vector<512x128xi1>, vector<512x128xf32>
    %33 = arith.truncf %32 : vector<512x128xf32> to vector<512x128xbf16>
    %c0_15 = arith.constant 0 : index
    %c0_16 = arith.constant 0 : index
    %34 = vector.load %arg5[%c0_15, %c0_16] : memref<512x128xbf16, #tpu.memory_space<vmem>>, vector<512x128xbf16>
    tpu.vector_store %arg5[%c0_15, %c0_16], %33 {strides = array<i32>} : memref<512x128xbf16, #tpu.memory_space<vmem>>, vector<512x128xbf16>,
    return
  }
  func.func @transform_0(%arg0: i32) -> (i32, i32) {
    %c0_i32 = arith.constant 0 : i32
    %c0_i32_0 = arith.constant 0 : i32
    %c0_i32_1 = arith.constant 0 : i32
    return %c0_i32, %c0_i32_0 : i32, i32
  }
  func.func @transform_1(%arg0: i32) -> (i32, i32) {
    %c0_i32 = arith.constant 0 : i32
    %c0_i32_0 = arith.constant 0 : i32
    %c0_i32_1 = arith.constant 0 : i32
    return %c0_i32, %c0_i32_0 : i32, i32
  }
  func.func @transform_2(%arg0: i32) -> (i32, i32) {
    %c0_i32 = arith.constant 0 : i32
    %c0_i32_0 = arith.constant 0 : i32
    %c0_i32_1 = arith.constant 0 : i32
    return %c0_i32, %c0_i32_0 : i32, i32
  }
  func.func @transform_3(%arg0: i32) -> (i32, i32) {
    %c0_i32 = arith.constant 0 : i32
    %c0_i32_0 = arith.constant 0 : i32
    %c0_i32_1 = arith.constant 0 : i32
    return %c0_i32, %c0_i32_0 : i32, i32
  }
  func.func @transform_4(%arg0: i32) -> (i32, i32) {
    %c0_i32 = arith.constant 0 : i32
    %c0_i32_0 = arith.constant 0 : i32
    %c0_i32_1 = arith.constant 0 : i32
    return %c0_i32, %c0_i32_0 : i32, i32
  }
}

module attributes {stable_mosaic.version = 11 : i64} {
  func.func @_matmul_bn_lrelu_kernel(%arg0: i32, %arg1: memref<128x256xbf16, #tpu.memory_space<vmem>>, %arg2: memref<256x128xbf16, #tpu.memory_space<vmem>>, %arg3: memref<1x128xf32, #tpu.memory_space<vmem>>, %arg4: memref<1x128xf32, #tpu.memory_space<vmem>>, %arg5: memref<128x128xbf16, #tpu.memory_space<vmem>>) attributes {dimension_semantics = [#tpu.dimension_semantics<parallel>], iteration_bounds = array<i64: 1>, scalar_prefetch = 0 : i64, scratch_operands = 0 : i64, tpu.core_type = #tpu.core_type<tc>, window_params = [{pipeline_mode = #tpu.pipeline_mode<synchronous>, transform_indices = @transform_0, window_bounds = array<i64: 128, 256>}, {pipeline_mode = #tpu.pipeline_mode<synchronous>, transform_indices = @transform_1, window_bounds = array<i64: 256, 128>}, {pipeline_mode = #tpu.pipeline_mode<synchronous>, transform_indices = @transform_2, window_bounds = array<i64: 1, 128>}, {pipeline_mode = #tpu.pipeline_mode<synchronous>, transform_indices = @transform_3, window_bounds = array<i64: 1, 128>}, {pipeline_mode = #tpu.pipeline_mode<synchronous>, transform_indices = @transform_4, window_bounds = array<i64: 128, 128>}]} {
    %c0 = arith.constant 0 : index
    %c0_0 = arith.constant 0 : index
    %0 = vector.load %arg1[%c0, %c0_0] : memref<128x256xbf16, #tpu.memory_space<vmem>>, vector<128x256xbf16>
    %c0_1 = arith.constant 0 : index
    %c0_2 = arith.constant 0 : index
    %1 = vector.load %arg2[%c0_1, %c0_2] : memref<256x128xbf16, #tpu.memory_space<vmem>>, vector<256x128xbf16>
    %cst = arith.constant dense<0.000000e+00> : vector<128x128xf32>
    %2 = tpu.matmul %0, %1, %cst {dimension_numbers = #tpu.dot_dimension_numbers<[1], [0], [0], [1], [0, 0, 1, 1], [], []>} : vector<128x256xbf16>, vector<256x128xbf16>, vector<128x128xf32> -> vector<128x128xf32>
    %cst_3 = arith.constant dense<0.000000e+00> : vector<128xf32>
    %3 = vector.multi_reduction <add>, %2, %cst_3 [0] : vector<128x128xf32> to vector<128xf32>
    %4 = vector.shape_cast %3 : vector<128xf32> to vector<1x128xf32>
    %cst_4 = arith.constant 7.812500e-03 : f32
    %5 = vector.broadcast %cst_4 : f32 to vector<1x128xf32>
    %6 = arith.mulf %4, %5 : vector<1x128xf32>
    %7 = arith.mulf %2, %2 : vector<128x128xf32>
    %cst_5 = arith.constant dense<0.000000e+00> : vector<128xf32>
    %8 = vector.multi_reduction <add>, %7, %cst_5 [0] : vector<128x128xf32> to vector<128xf32>
    %9 = vector.shape_cast %8 : vector<128xf32> to vector<1x128xf32>
    %cst_6 = arith.constant 7.812500e-03 : f32
    %10 = vector.broadcast %cst_6 : f32 to vector<1x128xf32>
    %11 = arith.mulf %9, %10 : vector<1x128xf32>
    %12 = arith.mulf %6, %6 : vector<1x128xf32>
    %13 = arith.subf %11, %12 : vector<1x128xf32>
    %cst_7 = arith.constant 0.000000e+00 : f32
    %14 = vector.broadcast %cst_7 : f32 to vector<1x128xf32>
    %15 = arith.maximumf %13, %14 : vector<1x128xf32>
    %c0_8 = arith.constant 0 : index
    %c0_9 = arith.constant 0 : index
    %16 = vector.load %arg3[%c0_8, %c0_9] : memref<1x128xf32, #tpu.memory_space<vmem>>, vector<1x128xf32>
    %cst_10 = arith.constant 9.99999974E-6 : f32
    %17 = vector.broadcast %cst_10 : f32 to vector<1x128xf32>
    %18 = arith.addf %15, %17 : vector<1x128xf32>
    %19 = math.rsqrt %18 : vector<1x128xf32>
    %20 = arith.mulf %16, %19 : vector<1x128xf32>
    %c0_11 = arith.constant 0 : index
    %c0_12 = arith.constant 0 : index
    %21 = vector.load %arg4[%c0_11, %c0_12] : memref<1x128xf32, #tpu.memory_space<vmem>>, vector<1x128xf32>
    %22 = arith.mulf %6, %20 : vector<1x128xf32>
    %23 = arith.subf %21, %22 : vector<1x128xf32>
    %24 = vector.broadcast %20 : vector<1x128xf32> to vector<128x128xf32>
    %25 = arith.mulf %2, %24 : vector<128x128xf32>
    %26 = vector.broadcast %23 : vector<1x128xf32> to vector<128x128xf32>
    %27 = arith.addf %25, %26 : vector<128x128xf32>
    %cst_13 = arith.constant 0.000000e+00 : f32
    %28 = vector.broadcast %cst_13 : f32 to vector<128x128xf32>
    %29 = arith.cmpf ogt, %27, %28 : vector<128x128xf32>
    %cst_14 = arith.constant 2.000000e-01 : f32
    %30 = vector.broadcast %cst_14 : f32 to vector<128x128xf32>
    %31 = arith.mulf %30, %27 : vector<128x128xf32>
    %32 = arith.select %29, %27, %31 : vector<128x128xi1>, vector<128x128xf32>
    %33 = arith.truncf %32 : vector<128x128xf32> to vector<128x128xbf16>
    %c0_15 = arith.constant 0 : index
    %c0_16 = arith.constant 0 : index
    %34 = vector.load %arg5[%c0_15, %c0_16] : memref<128x128xbf16, #tpu.memory_space<vmem>>, vector<128x128xbf16>
    tpu.vector_store %arg5[%c0_15, %c0_16], %33 {strides = array<i32>} : memref<128x128xbf16, #tpu.memory_space<vmem>>, vector<128x128xbf16>,
    return
  }
  func.func @transform_0(%arg0: i32) -> (i32, i32) {
    %c0_i32 = arith.constant 0 : i32
    %c0_i32_0 = arith.constant 0 : i32
    %c0_i32_1 = arith.constant 0 : i32
    return %c0_i32, %c0_i32_0 : i32, i32
  }
  func.func @transform_1(%arg0: i32) -> (i32, i32) {
    %c0_i32 = arith.constant 0 : i32
    %c0_i32_0 = arith.constant 0 : i32
    %c0_i32_1 = arith.constant 0 : i32
    return %c0_i32, %c0_i32_0 : i32, i32
  }
  func.func @transform_2(%arg0: i32) -> (i32, i32) {
    %c0_i32 = arith.constant 0 : i32
    %c0_i32_0 = arith.constant 0 : i32
    %c0_i32_1 = arith.constant 0 : i32
    return %c0_i32, %c0_i32_0 : i32, i32
  }
  func.func @transform_3(%arg0: i32) -> (i32, i32) {
    %c0_i32 = arith.constant 0 : i32
    %c0_i32_0 = arith.constant 0 : i32
    %c0_i32_1 = arith.constant 0 : i32
    return %c0_i32, %c0_i32_0 : i32, i32
  }
  func.func @transform_4(%arg0: i32) -> (i32, i32) {
    %c0_i32 = arith.constant 0 : i32
    %c0_i32_0 = arith.constant 0 : i32
    %c0_i32_1 = arith.constant 0 : i32
    return %c0_i32, %c0_i32_0 : i32, i32
  }
}

module attributes {stable_mosaic.version = 11 : i64} {
  func.func @_matmul_bn_lrelu_kernel(%arg0: i32, %arg1: memref<32x512xbf16, #tpu.memory_space<vmem>>, %arg2: memref<512x128xbf16, #tpu.memory_space<vmem>>, %arg3: memref<1x128xf32, #tpu.memory_space<vmem>>, %arg4: memref<1x128xf32, #tpu.memory_space<vmem>>, %arg5: memref<32x128xbf16, #tpu.memory_space<vmem>>) attributes {dimension_semantics = [#tpu.dimension_semantics<parallel>], iteration_bounds = array<i64: 1>, scalar_prefetch = 0 : i64, scratch_operands = 0 : i64, tpu.core_type = #tpu.core_type<tc>, window_params = [{pipeline_mode = #tpu.pipeline_mode<synchronous>, transform_indices = @transform_0, window_bounds = array<i64: 32, 512>}, {pipeline_mode = #tpu.pipeline_mode<synchronous>, transform_indices = @transform_1, window_bounds = array<i64: 512, 128>}, {pipeline_mode = #tpu.pipeline_mode<synchronous>, transform_indices = @transform_2, window_bounds = array<i64: 1, 128>}, {pipeline_mode = #tpu.pipeline_mode<synchronous>, transform_indices = @transform_3, window_bounds = array<i64: 1, 128>}, {pipeline_mode = #tpu.pipeline_mode<synchronous>, transform_indices = @transform_4, window_bounds = array<i64: 32, 128>}]} {
    %c0 = arith.constant 0 : index
    %c0_0 = arith.constant 0 : index
    %0 = vector.load %arg1[%c0, %c0_0] : memref<32x512xbf16, #tpu.memory_space<vmem>>, vector<32x512xbf16>
    %c0_1 = arith.constant 0 : index
    %c0_2 = arith.constant 0 : index
    %1 = vector.load %arg2[%c0_1, %c0_2] : memref<512x128xbf16, #tpu.memory_space<vmem>>, vector<512x128xbf16>
    %cst = arith.constant dense<0.000000e+00> : vector<32x128xf32>
    %2 = tpu.matmul %0, %1, %cst {dimension_numbers = #tpu.dot_dimension_numbers<[1], [0], [0], [1], [0, 0, 1, 1], [], []>} : vector<32x512xbf16>, vector<512x128xbf16>, vector<32x128xf32> -> vector<32x128xf32>
    %cst_3 = arith.constant dense<0.000000e+00> : vector<128xf32>
    %3 = vector.multi_reduction <add>, %2, %cst_3 [0] : vector<32x128xf32> to vector<128xf32>
    %4 = vector.shape_cast %3 : vector<128xf32> to vector<1x128xf32>
    %cst_4 = arith.constant 3.125000e-02 : f32
    %5 = vector.broadcast %cst_4 : f32 to vector<1x128xf32>
    %6 = arith.mulf %4, %5 : vector<1x128xf32>
    %7 = arith.mulf %2, %2 : vector<32x128xf32>
    %cst_5 = arith.constant dense<0.000000e+00> : vector<128xf32>
    %8 = vector.multi_reduction <add>, %7, %cst_5 [0] : vector<32x128xf32> to vector<128xf32>
    %9 = vector.shape_cast %8 : vector<128xf32> to vector<1x128xf32>
    %cst_6 = arith.constant 3.125000e-02 : f32
    %10 = vector.broadcast %cst_6 : f32 to vector<1x128xf32>
    %11 = arith.mulf %9, %10 : vector<1x128xf32>
    %12 = arith.mulf %6, %6 : vector<1x128xf32>
    %13 = arith.subf %11, %12 : vector<1x128xf32>
    %cst_7 = arith.constant 0.000000e+00 : f32
    %14 = vector.broadcast %cst_7 : f32 to vector<1x128xf32>
    %15 = arith.maximumf %13, %14 : vector<1x128xf32>
    %c0_8 = arith.constant 0 : index
    %c0_9 = arith.constant 0 : index
    %16 = vector.load %arg3[%c0_8, %c0_9] : memref<1x128xf32, #tpu.memory_space<vmem>>, vector<1x128xf32>
    %cst_10 = arith.constant 9.99999974E-6 : f32
    %17 = vector.broadcast %cst_10 : f32 to vector<1x128xf32>
    %18 = arith.addf %15, %17 : vector<1x128xf32>
    %19 = math.rsqrt %18 : vector<1x128xf32>
    %20 = arith.mulf %16, %19 : vector<1x128xf32>
    %c0_11 = arith.constant 0 : index
    %c0_12 = arith.constant 0 : index
    %21 = vector.load %arg4[%c0_11, %c0_12] : memref<1x128xf32, #tpu.memory_space<vmem>>, vector<1x128xf32>
    %22 = arith.mulf %6, %20 : vector<1x128xf32>
    %23 = arith.subf %21, %22 : vector<1x128xf32>
    %24 = vector.broadcast %20 : vector<1x128xf32> to vector<32x128xf32>
    %25 = arith.mulf %2, %24 : vector<32x128xf32>
    %26 = vector.broadcast %23 : vector<1x128xf32> to vector<32x128xf32>
    %27 = arith.addf %25, %26 : vector<32x128xf32>
    %cst_13 = arith.constant 0.000000e+00 : f32
    %28 = vector.broadcast %cst_13 : f32 to vector<32x128xf32>
    %29 = arith.cmpf ogt, %27, %28 : vector<32x128xf32>
    %cst_14 = arith.constant 2.000000e-01 : f32
    %30 = vector.broadcast %cst_14 : f32 to vector<32x128xf32>
    %31 = arith.mulf %30, %27 : vector<32x128xf32>
    %32 = arith.select %29, %27, %31 : vector<32x128xi1>, vector<32x128xf32>
    %33 = arith.truncf %32 : vector<32x128xf32> to vector<32x128xbf16>
    %c0_15 = arith.constant 0 : index
    %c0_16 = arith.constant 0 : index
    %34 = vector.load %arg5[%c0_15, %c0_16] : memref<32x128xbf16, #tpu.memory_space<vmem>>, vector<32x128xbf16>
    tpu.vector_store %arg5[%c0_15, %c0_16], %33 {strides = array<i32>} : memref<32x128xbf16, #tpu.memory_space<vmem>>, vector<32x128xbf16>,
    return
  }
  func.func @transform_0(%arg0: i32) -> (i32, i32) {
    %c0_i32 = arith.constant 0 : i32
    %c0_i32_0 = arith.constant 0 : i32
    %c0_i32_1 = arith.constant 0 : i32
    return %c0_i32, %c0_i32_0 : i32, i32
  }
  func.func @transform_1(%arg0: i32) -> (i32, i32) {
    %c0_i32 = arith.constant 0 : i32
    %c0_i32_0 = arith.constant 0 : i32
    %c0_i32_1 = arith.constant 0 : i32
    return %c0_i32, %c0_i32_0 : i32, i32
  }
  func.func @transform_2(%arg0: i32) -> (i32, i32) {
    %c0_i32 = arith.constant 0 : i32
    %c0_i32_0 = arith.constant 0 : i32
    %c0_i32_1 = arith.constant 0 : i32
    return %c0_i32, %c0_i32_0 : i32, i32
  }
  func.func @transform_3(%arg0: i32) -> (i32, i32) {
    %c0_i32 = arith.constant 0 : i32
    %c0_i32_0 = arith.constant 0 : i32
    %c0_i32_1 = arith.constant 0 : i32
    return %c0_i32, %c0_i32_0 : i32, i32
  }
  func.func @transform_4(%arg0: i32) -> (i32, i32) {
    %c0_i32 = arith.constant 0 : i32
    %c0_i32_0 = arith.constant 0 : i32
    %c0_i32_1 = arith.constant 0 : i32
    return %c0_i32, %c0_i32_0 : i32, i32
  }
}

</mosaic_0001>

<bundles_post_ra>
// kernel: discriminator_forward.4
= control target key start
LH: loop header
LB: loop body
LE: loop exit
PB: predicated region body
PF: predicated region fallthrough
CT: control target
= control target key end

     0   :  { %s1924_s9 = smov 0   ;;  %s2066_s0 = inlined_call_operand.vmem [shape: bf16[2048,48], index: 0, kind: input, shape index: {}]   ;;  %s2067_s1 = inlined_call_operand.vmem [shape: bf16[48,128], index: 1, kind: input, shape index: {}]   ;;  %s2068_s2 = inlined_call_operand.vmem [shape: bf16[2048,128], index: 2, kind: output, shape index: {}]  }
   0x1 LB: > { %s1350_s10 = sadd.s32 4294967295, %s1907_s9   ;;  %p1354_p0 = scmp.ge.s32.totalorder %s1907_s9, 1  ;;  %s1907_s9 = sphi %s1924_s9, %s12_s9  }
   0x2   : > { %p113_p1 = scmp.lt.s32.totalorder %s1907_s9, 5 }
   0x4   : > { %p114_p2 = pnand %p1354_p0, %p113_p1 }
   0x5   : > { %s1355_s13 = sshll.u32 (!%p114_p2), %s1350_s10, 6 }
   0x6   : > { %117 = sbr.rel (%p114_p2) target bundleno = 286 (0x11e), region = 28  ;;  %p136_p3 = scmp.lt.s32.totalorder (!%p114_p2), %s1355_s13, 255 }
   0xb   : > { %v1866_v0 = vld [vmem:[%s2067_s1 + $0x10] sm:$0xff]   ;;  %v1867_v1 = vld [vmem:[%s2067_s1 + $0x8] sm:$0xff]   ;;  %s2070_s13 = smov (!%p136_p3, %s1355_s13), 255  ;;  %v1868_v2 = vld [vmem:[%s2067_s1] sm:$0xff]   ;;  %vm396_vm0 = vcmask 392192  }
   0xc   : > { %1782 = vmatprep.subr.bf16.mxu0 %v1866_v0  ;;  %1852 = vmatprep.subr.bf16.mxu1 %v1866_v0  ;;  %s1356_s18 = sshll.u32 %s2070_s13, 2 }
   0xd   : > { %1783 = vmatpush3.bf16.msra.mxu0 %v1866_v0  ;;  %1855 = vmatpush3.bf16.msra.mxu1 %v1866_v0  ;;  %s1949_s21 = scalar_lea.vmem %s2066_s0, %s1356_s18  ;;  %s2020_s24 = scalar_lea.vmem %s2068_s2, %s1356_s18 }
   0xe   : > { %1784 = vmatprep.subr.bf16.mxu0 %v1867_v1  ;;  %1853 = vmatprep.subr.bf16.mxu1 %v1867_v1  ;;  %v1869_v3 = vld [vmem:[%s1949_s21] sm:$0xff]   ;;  %v1871_v5 = vld [vmem:[%s1949_s21 + $0x8] sm:$0xff]   ;;  %v1873_v7 = vld [vmem:[%s1949_s21 + $0x10] sm:$0xff]  }
   0xf   : > { %v1870_v4 = vld [vmem:[%s1949_s21 + $0x80] sm:$0xff]   ;;  %1788 = vmatprep.mubr.msk.bf16.mxu0 %vm396_vm0, %v1869_v3  ;;  %v1872_v6 = vld [vmem:[%s1949_s21 + $0x88] sm:$0xff]   ;;  %v1874_v8 = vld [vmem:[%s1949_s21 + $0x90] sm:$0xff]  }
  0x10   : > { %1820 = vmatprep.mubr.msk.bf16.mxu1 %vm396_vm0, %v1870_v4  ;;  %v1875_v9 = vld [vmem:[%s1949_s21 + $0x18] sm:$0xff]   ;;  %v1877_v11 = vld [vmem:[%s1949_s21 + $0x20] sm:$0xff]   ;;  %v1879_v13 = vld [vmem:[%s1949_s21 + $0x28] sm:$0xff]  }
  0x11   : > { %1785 = vmatpush3.bf16.msra.mxu0 %v1867_v1  ;;  %1856 = vmatpush3.bf16.msra.mxu1 %v1867_v1  ;;  %v1876_v10 = vld [vmem:[%s1949_s21 + $0x98] sm:$0xff]   ;;  %v1878_v12 = vld [vmem:[%s1949_s21 + $0xa0] sm:$0xff]   ;;  %v1880_v14 = vld [vmem:[%s1949_s21 + $0xa8] sm:$0xff]  }
  0x12   : > { %1786 = vmatprep.subr.bf16.mxu0 %v1868_v2  ;;  %1854 = vmatprep.subr.bf16.mxu1 %v1868_v2  ;;  %v1881_v15 = vld [vmem:[%s1949_s21 + $0x30] sm:$0xff]   ;;  %v1883_v17 = vld [vmem:[%s1949_s21 + $0x38] sm:$0xff]   ;;  %v1885_v19 = vld [vmem:[%s1949_s21 + $0x40] sm:$0xff]  }
  0x13   : > { %v1882_v16 = vld [vmem:[%s1949_s21 + $0xb0] sm:$0xff]   ;;  %v1884_v18 = vld [vmem:[%s1949_s21 + $0xb8] sm:$0xff]   ;;  %v1886_v20 = vld [vmem:[%s1949_s21 + $0xc0] sm:$0xff]  }
  0x14   : > { %v1887_v21 = vld [vmem:[%s1949_s21 + $0x48] sm:$0xff]   ;;  %v1889_v23 = vld [vmem:[%s1949_s21 + $0x50] sm:$0xff]   ;;  %v1891_v25 = vld [vmem:[%s1949_s21 + $0x58] sm:$0xff]  }
  0x15   : > { %1787 = vmatpush3.bf16.msra.mxu0 %v1868_v2  ;;  %1857 = vmatpush3.bf16.msra.mxu1 %v1868_v2  ;;  %v1888_v22 = vld [vmem:[%s1949_s21 + $0xc8] sm:$0xff]   ;;  %v1890_v24 = vld [vmem:[%s1949_s21 + $0xd0] sm:$0xff]   ;;  %v1892_v26 = vld [vmem:[%s1949_s21 + $0xd8] sm:$0xff]  }
  0x16   : > { %v1893_v27 = vld [vmem:[%s1949_s21 + $0x60] sm:$0xff]   ;;  %v1895_v29 = vld [vmem:[%s1949_s21 + $0x68] sm:$0xff]   ;;  %v1897_v31 = vld [vmem:[%s1949_s21 + $0x70] sm:$0xff]  }
  0x17   : > { %v1894_v28 = vld [vmem:[%s1949_s21 + $0xe0] sm:$0xff]   ;;  %v1896_v30 = vld [vmem:[%s1949_s21 + $0xe8] sm:$0xff]   ;;  %v1898_v32 = vld [vmem:[%s1949_s21 + $0xf0] sm:$0xff]  }
  0x18   : > { %1789 = vmatmul.mubr.msk.bf16.vlgmr.msra.gmra.mxu0 %vm396_vm0, %v1871_v5  ;;  %1821 = vmatmul.mubr.msk.bf16.vlgmr.msra.gmra.mxu1 %vm396_vm0, %v1872_v6  ;;  %v1899_v33 = vld [vmem:[%s1949_s21 + $0x78] sm:$0xff]  }
  0x19   : > { %1792 = vmatprep.mubr.msk.bf16.mxu0 %vm396_vm0, %v1873_v7  ;;  %1824 = vmatprep.mubr.msk.bf16.mxu1 %vm396_vm0, %v1874_v8  ;;  %v1900_v34 = vld [vmem:[%s1949_s21 + $0xf8] sm:$0xff]  }
  0x20   : > { %1793 = vmatmul.mubr.msk.bf16.gmra.mxu0 %vm396_vm0, %v1875_v9  ;;  %1825 = vmatmul.mubr.msk.bf16.gmra.mxu1 %vm396_vm0, %v1876_v10 }
  0x21   : > { %1796 = vmatprep.mubr.msk.bf16.mxu0 %vm396_vm0, %v1877_v11  ;;  %1828 = vmatprep.mubr.msk.bf16.mxu1 %vm396_vm0, %v1878_v12 }
  0x28   : > { %1797 = vmatmul.mubr.msk.bf16.gmra.mxu0 %vm396_vm0, %v1879_v13  ;;  %1829 = vmatmul.mubr.msk.bf16.gmra.mxu1 %vm396_vm0, %v1880_v14 }
  0x29   : > { %1800 = vmatprep.mubr.msk.bf16.mxu0 %vm396_vm0, %v1881_v15  ;;  %1832 = vmatprep.mubr.msk.bf16.mxu1 %vm396_vm0, %v1882_v16 }
  0x30   : > { %1801 = vmatmul.mubr.msk.bf16.gmra.mxu0 %vm396_vm0, %v1883_v17  ;;  %1833 = vmatmul.mubr.msk.bf16.gmra.mxu1 %vm396_vm0, %v1884_v18 }
  0x31   : > { %1804 = vmatprep.mubr.msk.bf16.mxu0 %vm396_vm0, %v1885_v19  ;;  %1836 = vmatprep.mubr.msk.bf16.mxu1 %vm396_vm0, %v1886_v20 }
  0x38   : > { %1805 = vmatmul.mubr.msk.bf16.gmra.mxu0 %vm396_vm0, %v1887_v21  ;;  %1837 = vmatmul.mubr.msk.bf16.gmra.mxu1 %vm396_vm0, %v1888_v22 }
  0x39   : > { %1808 = vmatprep.mubr.msk.bf16.mxu0 %vm396_vm0, %v1889_v23  ;;  %1840 = vmatprep.mubr.msk.bf16.mxu1 %vm396_vm0, %v1890_v24 }
  0x40   : > { %1809 = vmatmul.mubr.msk.bf16.gmra.mxu0 %vm396_vm0, %v1891_v25  ;;  %1841 = vmatmul.mubr.msk.bf16.gmra.mxu1 %vm396_vm0, %v1892_v26 }
  0x41   : > { %1812 = vmatprep.mubr.msk.bf16.mxu0 %vm396_vm0, %v1893_v27  ;;  %1844 = vmatprep.mubr.msk.bf16.mxu1 %vm396_vm0, %v1894_v28 }
  0x48   : > { %1813 = vmatmul.mubr.msk.bf16.gmra.mxu0 %vm396_vm0, %v1895_v29  ;;  %1845 = vmatmul.mubr.msk.bf16.gmra.mxu1 %vm396_vm0, %v1896_v30 }
  0x49   : > { %1816 = vmatprep.mubr.msk.bf16.mxu0 %vm396_vm0, %v1897_v31  ;;  %1848 = vmatprep.mubr.msk.bf16.mxu1 %vm396_vm0, %v1898_v32 }
  0x50   : > { %1817 = vmatmul.mubr.msk.bf16.gmra.mxu0 %vm396_vm0, %v1899_v33  ;;  %1849 = vmatmul.mubr.msk.bf16.gmra.mxu1 %vm396_vm0, %v1900_v34 }
  0xd8   : > { %v1790_v35 = vpop.f32.mrf.mxu0  ;;  %v1822_v36 = vpop.f32.mrf.mxu1 }
  0xd9   : > { %vm784_vm1 = vcmp.gt.f32.partialorder %v1790_v35, 0.0  ;;  %v848_v37 = vmul.f32 0.2, %v1790_v35  ;;  %v880_v38 = vmul.f32 0.2, %v1822_v36  ;;  %vm816_vm2 = vcmp.gt.f32.partialorder %v1822_v36, 0.0 }
  0xda   : > { %v527_v39 = vpop.f32.mrf.mxu0  ;;  %v655_v40 = vpop.f32.mrf.mxu1 }
  0xdb   : > { %v912_v41 = vsel %vm784_vm1, %v1790_v35, %v848_v37  ;;  %v846_v42 = vmul.f32 0.2, %v527_v39  ;;  %vm782_vm3 = vcmp.gt.f32.partialorder %v527_v39, 0.0  ;;  %v944_v46 = vsel %vm816_vm2, %v1822_v36, %v880_v38 }
  0xdc   : > { %v1791_v43 = vpop.f32.mrf.mxu0  ;;  %v1823_v44 = vpop.f32.mrf.mxu1  ;;  %vm814_vm6 = vcmp.gt.f32.partialorder %v655_v40, 0.0  ;;  %v878_v47 = vmul.f32 0.2, %v655_v40 }
  0xdd   : > { %vm785_vm4 = vcmp.gt.f32.partialorder %v1791_v43, 0.0  ;;  %v849_v45 = vmul.f32 0.2, %v1791_v43  ;;  %vm817_vm5 = vcmp.gt.f32.partialorder %v1823_v44, 0.0  ;;  %v881_v48 = vmul.f32 0.2, %v1823_v44 }
  0xde   : > { %v530_v49 = vpop.f32.mrf.mxu0  ;;  %v658_v50 = vpop.f32.mrf.mxu1  ;;  %v910_v53 = vsel %vm782_vm3, %v527_v39, %v846_v42  ;;  %v942_v62 = vsel %vm814_vm6, %v655_v40, %v878_v47 }
  0xdf   : > { %v913_v51 = vsel %vm785_vm4, %v1791_v43, %v849_v45  ;;  %vm783_vm7 = vcmp.gt.f32.partialorder %v530_v49, 0.0  ;;  %v847_v52 = vmul.f32 0.2, %v530_v49  ;;  %vm815_vm8 = vcmp.gt.f32.partialorder %v658_v50, 0.0 }
  0xe0   : > { %v1564_v54 = vpack.c.bf16 %v913_v51, %v912_v41  ;;  %v945_v55 = vsel %vm817_vm5, %v1823_v44, %v881_v48  ;;  %v879_v56 = vmul.f32 0.2, %v658_v50  ;;  %v1794_v57 = vpop.f32.mrf.mxu0  ;;  %v1826_v58 = vpop.f32.mrf.mxu1 }
  0xe1   : > { %v1644_v59 = vpack.c.bf16 %v945_v55, %v944_v46  ;;  %v911_v60 = vsel %vm783_vm7, %v530_v49, %v847_v52  ;;  %vm788_vm9 = vcmp.gt.f32.partialorder %v1794_v57, 0.0  ;;  %v852_v61 = vmul.f32 0.2, %v1794_v57 }
  0xe2   : > { %1716 = vst [vmem:[%s2020_s24 + $0x8] sm:$0xff] %v1564_v54   ;;  %v1559_v63 = vpack.c.bf16 %v911_v60, %v910_v53  ;;  %v943_v0 = vsel %vm815_vm8, %v658_v50, %v879_v56  ;;  %v884_v1 = vmul.f32 0.2, %v1826_v58  ;;  %v543_v2 = vpop.f32.mrf.mxu0  ;;  %v671_v3 = vpop.f32.mrf.mxu1  ;;  %vm820_vm10 = vcmp.gt.f32.partialorder %v1826_v58, 0.0 }
  0xe3   : > { %1732 = vst [vmem:[%s2020_s24 + $0x88] sm:$0xff] %v1644_v59   ;;  %v1639_v4 = vpack.c.bf16 %v943_v0, %v942_v62  ;;  %v916_v5 = vsel %vm788_vm9, %v1794_v57, %v852_v61  ;;  %v850_v6 = vmul.f32 0.2, %v543_v2  ;;  %vm786_vm11 = vcmp.gt.f32.partialorder %v543_v2, 0.0 }
  0xe4   : > { %1560 = vst [vmem:[%s2020_s24] sm:$0xff] %v1559_v63   ;;  %v1795_v7 = vpop.f32.mrf.mxu0  ;;  %v1827_v8 = vpop.f32.mrf.mxu1  ;;  %v948_v10 = vsel %vm820_vm10, %v1826_v58, %v884_v1  ;;  %vm818_vm14 = vcmp.gt.f32.partialorder %v671_v3, 0.0  ;;  %v882_v11 = vmul.f32 0.2, %v671_v3 }
  0xe5   : > { %1731 = vst [vmem:[%s2020_s24 + $0x80] sm:$0xff] %v1639_v4   ;;  %vm789_vm12 = vcmp.gt.f32.partialorder %v1795_v7, 0.0  ;;  %v853_v9 = vmul.f32 0.2, %v1795_v7  ;;  %vm821_vm13 = vcmp.gt.f32.partialorder %v1827_v8, 0.0  ;;  %v914_v17 = vsel %vm786_vm11, %v543_v2, %v850_v6 }
  0xe6   : > { %v885_v12 = vmul.f32 0.2, %v1827_v8  ;;  %v546_v13 = vpop.f32.mrf.mxu0  ;;  %v674_v14 = vpop.f32.mrf.mxu1  ;;  %v946_v26 = vsel %vm818_vm14, %v671_v3, %v882_v11 }
  0xe7   : > { %v917_v15 = vsel %vm789_vm12, %v1795_v7, %v853_v9  ;;  %vm787_vm15 = vcmp.gt.f32.partialorder %v546_v13, 0.0  ;;  %v851_v16 = vmul.f32 0.2, %v546_v13  ;;  %vm819_vm0 = vcmp.gt.f32.partialorder %v674_v14, 0.0 }
  0xe8   : > { %v1574_v18 = vpack.c.bf16 %v917_v15, %v916_v5  ;;  %v949_v19 = vsel %vm821_vm13, %v1827_v8, %v885_v12  ;;  %v883_v20 = vmul.f32 0.2, %v674_v14  ;;  %v1798_v21 = vpop.f32.mrf.mxu0  ;;  %v1830_v22 = vpop.f32.mrf.mxu1 }
  0xe9   : > { %v1654_v23 = vpack.c.bf16 %v949_v19, %v948_v10  ;;  %v915_v24 = vsel %vm787_vm15, %v546_v13, %v851_v16  ;;  %vm792_vm1 = vcmp.gt.f32.partialorder %v1798_v21, 0.0  ;;  %v856_v25 = vmul.f32 0.2, %v1798_v21 }
  0xea   : > { %1718 = vst [vmem:[%s2020_s24 + $0x18] sm:$0xff] %v1574_v18   ;;  %v1569_v27 = vpack.c.bf16 %v915_v24, %v914_v17  ;;  %v947_v28 = vsel %vm819_vm0, %v674_v14, %v883_v20  ;;  %v888_v29 = vmul.f32 0.2, %v1830_v22  ;;  %v559_v30 = vpop.f32.mrf.mxu0  ;;  %v687_v31 = vpop.f32.mrf.mxu1  ;;  %vm824_vm2 = vcmp.gt.f32.partialorder %v1830_v22, 0.0 }
  0xeb   : > { %1734 = vst [vmem:[%s2020_s24 + $0x98] sm:$0xff] %v1654_v23   ;;  %v1649_v32 = vpack.c.bf16 %v947_v28, %v946_v26  ;;  %v920_v33 = vsel %vm792_vm1, %v1798_v21, %v856_v25  ;;  %v854_v34 = vmul.f32 0.2, %v559_v30  ;;  %vm790_vm3 = vcmp.gt.f32.partialorder %v559_v30, 0.0 }
  0xec   : > { %1717 = vst [vmem:[%s2020_s24 + $0x10] sm:$0xff] %v1569_v27   ;;  %v1799_v35 = vpop.f32.mrf.mxu0  ;;  %v1831_v36 = vpop.f32.mrf.mxu1  ;;  %v952_v38 = vsel %vm824_vm2, %v1830_v22, %v888_v29  ;;  %vm822_vm6 = vcmp.gt.f32.partialorder %v687_v31, 0.0  ;;  %v886_v39 = vmul.f32 0.2, %v687_v31 }
  0xed   : > { %1733 = vst [vmem:[%s2020_s24 + $0x90] sm:$0xff] %v1649_v32   ;;  %vm793_vm4 = vcmp.gt.f32.partialorder %v1799_v35, 0.0  ;;  %v857_v37 = vmul.f32 0.2, %v1799_v35  ;;  %vm825_vm5 = vcmp.gt.f32.partialorder %v1831_v36, 0.0  ;;  %v918_v45 = vsel %vm790_vm3, %v559_v30, %v854_v34 }
  0xee   : > { %v889_v40 = vmul.f32 0.2, %v1831_v36  ;;  %v562_v41 = vpop.f32.mrf.mxu0  ;;  %v690_v42 = vpop.f32.mrf.mxu1  ;;  %v950_v54 = vsel %vm822_vm6, %v687_v31, %v886_v39 }
  0xef   : > { %v921_v43 = vsel %vm793_vm4, %v1799_v35, %v857_v37  ;;  %vm791_vm7 = vcmp.gt.f32.partialorder %v562_v41, 0.0  ;;  %v855_v44 = vmul.f32 0.2, %v562_v41  ;;  %vm823_vm8 = vcmp.gt.f32.partialorder %v690_v42, 0.0 }
  0xf0   : > { %v1584_v46 = vpack.c.bf16 %v921_v43, %v920_v33  ;;  %v953_v47 = vsel %vm825_vm5, %v1831_v36, %v889_v40  ;;  %v887_v48 = vmul.f32 0.2, %v690_v42  ;;  %v1802_v49 = vpop.f32.mrf.mxu0  ;;  %v1834_v50 = vpop.f32.mrf.mxu1 }
  0xf1   : > { %v1664_v51 = vpack.c.bf16 %v953_v47, %v952_v38  ;;  %v919_v52 = vsel %vm791_vm7, %v562_v41, %v855_v44  ;;  %vm796_vm9 = vcmp.gt.f32.partialorder %v1802_v49, 0.0  ;;  %v860_v53 = vmul.f32 0.2, %v1802_v49 }
  0xf2   : > { %1720 = vst [vmem:[%s2020_s24 + $0x28] sm:$0xff] %v1584_v46   ;;  %v1579_v55 = vpack.c.bf16 %v919_v52, %v918_v45  ;;  %v951_v56 = vsel %vm823_vm8, %v690_v42, %v887_v48  ;;  %v892_v57 = vmul.f32 0.2, %v1834_v50  ;;  %v575_v58 = vpop.f32.mrf.mxu0  ;;  %v703_v59 = vpop.f32.mrf.mxu1  ;;  %vm828_vm10 = vcmp.gt.f32.partialorder %v1834_v50, 0.0 }
  0xf3   : > { %1736 = vst [vmem:[%s2020_s24 + $0xa8] sm:$0xff] %v1664_v51   ;;  %v1659_v60 = vpack.c.bf16 %v951_v56, %v950_v54  ;;  %v924_v61 = vsel %vm796_vm9, %v1802_v49, %v860_v53  ;;  %v858_v62 = vmul.f32 0.2, %v575_v58  ;;  %vm794_vm11 = vcmp.gt.f32.partialorder %v575_v58, 0.0 }
  0xf4   : > { %1719 = vst [vmem:[%s2020_s24 + $0x20] sm:$0xff] %v1579_v55   ;;  %v1803_v63 = vpop.f32.mrf.mxu0  ;;  %v1835_v0 = vpop.f32.mrf.mxu1  ;;  %v956_v2 = vsel %vm828_vm10, %v1834_v50, %v892_v57  ;;  %vm826_vm14 = vcmp.gt.f32.partialorder %v703_v59, 0.0  ;;  %v890_v3 = vmul.f32 0.2, %v703_v59 }
  0xf5   : > { %1735 = vst [vmem:[%s2020_s24 + $0xa0] sm:$0xff] %v1659_v60   ;;  %vm797_vm12 = vcmp.gt.f32.partialorder %v1803_v63, 0.0  ;;  %v861_v1 = vmul.f32 0.2, %v1803_v63  ;;  %vm829_vm13 = vcmp.gt.f32.partialorder %v1835_v0, 0.0  ;;  %v922_v9 = vsel %vm794_vm11, %v575_v58, %v858_v62 }
  0xf6   : > { %v893_v4 = vmul.f32 0.2, %v1835_v0  ;;  %v578_v5 = vpop.f32.mrf.mxu0  ;;  %v706_v6 = vpop.f32.mrf.mxu1  ;;  %v954_v18 = vsel %vm826_vm14, %v703_v59, %v890_v3 }
  0xf7   : > { %v925_v7 = vsel %vm797_vm12, %v1803_v63, %v861_v1  ;;  %vm795_vm15 = vcmp.gt.f32.partialorder %v578_v5, 0.0  ;;  %v859_v8 = vmul.f32 0.2, %v578_v5  ;;  %vm827_vm0 = vcmp.gt.f32.partialorder %v706_v6, 0.0 }
  0xf8   : > { %v1594_v10 = vpack.c.bf16 %v925_v7, %v924_v61  ;;  %v957_v11 = vsel %vm829_vm13, %v1835_v0, %v893_v4  ;;  %v891_v12 = vmul.f32 0.2, %v706_v6  ;;  %v1806_v13 = vpop.f32.mrf.mxu0  ;;  %v1838_v14 = vpop.f32.mrf.mxu1 }
  0xf9   : > { %v1674_v15 = vpack.c.bf16 %v957_v11, %v956_v2  ;;  %v923_v16 = vsel %vm795_vm15, %v578_v5, %v859_v8  ;;  %vm800_vm1 = vcmp.gt.f32.partialorder %v1806_v13, 0.0  ;;  %v864_v17 = vmul.f32 0.2, %v1806_v13 }
  0xfa   : > { %1722 = vst [vmem:[%s2020_s24 + $0x38] sm:$0xff] %v1594_v10   ;;  %v1589_v19 = vpack.c.bf16 %v923_v16, %v922_v9  ;;  %v955_v20 = vsel %vm827_vm0, %v706_v6, %v891_v12  ;;  %v896_v21 = vmul.f32 0.2, %v1838_v14  ;;  %v591_v22 = vpop.f32.mrf.mxu0  ;;  %v719_v23 = vpop.f32.mrf.mxu1  ;;  %vm832_vm2 = vcmp.gt.f32.partialorder %v1838_v14, 0.0 }
  0xfb   : > { %1738 = vst [vmem:[%s2020_s24 + $0xb8] sm:$0xff] %v1674_v15   ;;  %v1669_v24 = vpack.c.bf16 %v955_v20, %v954_v18  ;;  %v928_v25 = vsel %vm800_vm1, %v1806_v13, %v864_v17  ;;  %v862_v26 = vmul.f32 0.2, %v591_v22  ;;  %vm798_vm3 = vcmp.gt.f32.partialorder %v591_v22, 0.0 }
  0xfc   : > { %1721 = vst [vmem:[%s2020_s24 + $0x30] sm:$0xff] %v1589_v19   ;;  %v1807_v27 = vpop.f32.mrf.mxu0  ;;  %v1839_v28 = vpop.f32.mrf.mxu1  ;;  %v960_v30 = vsel %vm832_vm2, %v1838_v14, %v896_v21  ;;  %vm830_vm6 = vcmp.gt.f32.partialorder %v719_v23, 0.0  ;;  %v894_v31 = vmul.f32 0.2, %v719_v23 }
  0xfd   : > { %1737 = vst [vmem:[%s2020_s24 + $0xb0] sm:$0xff] %v1669_v24   ;;  %vm801_vm4 = vcmp.gt.f32.partialorder %v1807_v27, 0.0  ;;  %v865_v29 = vmul.f32 0.2, %v1807_v27  ;;  %vm833_vm5 = vcmp.gt.f32.partialorder %v1839_v28, 0.0  ;;  %v926_v37 = vsel %vm798_vm3, %v591_v22, %v862_v26 }
  0xfe   : > { %v897_v32 = vmul.f32 0.2, %v1839_v28  ;;  %v594_v33 = vpop.f32.mrf.mxu0  ;;  %v722_v34 = vpop.f32.mrf.mxu1  ;;  %v958_v46 = vsel %vm830_vm6, %v719_v23, %v894_v31 }
  0xff   : > { %v929_v35 = vsel %vm801_vm4, %v1807_v27, %v865_v29  ;;  %vm799_vm7 = vcmp.gt.f32.partialorder %v594_v33, 0.0  ;;  %v863_v36 = vmul.f32 0.2, %v594_v33  ;;  %vm831_vm8 = vcmp.gt.f32.partialorder %v722_v34, 0.0 }
 0x100   : > { %v1604_v38 = vpack.c.bf16 %v929_v35, %v928_v25  ;;  %v961_v39 = vsel %vm833_vm5, %v1839_v28, %v897_v32  ;;  %v895_v40 = vmul.f32 0.2, %v722_v34  ;;  %v1810_v41 = vpop.f32.mrf.mxu0  ;;  %v1842_v42 = vpop.f32.mrf.mxu1 }
 0x101   : > { %v1684_v43 = vpack.c.bf16 %v961_v39, %v960_v30  ;;  %v927_v44 = vsel %vm799_vm7, %v594_v33, %v863_v36  ;;  %vm804_vm9 = vcmp.gt.f32.partialorder %v1810_v41, 0.0  ;;  %v868_v45 = vmul.f32 0.2, %v1810_v41 }
 0x102   : > { %1724 = vst [vmem:[%s2020_s24 + $0x48] sm:$0xff] %v1604_v38   ;;  %v1599_v47 = vpack.c.bf16 %v927_v44, %v926_v37  ;;  %v959_v48 = vsel %vm831_vm8, %v722_v34, %v895_v40  ;;  %v900_v49 = vmul.f32 0.2, %v1842_v42  ;;  %v607_v50 = vpop.f32.mrf.mxu0  ;;  %v735_v51 = vpop.f32.mrf.mxu1  ;;  %vm836_vm10 = vcmp.gt.f32.partialorder %v1842_v42, 0.0 }
 0x103   : > { %1740 = vst [vmem:[%s2020_s24 + $0xc8] sm:$0xff] %v1684_v43   ;;  %v1679_v52 = vpack.c.bf16 %v959_v48, %v958_v46  ;;  %v932_v53 = vsel %vm804_vm9, %v1810_v41, %v868_v45  ;;  %v866_v54 = vmul.f32 0.2, %v607_v50  ;;  %vm802_vm11 = vcmp.gt.f32.partialorder %v607_v50, 0.0 }
 0x104   : > { %1723 = vst [vmem:[%s2020_s24 + $0x40] sm:$0xff] %v1599_v47   ;;  %v1811_v55 = vpop.f32.mrf.mxu0  ;;  %v1843_v56 = vpop.f32.mrf.mxu1  ;;  %v964_v58 = vsel %vm836_vm10, %v1842_v42, %v900_v49  ;;  %vm834_vm14 = vcmp.gt.f32.partialorder %v735_v51, 0.0  ;;  %v898_v59 = vmul.f32 0.2, %v735_v51 }
 0x105   : > { %1739 = vst [vmem:[%s2020_s24 + $0xc0] sm:$0xff] %v1679_v52   ;;  %vm805_vm12 = vcmp.gt.f32.partialorder %v1811_v55, 0.0  ;;  %v869_v57 = vmul.f32 0.2, %v1811_v55  ;;  %vm837_vm13 = vcmp.gt.f32.partialorder %v1843_v56, 0.0  ;;  %v930_v1 = vsel %vm802_vm11, %v607_v50, %v866_v54 }
 0x106   : > { %v901_v60 = vmul.f32 0.2, %v1843_v56  ;;  %v610_v61 = vpop.f32.mrf.mxu0  ;;  %v738_v62 = vpop.f32.mrf.mxu1  ;;  %v962_v10 = vsel %vm834_vm14, %v735_v51, %v898_v59 }
 0x107   : > { %v933_v63 = vsel %vm805_vm12, %v1811_v55, %v869_v57  ;;  %vm803_vm15 = vcmp.gt.f32.partialorder %v610_v61, 0.0  ;;  %v867_v0 = vmul.f32 0.2, %v610_v61  ;;  %vm835_vm0 = vcmp.gt.f32.partialorder %v738_v62, 0.0 }
 0x108   : > { %v1614_v2 = vpack.c.bf16 %v933_v63, %v932_v53  ;;  %v965_v3 = vsel %vm837_vm13, %v1843_v56, %v901_v60  ;;  %v899_v4 = vmul.f32 0.2, %v738_v62  ;;  %v1814_v5 = vpop.f32.mrf.mxu0  ;;  %v1846_v6 = vpop.f32.mrf.mxu1 }
 0x109   : > { %v1694_v7 = vpack.c.bf16 %v965_v3, %v964_v58  ;;  %v931_v8 = vsel %vm803_vm15, %v610_v61, %v867_v0  ;;  %vm808_vm1 = vcmp.gt.f32.partialorder %v1814_v5, 0.0  ;;  %v872_v9 = vmul.f32 0.2, %v1814_v5 }
 0x10a   : > { %1726 = vst [vmem:[%s2020_s24 + $0x58] sm:$0xff] %v1614_v2   ;;  %v1609_v11 = vpack.c.bf16 %v931_v8, %v930_v1  ;;  %v963_v12 = vsel %vm835_vm0, %v738_v62, %v899_v4  ;;  %v904_v13 = vmul.f32 0.2, %v1846_v6  ;;  %v623_v14 = vpop.f32.mrf.mxu0  ;;  %v751_v15 = vpop.f32.mrf.mxu1  ;;  %vm840_vm2 = vcmp.gt.f32.partialorder %v1846_v6, 0.0 }
 0x10b   : > { %1742 = vst [vmem:[%s2020_s24 + $0xd8] sm:$0xff] %v1694_v7   ;;  %v1689_v16 = vpack.c.bf16 %v963_v12, %v962_v10  ;;  %v936_v17 = vsel %vm808_vm1, %v1814_v5, %v872_v9  ;;  %v870_v18 = vmul.f32 0.2, %v623_v14  ;;  %vm806_vm3 = vcmp.gt.f32.partialorder %v623_v14, 0.0 }
 0x10c   : > { %1725 = vst [vmem:[%s2020_s24 + $0x50] sm:$0xff] %v1609_v11   ;;  %v1815_v19 = vpop.f32.mrf.mxu0  ;;  %v1847_v20 = vpop.f32.mrf.mxu1  ;;  %v968_v22 = vsel %vm840_vm2, %v1846_v6, %v904_v13  ;;  %vm838_vm6 = vcmp.gt.f32.partialorder %v751_v15, 0.0  ;;  %v902_v23 = vmul.f32 0.2, %v751_v15 }
 0x10d   : > { %1741 = vst [vmem:[%s2020_s24 + $0xd0] sm:$0xff] %v1689_v16   ;;  %vm809_vm4 = vcmp.gt.f32.partialorder %v1815_v19, 0.0  ;;  %v873_v21 = vmul.f32 0.2, %v1815_v19  ;;  %vm841_vm5 = vcmp.gt.f32.partialorder %v1847_v20, 0.0  ;;  %v934_v29 = vsel %vm806_vm3, %v623_v14, %v870_v18 }
 0x10e   : > { %v905_v24 = vmul.f32 0.2, %v1847_v20  ;;  %v626_v25 = vpop.f32.mrf.mxu0  ;;  %v754_v26 = vpop.f32.mrf.mxu1  ;;  %v966_v38 = vsel %vm838_vm6, %v751_v15, %v902_v23 }
 0x10f   : > { %v937_v27 = vsel %vm809_vm4, %v1815_v19, %v873_v21  ;;  %vm807_vm7 = vcmp.gt.f32.partialorder %v626_v25, 0.0  ;;  %v871_v28 = vmul.f32 0.2, %v626_v25  ;;  %vm839_vm8 = vcmp.gt.f32.partialorder %v754_v26, 0.0 }
 0x110   : > { %v1624_v30 = vpack.c.bf16 %v937_v27, %v936_v17  ;;  %v969_v31 = vsel %vm841_vm5, %v1847_v20, %v905_v24  ;;  %v903_v32 = vmul.f32 0.2, %v754_v26  ;;  %v1818_v33 = vpop.f32.mrf.mxu0  ;;  %v1850_v34 = vpop.f32.mrf.mxu1 }
 0x111   : > { %v1704_v35 = vpack.c.bf16 %v969_v31, %v968_v22  ;;  %v935_v36 = vsel %vm807_vm7, %v626_v25, %v871_v28  ;;  %vm812_vm9 = vcmp.gt.f32.partialorder %v1818_v33, 0.0  ;;  %v876_v37 = vmul.f32 0.2, %v1818_v33 }
 0x112   : > { %1728 = vst [vmem:[%s2020_s24 + $0x68] sm:$0xff] %v1624_v30   ;;  %v1619_v39 = vpack.c.bf16 %v935_v36, %v934_v29  ;;  %v967_v40 = vsel %vm839_vm8, %v754_v26, %v903_v32  ;;  %v639_v41 = vpop.f32.mrf.mxu0  ;;  %v767_v42 = vpop.f32.mrf.mxu1  ;;  %vm844_vm10 = vcmp.gt.f32.partialorder %v1850_v34, 0.0  ;;  %v908_v45 = vmul.f32 0.2, %v1850_v34 }
 0x113   : > { %1744 = vst [vmem:[%s2020_s24 + $0xe8] sm:$0xff] %v1704_v35   ;;  %v1699_v43 = vpack.c.bf16 %v967_v40, %v966_v38  ;;  %v940_v44 = vsel %vm812_vm9, %v1818_v33, %v876_v37  ;;  %v874_v48 = vmul.f32 0.2, %v639_v41  ;;  %vm810_vm13 = vcmp.gt.f32.partialorder %v639_v41, 0.0 }
 0x114   : > { %1727 = vst [vmem:[%s2020_s24 + $0x60] sm:$0xff] %v1619_v39   ;;  %v1819_v46 = vpop.f32.mrf.mxu0  ;;  %v1851_v47 = vpop.f32.mrf.mxu1  ;;  %vm842_vm14 = vcmp.gt.f32.partialorder %v767_v42, 0.0  ;;  %v906_v50 = vmul.f32 0.2, %v767_v42  ;;  %v972_v56 = vsel %vm844_vm10, %v1850_v34, %v908_v45 }
 0x115   : > { %1743 = vst [vmem:[%s2020_s24 + $0xe0] sm:$0xff] %v1699_v43   ;;  %vm813_vm11 = vcmp.gt.f32.partialorder %v1819_v46, 0.0  ;;  %v877_v49 = vmul.f32 0.2, %v1819_v46  ;;  %vm845_vm12 = vcmp.gt.f32.partialorder %v1851_v47, 0.0  ;;  %v938_v60 = vsel %vm810_vm13, %v639_v41, %v874_v48 }
 0x116   : > { %v909_v51 = vmul.f32 0.2, %v1851_v47  ;;  %v642_v52 = vpop.f32.mrf.mxu0  ;;  %v770_v53 = vpop.f32.mrf.mxu1  ;;  %v970_v63 = vsel %vm842_vm14, %v767_v42, %v906_v50 }
 0x117   : > { %v941_v54 = vsel %vm813_vm11, %v1819_v46, %v877_v49  ;;  %vm811_vm15 = vcmp.gt.f32.partialorder %v642_v52, 0.0  ;;  %v875_v55 = vmul.f32 0.2, %v642_v52  ;;  %vm843_vm0 = vcmp.gt.f32.partialorder %v770_v53, 0.0 }
 0x118   : > { %v1634_v57 = vpack.c.bf16 %v941_v54, %v940_v44  ;;  %v973_v58 = vsel %vm845_vm12, %v1851_v47, %v909_v51  ;;  %v907_v59 = vmul.f32 0.2, %v770_v53 }
 0x119   : > { %v1714_v61 = vpack.c.bf16 %v973_v58, %v972_v56  ;;  %v939_v62 = vsel %vm811_vm15, %v642_v52, %v875_v55 }
 0x11a   : > { %1730 = vst [vmem:[%s2020_s24 + $0x78] sm:$0xff] %v1634_v57   ;;  %v1629_v0 = vpack.c.bf16 %v939_v62, %v938_v60  ;;  %v971_v1 = vsel %vm843_vm0, %v770_v53, %v907_v59 }
 0x11b   : > { %1746 = vst [vmem:[%s2020_s24 + $0xf8] sm:$0xff] %v1714_v61   ;;  %v1709_v2 = vpack.c.bf16 %v971_v1, %v970_v63 }
 0x11c   : > { %1729 = vst [vmem:[%s2020_s24 + $0x70] sm:$0xff] %v1629_v0  }
 0x11d   : > { %1745 = vst [vmem:[%s2020_s24 + $0xf0] sm:$0xff] %v1709_v2  }
 0x11e PF: > { %s12_s9 = sadd.s32 1, %s1907_s9  }
 0x11f   : > { %p9_p4 = scmp.ge.s32.totalorder %s12_s9, 6  }
 0x121   :  { %11 = sbr.rel (!%p9_p4) target bundleno = 1 (0x1), region = 58 }

// kernel: discriminator_forward.5
= control target key start
LH: loop header
LB: loop body
LE: loop exit
PB: predicated region body
PF: predicated region fallthrough
CT: control target
= control target key end

     0   :  { %s3758_s1 = inlined_call_operand.vmem [shape: bf16[128,128], index: 1, kind: input, shape index: {}]   ;;  %s3759_s0 = inlined_call_operand.vmem [shape: bf16[512,128], index: 0, kind: input, shape index: {}]   ;;  %s3760_s2 = inlined_call_operand.vmem [shape: f32[1,128], index: 2, kind: input, shape index: {}]   ;;  %s3761_s3 = inlined_call_operand.vmem [shape: f32[1,128], index: 3, kind: input, shape index: {}]   ;;  %s3762_s4 = inlined_call_operand.vmem [shape: bf16[512,128], index: 4, kind: output, shape index: {}]  }
   0x1   :  { %v1992_v0 = vld [vmem:[%s3758_s1 + $0x38] sm:$0xff]   ;;  %v1993_v1 = vld [vmem:[%s3758_s1 + $0x30] sm:$0xff]   ;;  %v1994_v2 = vld [vmem:[%s3758_s1 + $0x28] sm:$0xff]  }
   0x2   :  { %1896 = vmatprep.subr.bf16.mxu0 %v1992_v0  ;;  %1976 = vmatprep.subr.bf16.mxu1 %v1992_v0  ;;  %v1995_v3 = vld [vmem:[%s3758_s1 + $0x20] sm:$0xff]   ;;  %v1996_v5 = vld [vmem:[%s3758_s1 + $0x18] sm:$0xff]   ;;  %v1997_v6 = vld [vmem:[%s3758_s1 + $0x10] sm:$0xff]  }
   0x3   :  { %1897 = vmatpush3.bf16.msra.mxu0 %v1992_v0  ;;  %1984 = vmatpush3.bf16.msra.mxu1 %v1992_v0  ;;  %v2000_v4 = vld [vmem:[%s3759_s0] sm:$0xff]   ;;  %v1998_v7 = vld [vmem:[%s3758_s1 + $0x8] sm:$0xff]   ;;  %v2002_v11 = vld [vmem:[%s3759_s0 + $0x10] sm:$0xff]  }
   0x4   :  { %1898 = vmatprep.subr.bf16.mxu0 %v1993_v1  ;;  %1977 = vmatprep.subr.bf16.mxu1 %v1993_v1  ;;  %v1999_v8 = vld [vmem:[%s3758_s1] sm:$0xff]   ;;  %v2001_v10 = vld [vmem:[%s3759_s0 + $0x8] sm:$0xff]   ;;  %v2018_v13 = vld [vmem:[%s3759_s0 + $0x90] sm:$0xff]  }
   0x5   :  { %1912 = vmatprep.mubr.bf16.mxu0 %v2000_v4  ;;  %v2016_v9 = vld [vmem:[%s3759_s0 + $0x80] sm:$0xff]   ;;  %v2017_v12 = vld [vmem:[%s3759_s0 + $0x88] sm:$0xff]   ;;  %v2003_v14 = vld [vmem:[%s3759_s0 + $0x18] sm:$0xff]  }
   0x6   :  { %1944 = vmatprep.mubr.bf16.mxu1 %v2016_v9  ;;  %v2004_v15 = vld [vmem:[%s3759_s0 + $0x20] sm:$0xff]   ;;  %v2019_v16 = vld [vmem:[%s3759_s0 + $0x98] sm:$0xff]   ;;  %v2005_v18 = vld [vmem:[%s3759_s0 + $0x28] sm:$0xff]  }
   0x7   :  { %1899 = vmatpush3.bf16.msra.mxu0 %v1993_v1  ;;  %1985 = vmatpush3.bf16.msra.mxu1 %v1993_v1  ;;  %v2020_v17 = vld [vmem:[%s3759_s0 + $0xa0] sm:$0xff]   ;;  %v2021_v19 = vld [vmem:[%s3759_s0 + $0xa8] sm:$0xff]   ;;  %v2006_v20 = vld [vmem:[%s3759_s0 + $0x30] sm:$0xff]  }
   0x8   :  { %1900 = vmatprep.subr.bf16.mxu0 %v1994_v2  ;;  %1978 = vmatprep.subr.bf16.mxu1 %v1994_v2  ;;  %v2022_v21 = vld [vmem:[%s3759_s0 + $0xb0] sm:$0xff]   ;;  %v2007_v22 = vld [vmem:[%s3759_s0 + $0x38] sm:$0xff]   ;;  %v2008_v24 = vld [vmem:[%s3759_s0 + $0x40] sm:$0xff]  }
   0x9   :  { %v2023_v23 = vld [vmem:[%s3759_s0 + $0xb8] sm:$0xff]   ;;  %v2024_v25 = vld [vmem:[%s3759_s0 + $0xc0] sm:$0xff]   ;;  %v2009_v26 = vld [vmem:[%s3759_s0 + $0x48] sm:$0xff]  }
   0xa   :  { %v2025_v27 = vld [vmem:[%s3759_s0 + $0xc8] sm:$0xff]   ;;  %v2010_v28 = vld [vmem:[%s3759_s0 + $0x50] sm:$0xff]   ;;  %v2011_v30 = vld [vmem:[%s3759_s0 + $0x58] sm:$0xff]  }
   0xb   :  { %1901 = vmatpush3.bf16.msra.mxu0 %v1994_v2  ;;  %1986 = vmatpush3.bf16.msra.mxu1 %v1994_v2  ;;  %v2026_v29 = vld [vmem:[%s3759_s0 + $0xd0] sm:$0xff]   ;;  %v2027_v31 = vld [vmem:[%s3759_s0 + $0xd8] sm:$0xff]   ;;  %v2012_v32 = vld [vmem:[%s3759_s0 + $0x60] sm:$0xff]  }
   0xc   :  { %1902 = vmatprep.subr.bf16.mxu0 %v1995_v3  ;;  %1979 = vmatprep.subr.bf16.mxu1 %v1995_v3  ;;  %v2028_v33 = vld [vmem:[%s3759_s0 + $0xe0] sm:$0xff]   ;;  %v2013_v34 = vld [vmem:[%s3759_s0 + $0x68] sm:$0xff]   ;;  %v2014_v36 = vld [vmem:[%s3759_s0 + $0x70] sm:$0xff]  }
   0xd   :  { %v2029_v35 = vld [vmem:[%s3759_s0 + $0xe8] sm:$0xff]   ;;  %v2030_v37 = vld [vmem:[%s3759_s0 + $0xf0] sm:$0xff]   ;;  %v2015_v38 = vld [vmem:[%s3759_s0 + $0x78] sm:$0xff]  }
   0xe   :  { %v2031_v39 = vld [vmem:[%s3759_s0 + $0xf8] sm:$0xff]  }
   0xf   :  { %1903 = vmatpush3.bf16.msra.mxu0 %v1995_v3  ;;  %1987 = vmatpush3.bf16.msra.mxu1 %v1995_v3 }
  0x10   :  { %1904 = vmatprep.subr.bf16.mxu0 %v1996_v5  ;;  %1980 = vmatprep.subr.bf16.mxu1 %v1996_v5 }
  0x13   :  { %1905 = vmatpush3.bf16.msra.mxu0 %v1996_v5  ;;  %1988 = vmatpush3.bf16.msra.mxu1 %v1996_v5 }
  0x14   :  { %1906 = vmatprep.subr.bf16.mxu0 %v1997_v6  ;;  %1981 = vmatprep.subr.bf16.mxu1 %v1997_v6 }
  0x17   :  { %1907 = vmatpush3.bf16.msra.mxu0 %v1997_v6  ;;  %1989 = vmatpush3.bf16.msra.mxu1 %v1997_v6 }
  0x18   :  { %1908 = vmatprep.subr.bf16.mxu0 %v1998_v7  ;;  %1982 = vmatprep.subr.bf16.mxu1 %v1998_v7 }
  0x1b   :  { %1909 = vmatpush3.bf16.msra.mxu0 %v1998_v7  ;;  %1990 = vmatpush3.bf16.msra.mxu1 %v1998_v7 }
  0x1c   :  { %1910 = vmatprep.subr.bf16.mxu0 %v1999_v8  ;;  %1983 = vmatprep.subr.bf16.mxu1 %v1999_v8 }
  0x1f   :  { %1911 = vmatpush3.bf16.msra.mxu0 %v1999_v8  ;;  %1991 = vmatpush3.bf16.msra.mxu1 %v1999_v8 }
  0x22   :  { %1913 = vmatmul.mubr.bf16.vlgmr.msra.gmra.mxu0 %v2001_v10  ;;  %1945 = vmatmul.mubr.bf16.vlgmr.msra.gmra.mxu1 %v2017_v12 }
  0x23   :  { %1916 = vmatprep.mubr.bf16.mxu0 %v2002_v11  ;;  %1948 = vmatprep.mubr.bf16.mxu1 %v2018_v13 }
  0x2a   :  { %1917 = vmatmul.mubr.bf16.gmra.mxu0 %v2003_v14  ;;  %1949 = vmatmul.mubr.bf16.gmra.mxu1 %v2019_v16 }
  0x2b   :  { %1920 = vmatprep.mubr.bf16.mxu0 %v2004_v15  ;;  %1952 = vmatprep.mubr.bf16.mxu1 %v2020_v17 }
  0x32   :  { %1921 = vmatmul.mubr.bf16.gmra.mxu0 %v2005_v18  ;;  %1953 = vmatmul.mubr.bf16.gmra.mxu1 %v2021_v19 }
  0x33   :  { %1924 = vmatprep.mubr.bf16.mxu0 %v2006_v20  ;;  %1956 = vmatprep.mubr.bf16.mxu1 %v2022_v21 }
  0x3a   :  { %1925 = vmatmul.mubr.bf16.gmra.mxu0 %v2007_v22  ;;  %1957 = vmatmul.mubr.bf16.gmra.mxu1 %v2023_v23 }
  0x3b   :  { %1928 = vmatprep.mubr.bf16.mxu0 %v2008_v24  ;;  %1960 = vmatprep.mubr.bf16.mxu1 %v2024_v25 }
  0x42   :  { %1929 = vmatmul.mubr.bf16.gmra.mxu0 %v2009_v26  ;;  %1961 = vmatmul.mubr.bf16.gmra.mxu1 %v2025_v27 }
  0x43   :  { %1932 = vmatprep.mubr.bf16.mxu0 %v2010_v28  ;;  %1964 = vmatprep.mubr.bf16.mxu1 %v2026_v29 }
  0x4a   :  { %1933 = vmatmul.mubr.bf16.gmra.mxu0 %v2011_v30  ;;  %1965 = vmatmul.mubr.bf16.gmra.mxu1 %v2027_v31 }
  0x4b   :  { %1936 = vmatprep.mubr.bf16.mxu0 %v2012_v32  ;;  %1968 = vmatprep.mubr.bf16.mxu1 %v2028_v33 }
  0x52   :  { %1937 = vmatmul.mubr.bf16.gmra.mxu0 %v2013_v34  ;;  %1969 = vmatmul.mubr.bf16.gmra.mxu1 %v2029_v35 }
  0x53   :  { %1940 = vmatprep.mubr.bf16.mxu0 %v2014_v36  ;;  %1972 = vmatprep.mubr.bf16.mxu1 %v2030_v37 }
  0x5a   :  { %1941 = vmatmul.mubr.bf16.gmra.mxu0 %v2015_v38  ;;  %1973 = vmatmul.mubr.bf16.gmra.mxu1 %v2031_v39 }
  0xe2   :  { %v2179_v40 = vpop.f32.mrf.mxu0  ;;  %v2181_v41 = vpop.f32.mrf.mxu1 }
  0xe3   :  { %v699_v51 = vmul.f32 %v2179_v40, %v2179_v40 }
  0xe4   :  { %v2183_v42 = vpop.f32.mrf.mxu0  ;;  %v2187_v44 = vpop.f32.mrf.mxu1 }
  0xe5   :  { %3820 = vst [vmem:[#allocation2_spill] sm:$0xff] %v2187_v44  ;;  %v697_v46 = vmul.f32 %v2183_v42, %v2183_v42 }
  0xe6   :  { %v2185_v43 = vpop.f32.mrf.mxu0  ;;  %v2199_v50 = vpop.f32.mrf.mxu1 }
  0xe7   :  { %v700_v55 = vmul.f32 %v2185_v43, %v2185_v43 }
  0xe8   :  { %v2189_v45 = vpop.f32.mrf.mxu0  ;;  %v2211_v59 = vpop.f32.mrf.mxu1 }
  0xe9   :  { %v627_v47 = vadd.f32 %v2189_v45, %v2183_v42  ;;  %v698_v48 = vmul.f32 %v2189_v45, %v2189_v45  ;;  %3821 = vst [vmem:[#allocation3_spill] sm:$0xff] %v2211_v59 }
  0xea   :  { %v2197_v49 = vpop.f32.mrf.mxu0  ;;  %v2223_v4 = vpop.f32.mrf.mxu1 }
  0xeb   :  { %v628_v52 = vadd.f32 %v2179_v40, %v627_v47  ;;  %v761_v53 = vadd.f32 %v698_v48, %v697_v46  ;;  %v703_v5 = vmul.f32 %v2197_v49, %v2197_v49 }
  0xec   :  { %v2204_v54 = vpop.f32.mrf.mxu0  ;;  %v2235_v13 = vpop.f32.mrf.mxu1 }
  0xed   :  { %v762_v56 = vadd.f32 %v761_v53, %v699_v51  ;;  %v629_v57 = vadd.f32 %v2185_v43, %v628_v52  ;;  %v701_v61 = vmul.f32 %v2204_v54, %v2204_v54  ;;  %3822 = vst [vmem:[#allocation4_spill] sm:$0xff] %v2235_v13 }
  0xee   :  { %v2209_v58 = vpop.f32.mrf.mxu0  ;;  %v2247_v22 = vpop.f32.mrf.mxu1 }
  0xef   :  { %v630_v60 = vadd.f32 %v629_v57, %v2204_v54  ;;  %v763_v62 = vadd.f32 %v762_v56, %v700_v55  ;;  %v704_v9 = vmul.f32 %v2209_v58, %v2209_v58 }
  0xf0   :  { %v2216_v63 = vpop.f32.mrf.mxu0  ;;  %v2259_v31 = vpop.f32.mrf.mxu1 }
  0xf1   :  { %v764_v0 = vadd.f32 %v763_v62, %v701_v61  ;;  %v631_v1 = vadd.f32 %v630_v60, %v2216_v63  ;;  %v702_v2 = vmul.f32 %v2216_v63, %v2216_v63  ;;  %3823 = vst [vmem:[#allocation5_spill] sm:$0xff] %v2259_v31 }
  0xf2   :  { %v2221_v3 = vpop.f32.mrf.mxu0  ;;  %v2271_v46 = vpop.f32.mrf.mxu1 }
  0xf3   :  { %v632_v6 = vadd.f32 %v2197_v49, %v631_v1  ;;  %v765_v7 = vadd.f32 %v764_v0, %v702_v2  ;;  %v707_v23 = vmul.f32 %v2221_v3, %v2221_v3 }
  0xf4   :  { %v2228_v8 = vpop.f32.mrf.mxu0  ;;  %v2283_v60 = vpop.f32.mrf.mxu1 }
  0xf5   :  { %v766_v10 = vadd.f32 %v765_v7, %v703_v5  ;;  %v633_v11 = vadd.f32 %v2209_v58, %v632_v6  ;;  %v705_v15 = vmul.f32 %v2228_v8, %v2228_v8  ;;  %3824 = vst [vmem:[#allocation6_spill] sm:$0xff] %v2283_v60 }
  0xf6   :  { %v2233_v12 = vpop.f32.mrf.mxu0 }
  0xf7   :  { %v634_v14 = vadd.f32 %v633_v11, %v2228_v8  ;;  %v767_v16 = vadd.f32 %v766_v10, %v704_v9  ;;  %v708_v27 = vmul.f32 %v2233_v12, %v2233_v12  ;;  %v2295_v9 = vpop.f32.mrf.mxu1 }
  0xf8   :  { %v2240_v17 = vpop.f32.mrf.mxu0 }
  0xf9   :  { %v768_v18 = vadd.f32 %v767_v16, %v705_v15  ;;  %v635_v19 = vadd.f32 %v634_v14, %v2240_v17  ;;  %v706_v20 = vmul.f32 %v2240_v17, %v2240_v17 }
  0xfa   :  { %v2245_v21 = vpop.f32.mrf.mxu0 }
  0xfb   :  { %v636_v24 = vadd.f32 %v2221_v3, %v635_v19  ;;  %v769_v25 = vadd.f32 %v768_v18, %v706_v20  ;;  %v711_v47 = vmul.f32 %v2245_v21, %v2245_v21 }
  0xfc   :  { %v2252_v26 = vpop.f32.mrf.mxu0 }
  0xfd   :  { %v770_v28 = vadd.f32 %v769_v25, %v707_v23  ;;  %v637_v29 = vadd.f32 %v2233_v12, %v636_v24  ;;  %v709_v33 = vmul.f32 %v2252_v26, %v2252_v26  ;;  %v2307_v23 = vpop.f32.mrf.mxu1 }
  0xfe   :  { %v2257_v30 = vpop.f32.mrf.mxu0  ;;  %3825 = vst [vmem:[#allocation7_spill] sm:$0xff] %v2307_v23 }
  0xff   :  { %v638_v32 = vadd.f32 %v637_v29, %v2252_v26  ;;  %v771_v34 = vadd.f32 %v770_v28, %v708_v27  ;;  %v712_v53 = vmul.f32 %v2257_v30, %v2257_v30 }
 0x100   :  { %v2264_v35 = vpop.f32.mrf.mxu0 }
 0x101   :  { %v772_v36 = vadd.f32 %v771_v34, %v709_v33  ;;  %v639_v37 = vadd.f32 %v638_v32, %v2264_v35  ;;  %v710_v38 = vmul.f32 %v2264_v35, %v2264_v35 }
 0x102   :  { %v2269_v39 = vpop.f32.mrf.mxu0 }
 0x103   :  { %v640_v48 = vadd.f32 %v2245_v21, %v639_v37  ;;  %v773_v51 = vadd.f32 %v772_v36, %v710_v38  ;;  %v715_v10 = vmul.f32 %v2269_v39, %v2269_v39  ;;  %v2319_v36 = vpop.f32.mrf.mxu1 }
 0x104   :  { %v2276_v52 = vpop.f32.mrf.mxu0 }
 0x105   :  { %v774_v55 = vadd.f32 %v773_v51, %v711_v47  ;;  %v641_v56 = vadd.f32 %v2257_v30, %v640_v48  ;;  %v713_v62 = vmul.f32 %v2276_v52, %v2276_v52 }
 0x106   :  { %v2281_v57 = vpop.f32.mrf.mxu0 }
 0x107   :  { %v642_v61 = vadd.f32 %v641_v56, %v2276_v52  ;;  %v775_v0 = vadd.f32 %v774_v55, %v712_v53  ;;  %v716_v16 = vmul.f32 %v2281_v57, %v2281_v57 }
 0x108   :  { %v2288_v1 = vpop.f32.mrf.mxu0 }
 0x109   :  { %v776_v2 = vadd.f32 %v775_v0, %v713_v62  ;;  %v643_v5 = vadd.f32 %v642_v61, %v2288_v1  ;;  %v714_v6 = vmul.f32 %v2288_v1, %v2288_v1  ;;  %v2331_v61 = vpop.f32.mrf.mxu1 }
 0x10a   :  { %v2293_v7 = vpop.f32.mrf.mxu0  ;;  %3826 = vst [vmem:[#allocation8_spill] sm:$0xff] %v2331_v61 }
 0x10b   :  { %v644_v11 = vadd.f32 %v2269_v39, %v643_v5  ;;  %v777_v14 = vadd.f32 %v776_v2, %v714_v6  ;;  %v719_v37 = vmul.f32 %v2293_v7, %v2293_v7 }
 0x10c   :  { %v2300_v15 = vpop.f32.mrf.mxu0 }
 0x10d   :  { %v778_v18 = vadd.f32 %v777_v14, %v715_v10  ;;  %v645_v19 = vadd.f32 %v2281_v57, %v644_v11  ;;  %v717_v25 = vmul.f32 %v2300_v15, %v2300_v15 }
 0x10e   :  { %v2305_v20 = vpop.f32.mrf.mxu0 }
 0x10f   :  { %v646_v24 = vadd.f32 %v645_v19, %v2300_v15  ;;  %v779_v27 = vadd.f32 %v778_v18, %v716_v16  ;;  %v720_v51 = vmul.f32 %v2305_v20, %v2305_v20  ;;  %v2343_v16 = vpop.f32.mrf.mxu1 }
 0x110   :  { %v2312_v28 = vpop.f32.mrf.mxu0  ;;  %3827 = vst [vmem:[#allocation9_spill] sm:$0xff] %v2343_v16 }
 0x111   :  { %v780_v29 = vadd.f32 %v779_v27, %v717_v25  ;;  %v647_v32 = vadd.f32 %v646_v24, %v2312_v28  ;;  %v718_v33 = vmul.f32 %v2312_v28, %v2312_v28 }
 0x112   :  { %v2317_v34 = vpop.f32.mrf.mxu0 }
 0x113   :  { %v648_v38 = vadd.f32 %v2293_v7, %v647_v32  ;;  %v781_v47 = vadd.f32 %v780_v29, %v718_v33  ;;  %v723_v18 = vmul.f32 %v2317_v34, %v2317_v34 }
 0x114   :  { %v2324_v48 = vpop.f32.mrf.mxu0 }
 0x115   :  { %v782_v53 = vadd.f32 %v781_v47, %v719_v37  ;;  %v649_v55 = vadd.f32 %v2305_v20, %v648_v38  ;;  %v721_v0 = vmul.f32 %v2324_v48, %v2324_v48  ;;  %v2355_v37 = vpop.f32.mrf.mxu1 }
 0x116   :  { %v2329_v56 = vpop.f32.mrf.mxu0  ;;  %3828 = vst [vmem:[#allocation10_spill] sm:$0xff] %v2355_v37 }
 0x117   :  { %v650_v62 = vadd.f32 %v649_v55, %v2324_v48  ;;  %v783_v2 = vadd.f32 %v782_v53, %v720_v51  ;;  %v724_v27 = vmul.f32 %v2329_v56, %v2329_v56 }
 0x118   :  { %v2336_v5 = vpop.f32.mrf.mxu0 }
 0x119   :  { %v784_v6 = vadd.f32 %v783_v2, %v721_v0  ;;  %v651_v10 = vadd.f32 %v650_v62, %v2336_v5  ;;  %v722_v11 = vmul.f32 %v2336_v5, %v2336_v5  ;;  %v2365_v2 = vpop.f32.mrf.mxu1 }
 0x11a   :  { %v2341_v14 = vpop.f32.mrf.mxu0  ;;  %3829 = vst [vmem:[#allocation11_spill] sm:$0xff] %v2365_v2 }
 0x11b   :  { %v652_v19 = vadd.f32 %v2317_v34, %v651_v10  ;;  %v785_v24 = vadd.f32 %v784_v6, %v722_v11  ;;  %v727_v6 = vmul.f32 %v2341_v14, %v2341_v14 }
 0x11c   :  { %v2348_v25 = vpop.f32.mrf.mxu0 }
 0x11d   :  { %v786_v29 = vadd.f32 %v785_v24, %v723_v18  ;;  %v653_v32 = vadd.f32 %v2329_v56, %v652_v19  ;;  %v725_v47 = vmul.f32 %v2348_v25, %v2348_v25 }
 0x11e   :  { %v2353_v33 = vpop.f32.mrf.mxu0 }
 0x11f   :  { %v654_v38 = vadd.f32 %v653_v32, %v2348_v25  ;;  %v787_v51 = vadd.f32 %v786_v29, %v724_v27  ;;  %v728_v18 = vmul.f32 %v2353_v33, %v2353_v33  ;;  %v2373_v27 = vpop.f32.mrf.mxu1  ;;  %v729_v29 = vmul.f32 %v2187_v44, %v2187_v44 }
 0x120   :  { %v2360_v53 = vpop.f32.mrf.mxu0  ;;  %3830 = vst [vmem:[#allocation12_spill] sm:$0xff] %v2373_v27 }
 0x121   :  { %v788_v55 = vadd.f32 %v787_v51, %v725_v47  ;;  %v655_v62 = vadd.f32 %v654_v38, %v2360_v53  ;;  %v726_v0 = vmul.f32 %v2360_v53, %v2360_v53  ;;  %v730_v51 = vmul.f32 %v2211_v59, %v2211_v59 }
 0x123   :  { %v656_v10 = vadd.f32 %v2341_v14, %v655_v62  ;;  %v789_v11 = vadd.f32 %v788_v55, %v726_v0  ;;  %v2381_v62 = vpop.f32.mrf.mxu1  ;;  %v731_v0 = vmul.f32 %v2181_v41, %v2181_v41 }
 0x124   :  { %3831 = vst [vmem:[#allocation13_spill] sm:$0xff] %v2381_v62 }
 0x125   :  { %v657_v19 = vadd.f32 %v2353_v33, %v656_v10  ;;  %v790_v24 = vadd.f32 %v789_v11, %v727_v6  ;;  %v732_v11 = vmul.f32 %v2199_v50, %v2199_v50 }
 0x127   :  { %v791_v32 = vadd.f32 %v790_v24, %v728_v18  ;;  %v658_v38 = vadd.f32 %v657_v19, %v2187_v44  ;;  %v2389_v24 = vpop.f32.mrf.mxu1 }
 0x128   :  { %3832 = vst [vmem:[#allocation14_spill] sm:$0xff] %v2389_v24 }
 0x129   :  { %v659_v47 = vadd.f32 %v658_v38, %v2211_v59  ;;  %v792_v55 = vadd.f32 %v791_v32, %v729_v29  ;;  %v733_v29 = vmul.f32 %v2235_v13, %v2235_v13 }
 0x12b   :  { %v660_v6 = vadd.f32 %v2181_v41, %v659_v47  ;;  %v793_v10 = vadd.f32 %v792_v55, %v730_v51  ;;  %v734_v47 = vmul.f32 %v2259_v31, %v2259_v31  ;;  %v2397_v51 = vpop.f32.mrf.mxu1  ;;  %v735_v55 = vmul.f32 %v2223_v4, %v2223_v4 }
 0x12c   :  { %3833 = vst [vmem:[#allocation15_spill] sm:$0xff] %v2397_v51 }
 0x12d   :  { %v794_v18 = vadd.f32 %v793_v10, %v731_v0  ;;  %v661_v19 = vadd.f32 %v2199_v50, %v660_v6  ;;  %v736_v10 = vmul.f32 %v2247_v22, %v2247_v22 }
 0x12f   :  { %v662_v38 = vadd.f32 %v661_v19, %v2235_v13  ;;  %v795_v32 = vadd.f32 %v794_v18, %v732_v11  ;;  %v2405_v18 = vpop.f32.mrf.mxu1 }
 0x130   :  { %3834 = vst [vmem:[#allocation16_spill] sm:$0xff] %v2405_v18 }
 0x131   :  { %v796_v59 = vadd.f32 %v795_v32, %v733_v29  ;;  %v663_v44 = vadd.f32 %v662_v38, %v2259_v31  ;;  %v737_v29 = vmul.f32 %v2283_v60, %v2283_v60 }
 0x133   :  { %v664_v0 = vadd.f32 %v2223_v4, %v663_v44  ;;  %v797_v6 = vadd.f32 %v796_v59, %v734_v47  ;;  %v738_v44 = vmul.f32 %v2307_v23, %v2307_v23  ;;  %v2413_v59 = vpop.f32.mrf.mxu1  ;;  %v739_v47 = vmul.f32 %v2271_v46, %v2271_v46 }
 0x134   :  { %3835 = vst [vmem:[#allocation17_spill] sm:$0xff] %v2413_v59 }
 0x135   :  { %v798_v19 = vadd.f32 %v797_v6, %v735_v55  ;;  %v665_v11 = vadd.f32 %v2247_v22, %v664_v0  ;;  %v740_v6 = vmul.f32 %v2295_v9, %v2295_v9 }
 0x137   :  { %v666_v38 = vadd.f32 %v665_v11, %v2283_v60  ;;  %v799_v32 = vadd.f32 %v798_v19, %v736_v10  ;;  %v2421_v19 = vpop.f32.mrf.mxu1 }
 0x138   :  { %3836 = vst [vmem:[#allocation18_spill] sm:$0xff] %v2421_v19 }
 0x139   :  { %v800_v31 = vadd.f32 %v799_v32, %v737_v29  ;;  %v667_v13 = vadd.f32 %v666_v38, %v2307_v23  ;;  %v741_v29 = vmul.f32 %v2331_v61, %v2331_v61 }
 0x13b   :  { %v668_v55 = vadd.f32 %v2271_v46, %v667_v13  ;;  %v801_v0 = vadd.f32 %v800_v31, %v738_v44  ;;  %v742_v13 = vmul.f32 %v2355_v37, %v2355_v37  ;;  %v2429_v31 = vpop.f32.mrf.mxu1  ;;  %v743_v44 = vmul.f32 %v2319_v36, %v2319_v36 }
 0x13c   :  { %3837 = vst [vmem:[#allocation19_spill] sm:$0xff] %v2429_v31 }
 0x13d   :  { %v802_v11 = vadd.f32 %v801_v0, %v739_v47  ;;  %v669_v10 = vadd.f32 %v2295_v9, %v668_v55  ;;  %v744_v0 = vmul.f32 %v2343_v16, %v2343_v16 }
 0x13f   :  { %v670_v38 = vadd.f32 %v669_v10, %v2331_v61  ;;  %v803_v32 = vadd.f32 %v802_v11, %v740_v6  ;;  %v2437_v11 = vpop.f32.mrf.mxu1 }
 0x140   :  { %3838 = vst [vmem:[#allocation20_spill] sm:$0xff] %v2437_v11 }
 0x141   :  { %v804_v23 = vadd.f32 %v803_v32, %v741_v29  ;;  %v671_v60 = vadd.f32 %v670_v38, %v2355_v37  ;;  %v745_v29 = vmul.f32 %v2373_v27, %v2373_v27 }
 0x143   :  { %v672_v47 = vadd.f32 %v2319_v36, %v671_v60  ;;  %v805_v55 = vadd.f32 %v804_v23, %v742_v13  ;;  %v746_v60 = vmul.f32 %v2389_v24, %v2389_v24  ;;  %v2445_v23 = vpop.f32.mrf.mxu1  ;;  %v747_v13 = vmul.f32 %v2365_v2, %v2365_v2 }
 0x144   :  { %3839 = vst [vmem:[#allocation21_spill] sm:$0xff] %v2445_v23 }
 0x145   :  { %v806_v10 = vadd.f32 %v805_v55, %v743_v44  ;;  %v673_v6 = vadd.f32 %v2343_v16, %v672_v47  ;;  %v748_v55 = vmul.f32 %v2381_v62, %v2381_v62 }
 0x147   :  { %v674_v38 = vadd.f32 %v673_v6, %v2373_v27  ;;  %v807_v32 = vadd.f32 %v806_v10, %v744_v0  ;;  %v2453_v10 = vpop.f32.mrf.mxu1 }
 0x148   :  { %3840 = vst [vmem:[#allocation22_spill] sm:$0xff] %v2453_v10 }
 0x149   :  { %v808_v37 = vadd.f32 %v807_v32, %v745_v29  ;;  %v675_v61 = vadd.f32 %v674_v38, %v2389_v24  ;;  %v749_v29 = vmul.f32 %v2405_v18, %v2405_v18 }
 0x14b   :  { %v676_v44 = vadd.f32 %v2365_v2, %v675_v61  ;;  %v809_v47 = vadd.f32 %v808_v37, %v746_v60  ;;  %v750_v61 = vmul.f32 %v2421_v19, %v2421_v19  ;;  %v2461_v37 = vpop.f32.mrf.mxu1  ;;  %v751_v60 = vmul.f32 %v2397_v51, %v2397_v51 }
 0x14c   :  { %3841 = vst [vmem:[#allocation23_spill] sm:$0xff] %v2461_v37 }
 0x14d   :  { %v810_v6 = vadd.f32 %v809_v47, %v747_v13  ;;  %v677_v0 = vadd.f32 %v2381_v62, %v676_v44  ;;  %v752_v47 = vmul.f32 %v2413_v59, %v2413_v59 }
 0x14f   :  { %v678_v38 = vadd.f32 %v677_v0, %v2405_v18  ;;  %v811_v32 = vadd.f32 %v810_v6, %v748_v55  ;;  %v2469_v6 = vpop.f32.mrf.mxu1 }
 0x150   :  { %3842 = vst [vmem:[#allocation24_spill] sm:$0xff] %v2469_v6 }
 0x151   :  { %v812_v24 = vadd.f32 %v811_v32, %v749_v29  ;;  %v679_v27 = vadd.f32 %v678_v38, %v2421_v19  ;;  %v753_v29 = vmul.f32 %v2437_v11, %v2437_v11 }
 0x153   :  { %v680_v13 = vadd.f32 %v2397_v51, %v679_v27  ;;  %v813_v44 = vadd.f32 %v812_v24, %v750_v61  ;;  %v754_v27 = vmul.f32 %v2453_v10, %v2453_v10  ;;  %v2477_v24 = vpop.f32.mrf.mxu1  ;;  %v755_v61 = vmul.f32 %v2429_v31, %v2429_v31 }
 0x155   :  { %v814_v0 = vadd.f32 %v813_v44, %v751_v60  ;;  %v681_v55 = vadd.f32 %v2413_v59, %v680_v13  ;;  %v756_v44 = vmul.f32 %v2445_v23, %v2445_v23 }
 0x157   :  { %v682_v38 = vadd.f32 %v681_v55, %v2437_v11  ;;  %v815_v32 = vadd.f32 %v814_v0, %v752_v47  ;;  %v2485_v0 = vpop.f32.mrf.mxu1 }
 0x158   :  { %3843 = vst [vmem:[#allocation25_spill] sm:$0xff] %v2485_v0 }
 0x159   :  { %v816_v19 = vadd.f32 %v815_v32, %v753_v29  ;;  %v683_v18 = vadd.f32 %v682_v38, %v2453_v10  ;;  %v757_v29 = vmul.f32 %v2469_v6, %v2469_v6 }
 0x15b   :  { %v684_v60 = vadd.f32 %v2429_v31, %v683_v18  ;;  %v817_v13 = vadd.f32 %v816_v19, %v754_v27  ;;  %v758_v18 = vmul.f32 %v2485_v0, %v2485_v0  ;;  %v759_v19 = vmul.f32 %v2461_v37, %v2461_v37 }
 0x15d   :  { %v818_v55 = vadd.f32 %v817_v13, %v755_v61  ;;  %v685_v47 = vadd.f32 %v2445_v23, %v684_v60  ;;  %v760_v60 = vmul.f32 %v2477_v24, %v2477_v24 }
 0x15f   :  { %v686_v38 = vadd.f32 %v685_v47, %v2469_v6  ;;  %v819_v32 = vadd.f32 %v818_v55, %v756_v44 }
 0x161   :  { %v820_v10 = vadd.f32 %v819_v32, %v757_v29  ;;  %v687_v11 = vadd.f32 %v686_v38, %v2485_v0 }
 0x163   :  { %v688_v27 = vadd.f32 %v2461_v37, %v687_v11  ;;  %v821_v61 = vadd.f32 %v820_v10, %v758_v18 }
 0x165   :  { %v689_v13 = vadd.f32 %v2477_v24, %v688_v27  ;;  %v822_v47 = vadd.f32 %v821_v61, %v759_v19  ;;  %v842_v19 = vlaneseq }
 0x167   :  { %v690_v6 = vrot.slane %v689_v13, 4  ;;  %v823_v44 = vadd.f32 %v822_v47, %v760_v60  ;;  %v843_v60 = vshrl.u32 %v842_v19, 7 }
 0x169   :  { %v691_v55 = vadd.f32 %v690_v6, %v689_v13  ;;  %v824_v29 = vrot.slane %v823_v44, 4  ;;  %v834_v6 = vld [vmem:[%s3760_s2] sm:$0x1]  ;;  %v844_v47 = vsub.s32 0, %v843_v60 }
 0x16b   :  { %v692_v38 = vrot.slane %v691_v55, 2  ;;  %v825_v32 = vadd.f32 %v824_v29, %v823_v44  ;;  %v3844_v44 = vld [vmem:[#allocation2_spill] sm:$0xff]  ;;  %v3846_v29 = vld [vmem:[#allocation4_spill] sm:$0xff] }
 0x16d   :  { %v693_v23 = vadd.f32 %v692_v38, %v691_v55  ;;  %v826_v0 = vrot.slane %v825_v32, 2  ;;  %v3845_v55 = vld [vmem:[#allocation3_spill] sm:$0xff]  ;;  %v3847_v38 = vld [vmem:[#allocation5_spill] sm:$0xff] }
 0x16f   :  { %v694_v31 = vrot.slane %v693_v23, 1  ;;  %v827_v59 = vadd.f32 %v826_v0, %v825_v32 }
 0x171   :  { %v695_v51 = vadd.f32 %v694_v31, %v693_v23  ;;  %v828_v62 = vrot.slane %v827_v59, 1 }
 0x173   :  { %v696_v11 = vmul.f32 0.001953125, %v695_v51  ;;  %v829_v10 = vadd.f32 %v828_v62, %v827_v59  ;;  %v838_v62 = vld [vmem:[%s3761_s3] sm:$0x1] }
 0x175   :  { %v830_v18 = vmul.f32 0.001953125, %v829_v10  ;;  %v831_v37 = vmul.f32 %v696_v11, %v696_v11  ;;  %v3848_v10 = vld [vmem:[#allocation6_spill] sm:$0xff] }
 0x177   :  { %v832_v2 = vsub.f32 %v830_v18, %v831_v37  ;;  %v3849_v18 = vld [vmem:[#allocation7_spill] sm:$0xff] }
 0x179   :  { %v833_v16 = vmax.f32 %v832_v2, 0.0 }
 0x17b   :  { %v835_v27 = vadd.f32 1e-05, %v833_v16 }
 0x17d   :  { %2032 = vrsqrt.f32 %v835_v27 }
 0x18a   :  { %v2033_v61 = vpop.eup %2032 }
 0x18b   :  { %v837_v13 = vmul.f32 %v2033_v61, %v834_v6  ;;  %v3850_v61 = vld [vmem:[#allocation8_spill] sm:$0xff]  ;;  %v3851_v6 = vld [vmem:[#allocation10_spill] sm:$0xff] }
 0x18d   :  { %v839_v0 = vmul.f32 %v837_v13, %v696_v11  ;;  %v2505_v51 = vrot.slane %v837_v13, %v844_v47 }
 0x18f   :  { %v840_v59 = vsub.f32 %v838_v62, %v839_v0  ;;  %v2509_v16 = vmul.f32 %v2505_v51, %v2183_v42  ;;  %v2513_v2 = vmul.f32 %v2505_v51, %v2189_v45  ;;  %v2517_v31 = vmul.f32 %v2179_v40, %v2505_v51  ;;  %v3852_v0 = vld [vmem:[#allocation9_spill] sm:$0xff]  ;;  %v3853_v62 = vld [vmem:[#allocation12_spill] sm:$0xff] }
 0x190   :  { %v2521_v23 = vmul.f32 %v2185_v43, %v2505_v51  ;;  %v2525_v37 = vmul.f32 %v2505_v51, %v2204_v54  ;;  %v2529_v42 = vmul.f32 %v2505_v51, %v2216_v63  ;;  %v2533_v45 = vmul.f32 %v2197_v49, %v2505_v51 }
 0x191   :  { %v2537_v40 = vmul.f32 %v2209_v58, %v2505_v51  ;;  %v2541_v43 = vmul.f32 %v2505_v51, %v2228_v8  ;;  %v2545_v54 = vmul.f32 %v2505_v51, %v2240_v17  ;;  %v2549_v63 = vmul.f32 %v2221_v3, %v2505_v51 }
 0x192   :  { %v2553_v49 = vmul.f32 %v2233_v12, %v2505_v51  ;;  %v2557_v58 = vmul.f32 %v2505_v51, %v2252_v26  ;;  %v2561_v8 = vmul.f32 %v2505_v51, %v2264_v35  ;;  %v2565_v17 = vmul.f32 %v2245_v21, %v2505_v51 }
 0x193   :  { %v2569_v3 = vmul.f32 %v2257_v30, %v2505_v51  ;;  %v2573_v12 = vmul.f32 %v2505_v51, %v2276_v52  ;;  %v2577_v26 = vmul.f32 %v2505_v51, %v2288_v1  ;;  %v2581_v35 = vmul.f32 %v2269_v39, %v2505_v51 }
 0x194   :  { %v2585_v21 = vmul.f32 %v2281_v57, %v2505_v51  ;;  %v2589_v30 = vmul.f32 %v2505_v51, %v2300_v15  ;;  %v2593_v52 = vmul.f32 %v2505_v51, %v2312_v28  ;;  %v2597_v1 = vmul.f32 %v2293_v7, %v2505_v51 }
 0x195   :  { %v2601_v39 = vmul.f32 %v2305_v20, %v2505_v51  ;;  %v2605_v57 = vmul.f32 %v2505_v51, %v2324_v48  ;;  %v2609_v15 = vmul.f32 %v2505_v51, %v2336_v5  ;;  %v2613_v28 = vmul.f32 %v2317_v34, %v2505_v51 }
 0x196   :  { %v2617_v7 = vmul.f32 %v2329_v56, %v2505_v51  ;;  %v2621_v20 = vmul.f32 %v2505_v51, %v2348_v25  ;;  %v2625_v48 = vmul.f32 %v2505_v51, %v2360_v53  ;;  %v2629_v5 = vmul.f32 %v2341_v14, %v2505_v51 }
 0x197   :  { %v2633_v34 = vmul.f32 %v2353_v33, %v2505_v51  ;;  %v2637_v56 = vmul.f32 %v2505_v51, %v3844_v44  ;;  %v2641_v25 = vmul.f32 %v2505_v51, %v3845_v55  ;;  %v2645_v53 = vmul.f32 %v2181_v41, %v2505_v51  ;;  %v3854_v44 = vld [vmem:[#allocation14_spill] sm:$0xff] }
 0x198   :  { %v2649_v14 = vmul.f32 %v2199_v50, %v2505_v51  ;;  %v2653_v33 = vmul.f32 %v2505_v51, %v3846_v29  ;;  %v2657_v32 = vmul.f32 %v2505_v51, %v3847_v38  ;;  %v2661_v11 = vmul.f32 %v2223_v4, %v2505_v51  ;;  %v3856_v29 = vld [vmem:[#allocation11_spill] sm:$0xff] }
 0x199   :  { %v2665_v41 = vmul.f32 %v2247_v22, %v2505_v51  ;;  %v2669_v50 = vmul.f32 %v2505_v51, %v3848_v10  ;;  %v2673_v27 = vmul.f32 %v2505_v51, %v3849_v18  ;;  %v2677_v19 = vmul.f32 %v2271_v46, %v2505_v51 }
 0x19a   :  { %v2681_v4 = vmul.f32 %v2295_v9, %v2505_v51  ;;  %v2685_v22 = vmul.f32 %v2505_v51, %v3850_v61  ;;  %v2689_v60 = vmul.f32 %v2505_v51, %v3851_v6  ;;  %v2693_v13 = vmul.f32 %v2319_v36, %v2505_v51  ;;  %v3857_v36 = vld [vmem:[#allocation13_spill] sm:$0xff]  ;;  %v3859_v61 = vld [vmem:[#allocation16_spill] sm:$0xff] }
 0x19b   :  { %v2697_v46 = vmul.f32 %v3852_v0, %v2505_v51  ;;  %v2701_v9 = vmul.f32 %v2505_v51, %v3853_v62  ;;  %v2705_v55 = vmul.f32 %v2505_v51, %v3854_v44  ;;  %v2709_v38 = vmul.f32 %v3856_v29, %v2505_v51  ;;  %v3861_v0 = vld [vmem:[#allocation18_spill] sm:$0xff]  ;;  %v3863_v44 = vld [vmem:[#allocation15_spill] sm:$0xff]  ;;  %v3865_v29 = vld [vmem:[#allocation17_spill] sm:$0xff] }
 0x19c   :  { %v2711_v10 = vrot.slane %v840_v59, %v844_v47  ;;  %v2715_v18 = vmul.f32 %v3857_v36, %v2505_v51  ;;  %v2719_v6 = vmul.f32 %v2505_v51, %v3859_v61  ;;  %v2723_v62 = vmul.f32 %v2505_v51, %v3861_v0  ;;  %v3867_v59 = vld [vmem:[#allocation20_spill] sm:$0xff] }
 0x19d   :  { %3855 = vst [vmem:[#allocation2_spill] sm:$0xff] %v2705_v55  ;;  %v2727_v55 = vmul.f32 %v3863_v44, %v2505_v51  ;;  %v2731_v47 = vmul.f32 %v3865_v29, %v2505_v51  ;;  %v2735_v36 = vmul.f32 %v2505_v51, %v3867_v59 }
 0x19e   :  { %3858 = vst [vmem:[#allocation3_spill] sm:$0xff] %v2715_v18  ;;  %3860 = vst [vmem:[#allocation4_spill] sm:$0xff] %v2719_v6  ;;  %v3869_v18 = vld [vmem:[#allocation22_spill] sm:$0xff]  ;;  %v3870_v6 = vld [vmem:[#allocation19_spill] sm:$0xff] }
 0x19f   :  { %3862 = vst [vmem:[#allocation5_spill] sm:$0xff] %v2723_v62  ;;  %3864 = vst [vmem:[#allocation6_spill] sm:$0xff] %v2727_v55  ;;  %v2739_v61 = vmul.f32 %v2505_v51, %v3869_v18  ;;  %v2743_v0 = vmul.f32 %v3870_v6, %v2505_v51  ;;  %v3871_v62 = vld [vmem:[#allocation21_spill] sm:$0xff]  ;;  %v3872_v55 = vld [vmem:[#allocation24_spill] sm:$0xff]  ;;  %v2763_v6 = vmul.f32 %v2477_v24, %v2505_v51 }
 0x1a0   :  { %3866 = vst [vmem:[#allocation7_spill] sm:$0xff] %v2731_v47  ;;  %3868 = vst [vmem:[#allocation8_spill] sm:$0xff] %v2735_v36  ;;  %v2747_v44 = vmul.f32 %v3871_v62, %v2505_v51  ;;  %v2751_v29 = vmul.f32 %v2505_v51, %v3872_v55  ;;  %v3873_v47 = vld [vmem:[#allocation25_spill] sm:$0xff]  ;;  %v3874_v36 = vld [vmem:[#allocation23_spill] sm:$0xff]  ;;  %v2767_v62 = vadd.f32 %v2711_v10, %v2509_v16 }
 0x1a1   :  { %v2755_v59 = vmul.f32 %v2505_v51, %v3873_v47  ;;  %v2759_v18 = vmul.f32 %v3874_v36, %v2505_v51  ;;  %v2771_v55 = vadd.f32 %v2711_v10, %v2513_v2  ;;  %v2775_v47 = vadd.f32 %v2711_v10, %v2517_v31 }
 0x1a2   :  { %v2779_v36 = vadd.f32 %v2711_v10, %v2521_v23  ;;  %v2783_v24 = vadd.f32 %v2711_v10, %v2525_v37  ;;  %v2787_v51 = vadd.f32 %v2711_v10, %v2529_v42  ;;  %v2791_v16 = vadd.f32 %v2711_v10, %v2533_v45 }
 0x1a3   :  { %v2795_v2 = vadd.f32 %v2711_v10, %v2537_v40  ;;  %v2799_v31 = vadd.f32 %v2711_v10, %v2541_v43  ;;  %v2803_v23 = vadd.f32 %v2711_v10, %v2545_v54  ;;  %v2807_v37 = vadd.f32 %v2711_v10, %v2549_v63 }
 0x1a4   :  { %v2811_v42 = vadd.f32 %v2711_v10, %v2553_v49  ;;  %v2815_v45 = vadd.f32 %v2711_v10, %v2557_v58  ;;  %v2819_v40 = vadd.f32 %v2711_v10, %v2561_v8  ;;  %v2823_v43 = vadd.f32 %v2711_v10, %v2565_v17 }
 0x1a5   :  { %v2827_v54 = vadd.f32 %v2711_v10, %v2569_v3  ;;  %v2831_v63 = vadd.f32 %v2711_v10, %v2573_v12  ;;  %v2835_v49 = vadd.f32 %v2711_v10, %v2577_v26  ;;  %v2839_v58 = vadd.f32 %v2711_v10, %v2581_v35 }
 0x1a6   :  { %v2843_v8 = vadd.f32 %v2711_v10, %v2585_v21  ;;  %v2847_v17 = vadd.f32 %v2711_v10, %v2589_v30  ;;  %v2851_v3 = vadd.f32 %v2711_v10, %v2593_v52  ;;  %v2855_v12 = vadd.f32 %v2711_v10, %v2597_v1 }
 0x1a7   :  { %v2859_v26 = vadd.f32 %v2711_v10, %v2601_v39  ;;  %v2863_v35 = vadd.f32 %v2711_v10, %v2605_v57  ;;  %v2867_v21 = vadd.f32 %v2711_v10, %v2609_v15  ;;  %v2871_v30 = vadd.f32 %v2711_v10, %v2613_v28 }
 0x1a8   :  { %v2875_v52 = vadd.f32 %v2711_v10, %v2617_v7  ;;  %v2879_v1 = vadd.f32 %v2711_v10, %v2621_v20  ;;  %v2883_v39 = vadd.f32 %v2711_v10, %v2625_v48  ;;  %v2887_v57 = vadd.f32 %v2711_v10, %v2629_v5 }
 0x1a9   :  { %v2891_v15 = vadd.f32 %v2711_v10, %v2633_v34  ;;  %v2895_v28 = vadd.f32 %v2711_v10, %v2637_v56  ;;  %v2899_v7 = vadd.f32 %v2711_v10, %v2641_v25  ;;  %v2903_v20 = vadd.f32 %v2711_v10, %v2645_v53 }
 0x1aa   :  { %v2907_v48 = vadd.f32 %v2711_v10, %v2649_v14  ;;  %v2911_v5 = vadd.f32 %v2711_v10, %v2653_v33  ;;  %v2915_v34 = vadd.f32 %v2711_v10, %v2657_v32  ;;  %v2919_v56 = vadd.f32 %v2711_v10, %v2661_v11 }
 0x1ab   :  { %v2923_v25 = vadd.f32 %v2711_v10, %v2665_v41  ;;  %v2927_v53 = vadd.f32 %v2711_v10, %v2669_v50  ;;  %v2931_v14 = vadd.f32 %v2711_v10, %v2673_v27  ;;  %v2935_v33 = vadd.f32 %v2711_v10, %v2677_v19 }
 0x1ac   :  { %v2939_v32 = vadd.f32 %v2711_v10, %v2681_v4  ;;  %v2943_v11 = vadd.f32 %v2711_v10, %v2685_v22  ;;  %v2947_v41 = vadd.f32 %v2711_v10, %v2689_v60  ;;  %v2951_v50 = vadd.f32 %v2711_v10, %v2693_v13  ;;  %v3880_v4 = vld [vmem:[#allocation2_spill] sm:$0xff] }
 0x1ad   :  { %3875 = vst [vmem:[#allocation10_spill] sm:$0xff] %v2931_v14  ;;  %v2955_v27 = vadd.f32 %v2711_v10, %v2697_v46  ;;  %v2959_v19 = vadd.f32 %v2711_v10, %v2701_v9  ;;  %v2963_v22 = vadd.f32 %v2711_v10, %v3880_v4  ;;  %v2967_v60 = vadd.f32 %v2711_v10, %v2709_v38 }
 0x1ae   :  { %3876 = vst [vmem:[#allocation9_spill] sm:$0xff] %v2947_v41  ;;  %3877 = vst [vmem:[#allocation12_spill] sm:$0xff] %v2951_v50  ;;  %v3883_v41 = vld [vmem:[#allocation3_spill] sm:$0xff]  ;;  %v3885_v50 = vld [vmem:[#allocation4_spill] sm:$0xff]  ;;  %vm981_vm0 = vcmp.gt.f32.partialorder %v2767_v62, 0.0  ;;  %vm982_vm1 = vcmp.gt.f32.partialorder %v2771_v55, 0.0 }
 0x1af   :  { %3878 = vst [vmem:[#allocation14_spill] sm:$0xff] %v2955_v27  ;;  %3879 = vst [vmem:[#allocation11_spill] sm:$0xff] %v2959_v19  ;;  %v2971_v13 = vadd.f32 %v2711_v10, %v3883_v41  ;;  %v2975_v46 = vadd.f32 %v2711_v10, %v3885_v50  ;;  %v3887_v27 = vld [vmem:[#allocation5_spill] sm:$0xff]  ;;  %v3889_v19 = vld [vmem:[#allocation6_spill] sm:$0xff]  ;;  %v2995_v50 = vadd.f32 %v2711_v10, %v2739_v61  ;;  %vm983_vm2 = vcmp.gt.f32.partialorder %v2775_v47, 0.0 }
 0x1b0   :  { %3881 = vst [vmem:[#allocation13_spill] sm:$0xff] %v2963_v22  ;;  %3882 = vst [vmem:[#allocation16_spill] sm:$0xff] %v2967_v60  ;;  %v2979_v9 = vadd.f32 %v2711_v10, %v3887_v27  ;;  %v2983_v4 = vadd.f32 %v2711_v10, %v3889_v19  ;;  %v3891_v22 = vld [vmem:[#allocation7_spill] sm:$0xff]  ;;  %v3893_v60 = vld [vmem:[#allocation8_spill] sm:$0xff]  ;;  %v2999_v27 = vadd.f32 %v2711_v10, %v2743_v0  ;;  %vm984_vm3 = vcmp.gt.f32.partialorder %v2779_v36, 0.0 }
 0x1b1   :  { %3884 = vst [vmem:[#allocation18_spill] sm:$0xff] %v2971_v13  ;;  %3886 = vst [vmem:[#allocation15_spill] sm:$0xff] %v2975_v46  ;;  %v2987_v38 = vadd.f32 %v2711_v10, %v3891_v22  ;;  %v2991_v41 = vadd.f32 %v2711_v10, %v3893_v60  ;;  %v3003_v19 = vadd.f32 %v2711_v10, %v2747_v44  ;;  %vm985_vm4 = vcmp.gt.f32.partialorder %v2783_v24, 0.0 }
 0x1b2   :  { %3888 = vst [vmem:[#allocation17_spill] sm:$0xff] %v2979_v9  ;;  %3890 = vst [vmem:[#allocation20_spill] sm:$0xff] %v2983_v4  ;;  %v3007_v22 = vadd.f32 %v2711_v10, %v2751_v29  ;;  %v3011_v60 = vadd.f32 %v2711_v10, %v2755_v59  ;;  %vm986_vm5 = vcmp.gt.f32.partialorder %v2787_v51, 0.0  ;;  %vm987_vm6 = vcmp.gt.f32.partialorder %v2791_v16, 0.0 }
 0x1b3   :  { %3892 = vst [vmem:[#allocation22_spill] sm:$0xff] %v2987_v38  ;;  %3894 = vst [vmem:[#allocation19_spill] sm:$0xff] %v2991_v41  ;;  %vm988_vm7 = vcmp.gt.f32.partialorder %v2795_v2, 0.0  ;;  %vm989_vm8 = vcmp.gt.f32.partialorder %v2799_v31, 0.0  ;;  %v3024_v61 = vadd.f32 %v2711_v10, %v2759_v18  ;;  %vm990_vm9 = vcmp.gt.f32.partialorder %v2803_v23, 0.0 }
 0x1b4   :  { %3895 = vst [vmem:[#allocation21_spill] sm:$0xff] %v2995_v50  ;;  %3896 = vst [vmem:[#allocation24_spill] sm:$0xff] %v2999_v27  ;;  %v1045_v0 = vmul.f32 0.2, %v2767_v62  ;;  %v1046_v44 = vmul.f32 0.2, %v2771_v55  ;;  %v3032_v59 = vadd.f32 %v2711_v10, %v2763_v6 }
 0x1b5   :  { %3897 = vst [vmem:[#allocation25_spill] sm:$0xff] %v3003_v19  ;;  %3898 = vst [vmem:[#allocation23_spill] sm:$0xff] %v3007_v22  ;;  %v1047_v29 = vmul.f32 0.2, %v2775_v47  ;;  %vm991_vm10 = vcmp.gt.f32.partialorder %v2807_v37, 0.0  ;;  %vm992_vm11 = vcmp.gt.f32.partialorder %v2811_v42, 0.0 }
 0x1b6   :  { %3899 = vst [vmem:[#allocation2_spill] sm:$0xff] %v3011_v60  ;;  %3900 = vst [vmem:[#allocation3_spill] sm:$0xff] %v3024_v61  ;;  %v1048_v60 = vmul.f32 0.2, %v2779_v36  ;;  %v1049_v22 = vmul.f32 0.2, %v2783_v24  ;;  %v3045_v10 = vsel %vm981_vm0, %v2767_v62, %v1045_v0  ;;  %v3056_v41 = vsel %vm982_vm1, %v2771_v55, %v1046_v44 }
 0x1b7   :  { %3901 = vst [vmem:[#allocation4_spill] sm:$0xff] %v3032_v59  ;;  %v1050_v18 = vmul.f32 0.2, %v2787_v51  ;;  %v1051_v61 = vmul.f32 0.2, %v2791_v16  ;;  %3902 = vst [vmem:[#allocation5_spill] sm:$0xff] %v3045_v10  ;;  %v3071_v10 = vsel %vm983_vm2, %v2775_v47, %v1047_v29 }
 0x1b8   :  { %v1052_v19 = vmul.f32 0.2, %v2795_v2  ;;  %v1053_v27 = vmul.f32 0.2, %v2799_v31  ;;  %vm993_vm12 = vcmp.gt.f32.partialorder %v2815_v45, 0.0  ;;  %3903 = vst [vmem:[#allocation6_spill] sm:$0xff] %v3056_v41  ;;  %v3086_v4 = vsel %vm984_vm3, %v2779_v36, %v1048_v60 }
 0x1b9   :  { %v1054_v6 = vmul.f32 0.2, %v2803_v23  ;;  %v1055_v59 = vmul.f32 0.2, %v2807_v37  ;;  %v3051_v50 = vmul.f32 0.2, %v2811_v42 }
 0x1ba   :  { %vm994_vm13 = vcmp.gt.f32.partialorder %v2819_v40, 0.0  ;;  %v3060_v38 = vmul.f32 0.2, %v2815_v45  ;;  %v3063_v62 = vmul.f32 0.2, %v2819_v40  ;;  %3904 = vst [vmem:[#allocation7_spill] sm:$0xff] %v3071_v10 }
 0x1bb   :  { %v3066_v0 = vmul.f32 0.2, %v2823_v43  ;;  %vm995_vm14 = vcmp.gt.f32.partialorder %v2823_v43, 0.0  ;;  %v3075_v55 = vmul.f32 0.2, %v2827_v54  ;;  %3906 = vst [vmem:[#allocation26_spill] sm:$0xff] %v3086_v4 }
 0x1bc   :  { %v3078_v44 = vmul.f32 0.2, %v2831_v63  ;;  %v3081_v41 = vmul.f32 0.2, %v2835_v49  ;;  %vm996_vm15 = vcmp.gt.f32.partialorder %v2827_v54, 0.0  ;;  %vm997_vm0 = vcmp.gt.f32.partialorder %v2831_v63, 0.0 }
 0x1bd   :  { %v3090_v47 = vmul.f32 0.2, %v2839_v58  ;;  %v3093_v29 = vmul.f32 0.2, %v2843_v8  ;;  %v3096_v10 = vmul.f32 0.2, %v2847_v17 }
 0x1be   :  { %3905 = vst [vmem:[#allocation8_spill] sm:$0xff] %v3081_v41  ;;  %v3101_v41 = vsel %vm985_vm4, %v2783_v24, %v1049_v22  ;;  %v3105_v36 = vmul.f32 0.2, %v2851_v3  ;;  %v3108_v60 = vmul.f32 0.2, %v2855_v12  ;;  %vm998_vm1 = vcmp.gt.f32.partialorder %v2835_v49, 0.0 }
 0x1bf   :  { %3907 = vst [vmem:[#allocation27_spill] sm:$0xff] %v3096_v10  ;;  %3908 = vst [vmem:[#allocation28_spill] sm:$0xff] %v3101_v41  ;;  %v3111_v4 = vmul.f32 0.2, %v2859_v26  ;;  %v3116_v10 = vsel %vm986_vm5, %v2787_v51, %v1050_v18  ;;  %v3120_v24 = vmul.f32 0.2, %v2863_v35 }
 0x1c0   :  { %3910 = vst [vmem:[#allocation30_spill] sm:$0xff] %v3116_v10  ;;  %v3123_v22 = vmul.f32 0.2, %v2867_v21  ;;  %v3126_v41 = vmul.f32 0.2, %v2871_v30  ;;  %vm999_vm2 = vcmp.gt.f32.partialorder %v2839_v58, 0.0 }
 0x1c1   :  { %3909 = vst [vmem:[#allocation29_spill] sm:$0xff] %v3111_v4  ;;  %v3131_v4 = vsel %vm987_vm6, %v2791_v16, %v1051_v61  ;;  %v3135_v51 = vmul.f32 0.2, %v2875_v52  ;;  %v3138_v18 = vmul.f32 0.2, %v2879_v1  ;;  %vm1000_vm3 = vcmp.gt.f32.partialorder %v2843_v8, 0.0 }
 0x1c2   :  { %3911 = vst [vmem:[#allocation31_spill] sm:$0xff] %v3126_v41  ;;  %3912 = vst [vmem:[#allocation32_spill] sm:$0xff] %v3131_v4  ;;  %v3141_v10 = vmul.f32 0.2, %v2883_v39  ;;  %v3146_v41 = vsel %vm988_vm7, %v2795_v2, %v1052_v19  ;;  %v3152_v16 = vmul.f32 0.2, %v2887_v57  ;;  %v3163_v2 = vsel %vm989_vm8, %v2799_v31, %v1053_v27 }
 0x1c3   :  { %3913 = vst [vmem:[#allocation33_spill] sm:$0xff] %v3146_v41  ;;  %v3155_v61 = vmul.f32 0.2, %v2891_v15  ;;  %v3158_v4 = vmul.f32 0.2, %v2895_v28  ;;  %3915 = vst [vmem:[#allocation35_spill] sm:$0xff] %v3163_v2  ;;  %v3181_v31 = vsel %vm990_vm9, %v2803_v23, %v1054_v6  ;;  %v3199_v23 = vsel %vm991_vm10, %v2807_v37, %v1055_v59 }
 0x1c4   :  { %vm1003_vm6 = vcmp.gt.f32.partialorder %v2855_v12, 0.0  ;;  %v3170_v19 = vmul.f32 0.2, %v2899_v7  ;;  %v3173_v41 = vmul.f32 0.2, %v2903_v20  ;;  %3917 = vst [vmem:[#allocation37_spill] sm:$0xff] %v3181_v31  ;;  %v3218_v37 = vsel %vm992_vm11, %v2811_v42, %v3051_v50 }
 0x1c5   :  { %3914 = vst [vmem:[#allocation34_spill] sm:$0xff] %v3158_v4  ;;  %v3176_v4 = vmul.f32 0.2, %v2907_v48  ;;  %vm1007_vm8 = vcmp.gt.f32.partialorder %v2871_v30, 0.0  ;;  %v3188_v27 = vmul.f32 0.2, %v2911_v5  ;;  %v3237_v42 = vsel %vm993_vm12, %v2815_v45, %v3060_v38 }
 0x1c6   :  { %v3191_v2 = vmul.f32 0.2, %v2915_v34  ;;  %3919 = vst [vmem:[#allocation39_spill] sm:$0xff] %v3199_v23  ;;  %vm1011_vm9 = vcmp.gt.f32.partialorder %v2887_v57, 0.0  ;;  %v3206_v6 = vmul.f32 0.2, %v2923_v25  ;;  %v3256_v45 = vsel %vm994_vm13, %v2819_v40, %v3063_v62 }
 0x1c7   :  { %3916 = vst [vmem:[#allocation36_spill] sm:$0xff] %v3176_v4  ;;  %v3194_v4 = vmul.f32 0.2, %v2919_v56  ;;  %v3209_v31 = vmul.f32 0.2, %v2927_v53  ;;  %3922 = vst [vmem:[#allocation42_spill] sm:$0xff] %v3218_v37  ;;  %v3275_v40 = vsel %vm995_vm14, %v2823_v43, %v3066_v0  ;;  %v3294_v43 = vsel %vm996_vm15, %v2827_v54, %v3075_v55 }
 0x1c8   :  { %vm1015_vm10 = vcmp.gt.f32.partialorder %v2903_v20, 0.0  ;;  %v3225_v59 = vmul.f32 0.2, %v2935_v33  ;;  %v3228_v23 = vmul.f32 0.2, %v2939_v32  ;;  %3926 = vst [vmem:[#allocation46_spill] sm:$0xff] %v3237_v42  ;;  %v3307_v54 = vsel %vm997_vm0, %v2831_v63, %v3078_v44 }
 0x1c9   :  { %3918 = vst [vmem:[#allocation38_spill] sm:$0xff] %v3194_v4  ;;  %3920 = vst [vmem:[#allocation40_spill] sm:$0xff] %v3209_v31  ;;  %v3212_v4 = vmul.f32 0.2, %v2931_v14  ;;  %vm1019_vm11 = vcmp.gt.f32.partialorder %v2919_v56, 0.0  ;;  %v3927_v50 = vld [vmem:[#allocation9_spill] sm:$0xff] }
 0x1ca   :  { %3923 = vst [vmem:[#allocation43_spill] sm:$0xff] %v3225_v59  ;;  %3924 = vst [vmem:[#allocation44_spill] sm:$0xff] %v3228_v23  ;;  %v3244_v37 = vmul.f32 0.2, %v3927_v50  ;;  %v3929_v23 = vld [vmem:[#allocation12_spill] sm:$0xff]  ;;  %vm1023_vm12 = vcmp.gt.f32.partialorder %v2935_v33, 0.0 }
 0x1cb   :  { %3921 = vst [vmem:[#allocation41_spill] sm:$0xff] %v3212_v4  ;;  %v3231_v4 = vmul.f32 0.2, %v2943_v11  ;;  %v3247_v59 = vmul.f32 0.2, %v3929_v23  ;;  %3933 = vst [vmem:[#allocation47_spill] sm:$0xff] %v3256_v45 }
 0x1cc   :  { %3928 = vst [vmem:[#allocation9_spill] sm:$0xff] %v3244_v37  ;;  %v3934_v38 = vld [vmem:[#allocation11_spill] sm:$0xff]  ;;  %3939 = vst [vmem:[#allocation49_spill] sm:$0xff] %v3275_v40  ;;  %vm1027_vm13 = vcmp.gt.f32.partialorder %v3929_v23, 0.0  ;;  %v3282_v62 = vmul.f32 0.2, %v2971_v13 }
 0x1cd   :  { %3925 = vst [vmem:[#allocation45_spill] sm:$0xff] %v3231_v4  ;;  %3930 = vst [vmem:[#allocation12_spill] sm:$0xff] %v3247_v59  ;;  %v3931_v4 = vld [vmem:[#allocation14_spill] sm:$0xff]  ;;  %v3263_v42 = vmul.f32 0.2, %v3934_v38  ;;  %v3935_v59 = vld [vmem:[#allocation13_spill] sm:$0xff] }
 0x1ce   :  { %v3250_v31 = vmul.f32 0.2, %v3931_v4  ;;  %v3266_v37 = vmul.f32 0.2, %v3935_v59  ;;  %3940 = vst [vmem:[#allocation50_spill] sm:$0xff] %v3282_v62  ;;  %3943 = vst [vmem:[#allocation53_spill] sm:$0xff] %v3294_v43 }
 0x1cf   :  { %v3285_v45 = vmul.f32 0.2, %v2975_v46  ;;  %v3944_v0 = vld [vmem:[#allocation20_spill] sm:$0xff]  ;;  %v3946_v59 = vld [vmem:[#allocation19_spill] sm:$0xff]  ;;  %3947 = vst [vmem:[#allocation54_spill] sm:$0xff] %v3307_v54  ;;  %v3948_v55 = vld [vmem:[#allocation21_spill] sm:$0xff] }
 0x1d0   :  { %3932 = vst [vmem:[#allocation14_spill] sm:$0xff] %v3250_v31  ;;  %3936 = vst [vmem:[#allocation11_spill] sm:$0xff] %v3266_v37  ;;  %v3937_v31 = vld [vmem:[#allocation16_spill] sm:$0xff]  ;;  %v1099_v40 = vmul.f32 0.2, %v3944_v0  ;;  %vm1035_vm15 = vcmp.gt.f32.partialorder %v3944_v0, 0.0 }
 0x1d1   :  { %v3269_v14 = vmul.f32 0.2, %v3937_v31  ;;  %3941 = vst [vmem:[#allocation51_spill] sm:$0xff] %v3285_v45  ;;  %vm1031_vm14 = vcmp.gt.f32.partialorder %v3937_v31, 0.0  ;;  %v3945_v45 = vld [vmem:[#allocation22_spill] sm:$0xff]  ;;  %v3950_v13 = vld [vmem:[#allocation25_spill] sm:$0xff] }
 0x1d2   :  { %v1100_v62 = vmul.f32 0.2, %v3945_v45  ;;  %v1102_v43 = vmul.f32 0.2, %v3948_v55  ;;  %v1104_v31 = vmul.f32 0.2, %v3950_v13 }
 0x1d3   :  { %3938 = vst [vmem:[#allocation48_spill] sm:$0xff] %v3269_v14  ;;  %v3288_v14 = vmul.f32 0.2, %v2979_v9  ;;  %v3949_v9 = vld [vmem:[#allocation24_spill] sm:$0xff]  ;;  %v3953_v44 = vld [vmem:[#allocation23_spill] sm:$0xff]  ;;  %v3954_v54 = vld [vmem:[#allocation2_spill] sm:$0xff] }
 0x1d4   :  { %v1103_v46 = vmul.f32 0.2, %v3949_v9  ;;  %v3951_v37 = vld [vmem:[#allocation8_spill] sm:$0xff]  ;;  %vm1039_vm0 = vcmp.gt.f32.partialorder %v3949_v9, 0.0  ;;  %vm1041_vm4 = vcmp.gt.f32.partialorder %v3953_v44, 0.0  ;;  %v3955_v45 = vld [vmem:[#allocation3_spill] sm:$0xff] }
 0x1d5   :  { %3942 = vst [vmem:[#allocation52_spill] sm:$0xff] %v3288_v14  ;;  %v1101_v14 = vmul.f32 0.2, %v3946_v59  ;;  %v3320_v63 = vsel %vm998_vm1, %v2835_v49, %v3951_v37  ;;  %v1105_v55 = vmul.f32 0.2, %v3953_v44  ;;  %v3333_v49 = vsel %vm999_vm2, %v2839_v58, %v3090_v47  ;;  %v3956_v37 = vld [vmem:[#allocation4_spill] sm:$0xff] }
 0x1d6   :  { %3952 = vst [vmem:[#allocation24_spill] sm:$0xff] %v3320_v63  ;;  %v1106_v59 = vmul.f32 0.2, %v3954_v54  ;;  %v1107_v0 = vmul.f32 0.2, %v3955_v45  ;;  %vm1043_vm1 = vcmp.gt.f32.partialorder %v3955_v45, 0.0  ;;  %v3342_v44 = vsel %vm1000_vm3, %v2843_v8, %v3093_v29 }
 0x1d7   :  { %vm1044_vm5 = vcmp.gt.f32.partialorder %v3956_v37, 0.0  ;;  %v1108_v63 = vmul.f32 0.2, %v3956_v37  ;;  %v3957_v54 = vld [vmem:[#allocation27_spill] sm:$0xff]  ;;  %vm3958_vm7 = vcmp.gt.f32.partialorder %v2847_v17, 0.0  ;;  %vm3959_vm2 = vcmp.gt.f32.partialorder %v2851_v3, 0.0 }
 0x1d8   :  { %v3348_v13 = vsel %vm3958_vm7, %v2847_v17, %v3957_v54  ;;  %v3354_v58 = vsel %vm3959_vm2, %v2851_v3, %v3105_v36  ;;  %v3360_v47 = vsel %vm1003_vm6, %v2855_v12, %v3108_v60  ;;  %v3960_v8 = vld [vmem:[#allocation29_spill] sm:$0xff]  ;;  %vm3961_vm3 = vcmp.gt.f32.partialorder %v2859_v26, 0.0  ;;  %v3964_v12 = vld [vmem:[#allocation31_spill] sm:$0xff] }
 0x1d9   :  { %v3366_v29 = vsel %vm3961_vm3, %v2859_v26, %v3960_v8  ;;  %vm3962_vm7 = vcmp.gt.f32.partialorder %v2863_v35, 0.0  ;;  %vm3963_vm2 = vcmp.gt.f32.partialorder %v2867_v21, 0.0  ;;  %v3384_v36 = vsel %vm1007_vm8, %v2871_v30, %v3964_v12  ;;  %v3995_v54 = vld [vmem:[#allocation13_spill] sm:$0xff]  ;;  %v3998_v12 = vld [vmem:[#allocation16_spill] sm:$0xff] }
 0x1da   :  { %v3372_v17 = vsel %vm3962_vm7, %v2863_v35, %v3120_v24  ;;  %v3378_v3 = vsel %vm3963_vm2, %v2867_v21, %v3123_v22  ;;  %vm3965_vm6 = vcmp.gt.f32.partialorder %v2875_v52, 0.0  ;;  %vm3966_vm3 = vcmp.gt.f32.partialorder %v2879_v1, 0.0  ;;  %v3981_v22 = vld [vmem:[#allocation10_spill] sm:$0xff] }
 0x1db   :  { %v3390_v26 = vsel %vm3965_vm6, %v2875_v52, %v3135_v51  ;;  %v3396_v35 = vsel %vm3966_vm3, %v2879_v1, %v3138_v18  ;;  %vm3967_vm7 = vcmp.gt.f32.partialorder %v2883_v39, 0.0  ;;  %v3408_v30 = vsel %vm1011_vm9, %v2887_v57, %v3152_v16  ;;  %v3969_v1 = vld [vmem:[#allocation34_spill] sm:$0xff] }
 0x1dc   :  { %v3402_v21 = vsel %vm3967_vm7, %v2883_v39, %v3141_v10  ;;  %vm3968_vm8 = vcmp.gt.f32.partialorder %v2891_v15, 0.0  ;;  %vm3970_vm2 = vcmp.gt.f32.partialorder %v2895_v28, 0.0  ;;  %vm3971_vm6 = vcmp.gt.f32.partialorder %v2899_v7, 0.0 }
 0x1dd   :  { %v3414_v52 = vsel %vm3968_vm8, %v2891_v15, %v3155_v61  ;;  %v3420_v60 = vsel %vm3970_vm2, %v2895_v28, %v3969_v1  ;;  %v3426_v39 = vsel %vm3971_vm6, %v2899_v7, %v3170_v19  ;;  %v3432_v57 = vsel %vm1015_vm10, %v2903_v20, %v3173_v41  ;;  %v3972_v15 = vld [vmem:[#allocation36_spill] sm:$0xff]  ;;  %v3976_v20 = vld [vmem:[#allocation38_spill] sm:$0xff] }
 0x1de   :  { %vm3973_vm9 = vcmp.gt.f32.partialorder %v2907_v48, 0.0  ;;  %vm3974_vm3 = vcmp.gt.f32.partialorder %v2911_v5, 0.0  ;;  %vm3975_vm7 = vcmp.gt.f32.partialorder %v2915_v34, 0.0  ;;  %v3456_v41 = vsel %vm1019_vm11, %v2919_v56, %v3976_v20  ;;  %v3983_v56 = vld [vmem:[#allocation43_spill] sm:$0xff] }
 0x1df   :  { %v3438_v10 = vsel %vm3973_vm9, %v2907_v48, %v3972_v15  ;;  %v3444_v28 = vsel %vm3974_vm3, %v2911_v5, %v3188_v27  ;;  %v3450_v7 = vsel %vm3975_vm7, %v2915_v34, %v3191_v2  ;;  %vm3977_vm10 = vcmp.gt.f32.partialorder %v2923_v25, 0.0  ;;  %v3978_v5 = vld [vmem:[#allocation40_spill] sm:$0xff]  ;;  %v3980_v34 = vld [vmem:[#allocation41_spill] sm:$0xff]  ;;  %v4000_v15 = vld [vmem:[#allocation18_spill] sm:$0xff] }
 0x1e0   :  { %v3462_v48 = vsel %vm3977_vm10, %v2923_v25, %v3206_v6  ;;  %vm3979_vm8 = vcmp.gt.f32.partialorder %v2927_v53, 0.0  ;;  %vm3982_vm2 = vcmp.gt.f32.partialorder %v3981_v22, 0.0  ;;  %v3480_v18 = vsel %vm1023_vm12, %v2935_v33, %v3983_v56  ;;  %v3984_v25 = vld [vmem:[#allocation44_spill] sm:$0xff]  ;;  %v3988_v2 = vld [vmem:[#allocation9_spill] sm:$0xff] }
 0x1e1   :  { %v3468_v24 = vsel %vm3979_vm8, %v2927_v53, %v3978_v5  ;;  %v3474_v51 = vsel %vm3982_vm2, %v3981_v22, %v3980_v34  ;;  %vm3985_vm11 = vcmp.gt.f32.partialorder %v2939_v32, 0.0  ;;  %v3986_v53 = vld [vmem:[#allocation45_spill] sm:$0xff]  ;;  %vm3987_vm6 = vcmp.gt.f32.partialorder %v2943_v11, 0.0  ;;  %v3990_v33 = vld [vmem:[#allocation12_spill] sm:$0xff] }
 0x1e2   :  { %v3486_v16 = vsel %vm3985_vm11, %v2939_v32, %v3984_v25  ;;  %v3492_v61 = vsel %vm3987_vm6, %v2943_v11, %v3986_v53  ;;  %vm3989_vm9 = vcmp.gt.f32.partialorder %v3927_v50, 0.0  ;;  %v3504_v27 = vsel %vm1027_vm13, %v3929_v23, %v3990_v33  ;;  %v3991_v32 = vld [vmem:[#allocation14_spill] sm:$0xff]  ;;  %v3997_v23 = vld [vmem:[#allocation48_spill] sm:$0xff]  ;;  %v4006_v22 = vld [vmem:[#allocation17_spill] sm:$0xff] }
 0x1e3   :  { %v3498_v19 = vsel %vm3989_vm9, %v3927_v50, %v3988_v2  ;;  %vm3992_vm12 = vcmp.gt.f32.partialorder %v3931_v4, 0.0  ;;  %vm3993_vm3 = vcmp.gt.f32.partialorder %v3934_v38, 0.0  ;;  %v3994_v50 = vld [vmem:[#allocation11_spill] sm:$0xff]  ;;  %vm3996_vm7 = vcmp.gt.f32.partialorder %v3995_v54, 0.0  ;;  %v4005_v34 = vld [vmem:[#allocation52_spill] sm:$0xff]  ;;  %v4009_v2 = vld [vmem:[#allocation22_spill] sm:$0xff] }
 0x1e4   :  { %v3510_v6 = vsel %vm3992_vm12, %v3931_v4, %v3991_v32  ;;  %v3516_v11 = vsel %vm3993_vm3, %v3934_v38, %v3263_v42  ;;  %v3522_v8 = vsel %vm3996_vm7, %v3995_v54, %v3994_v50  ;;  %v3528_v1 = vsel %vm1031_vm14, %v3998_v12, %v3997_v23  ;;  %v3999_v4 = vld [vmem:[#allocation50_spill] sm:$0xff]  ;;  %v4002_v42 = vld [vmem:[#allocation51_spill] sm:$0xff]  ;;  %v4008_v25 = vld [vmem:[#allocation20_spill] sm:$0xff] }
 0x1e5   :  { %vm4001_vm13 = vcmp.gt.f32.partialorder %v4000_v15, 0.0  ;;  %v4003_v38 = vld [vmem:[#allocation15_spill] sm:$0xff]  ;;  %vm4007_vm8 = vcmp.gt.f32.partialorder %v4006_v22, 0.0  ;;  %v3551_v53 = vsel %vm1035_vm15, %v4008_v25, %v1099_v40  ;;  %vm4010_vm14 = vcmp.gt.f32.partialorder %v4009_v2, 0.0  ;;  %v4013_v54 = vld [vmem:[#allocation21_spill] sm:$0xff]  ;;  %v4026_v25 = vld [vmem:[#allocation28_spill] sm:$0xff] }
 0x1e6   :  { %v3534_v20 = vsel %vm4001_vm13, %v4000_v15, %v3999_v4  ;;  %vm4004_vm10 = vcmp.gt.f32.partialorder %v4003_v38, 0.0  ;;  %v3546_v56 = vsel %vm4007_vm8, %v4006_v22, %v4005_v34  ;;  %v3556_v33 = vsel %vm4010_vm14, %v4009_v2, %v1100_v62  ;;  %v4011_v32 = vld [vmem:[#allocation19_spill] sm:$0xff]  ;;  %v4015_v12 = vld [vmem:[#allocation25_spill] sm:$0xff]  ;;  %v4018_v15 = vld [vmem:[#allocation2_spill] sm:$0xff] }
 0x1e7   :  { %v3540_v5 = vsel %vm4004_vm10, %v4003_v38, %v4002_v42  ;;  %vm4012_vm2 = vcmp.gt.f32.partialorder %v4011_v32, 0.0  ;;  %vm4014_vm11 = vcmp.gt.f32.partialorder %v4013_v54, 0.0  ;;  %v3571_v40 = vsel %vm1039_vm0, %v3949_v9, %v1103_v46  ;;  %v4017_v4 = vld [vmem:[#allocation23_spill] sm:$0xff]  ;;  %v4023_v42 = vld [vmem:[#allocation6_spill] sm:$0xff] }
 0x1e8   :  { %v3561_v50 = vsel %vm4012_vm2, %v4011_v32, %v1101_v14  ;;  %v3566_v23 = vsel %vm4014_vm11, %v4013_v54, %v1102_v43  ;;  %vm4016_vm15 = vcmp.gt.f32.partialorder %v4015_v12, 0.0  ;;  %v3581_v14 = vsel %vm1041_vm4, %v4017_v4, %v1105_v55  ;;  %v4024_v55 = vld [vmem:[#allocation7_spill] sm:$0xff]  ;;  %v4025_v34 = vld [vmem:[#allocation26_spill] sm:$0xff]  ;;  %v4028_v32 = vld [vmem:[#allocation32_spill] sm:$0xff] }
 0x1e9   :  { %v3576_v62 = vsel %vm4016_vm15, %v4015_v12, %v1104_v31  ;;  %vm4019_vm6 = vcmp.gt.f32.partialorder %v4018_v15, 0.0  ;;  %v3591_v46 = vsel %vm1043_vm1, %v3955_v45, %v1107_v0  ;;  %v3596_v9 = vsel %vm1044_vm5, %v3956_v37, %v1108_v63  ;;  %v4022_v31 = vld [vmem:[#allocation5_spill] sm:$0xff]  ;;  %v4027_v2 = vld [vmem:[#allocation30_spill] sm:$0xff]  ;;  %v4030_v4 = vld [vmem:[#allocation35_spill] sm:$0xff] }
 0x1ea   :  { %v3586_v43 = vsel %vm4019_vm6, %v4018_v15, %v1106_v59  ;;  %4021 = vst [vmem:[#allocation3_spill] sm:$0xff] %v3591_v46  ;;  %v1668_v38 = vpack.c.bf16 %v4023_v42, %v4022_v31  ;;  %v1673_v22 = vpack.c.bf16 %v4025_v34, %v4024_v55  ;;  %v1678_v59 = vpack.c.bf16 %v4027_v2, %v4026_v25  ;;  %v4029_v54 = vld [vmem:[#allocation33_spill] sm:$0xff]  ;;  %v4032_v15 = vld [vmem:[#allocation39_spill] sm:$0xff]  ;;  %v4033_v46 = vld [vmem:[#allocation42_spill] sm:$0xff] }
 0x1eb   :  { %4020 = vst [vmem:[#allocation8_spill] sm:$0xff] %v3586_v43  ;;  %v1683_v12 = vpack.c.bf16 %v4029_v54, %v4028_v32  ;;  %v4031_v45 = vld [vmem:[#allocation37_spill] sm:$0xff]  ;;  %v1693_v43 = vpack.c.bf16 %v4033_v46, %v4032_v15  ;;  %v4034_v63 = vld [vmem:[#allocation46_spill] sm:$0xff]  ;;  %v4035_v37 = vld [vmem:[#allocation47_spill] sm:$0xff]  ;;  %v1713_v46 = vpack.c.bf16 %v3342_v44, %v3333_v49  ;;  %v1723_v44 = vpack.c.bf16 %v3366_v29, %v3360_v47 }
 0x1ec   :  { %v1688_v0 = vpack.c.bf16 %v4031_v45, %v4030_v4  ;;  %1669 = vst [vmem:[%s3762_s4] sm:$0xff] %v1668_v38   ;;  %1825 = vst [vmem:[%s3762_s4 + $0x8] sm:$0xff] %v1673_v22   ;;  %v1698_v31 = vpack.c.bf16 %v4035_v37, %v4034_v63  ;;  %v4036_v42 = vld [vmem:[#allocation49_spill] sm:$0xff]  ;;  %v4038_v25 = vld [vmem:[#allocation54_spill] sm:$0xff]  ;;  %v1718_v38 = vpack.c.bf16 %v3354_v58, %v3348_v13 }
 0x1ed   :  { %v4037_v55 = vld [vmem:[#allocation53_spill] sm:$0xff]  ;;  %v4039_v2 = vld [vmem:[#allocation24_spill] sm:$0xff]  ;;  %1826 = vst [vmem:[%s3762_s4 + $0x10] sm:$0xff] %v1678_v59   ;;  %1827 = vst [vmem:[%s3762_s4 + $0x18] sm:$0xff] %v1683_v12   ;;  %v1728_v49 = vpack.c.bf16 %v3378_v3, %v3372_v17  ;;  %v1733_v22 = vpack.c.bf16 %v3390_v26, %v3384_v36  ;;  %v1738_v13 = vpack.c.bf16 %v3402_v21, %v3396_v35 }
 0x1ee   :  { %v1703_v34 = vpack.c.bf16 %v4037_v55, %v4036_v42  ;;  %v1708_v32 = vpack.c.bf16 %v4039_v2, %v4038_v25  ;;  %1828 = vst [vmem:[%s3762_s4 + $0x20] sm:$0xff] %v1688_v0   ;;  %1829 = vst [vmem:[%s3762_s4 + $0x28] sm:$0xff] %v1693_v43   ;;  %v1743_v58 = vpack.c.bf16 %v3414_v52, %v3408_v30 }
 0x1ef   :  { %1830 = vst [vmem:[%s3762_s4 + $0x30] sm:$0xff] %v1698_v31   ;;  %1833 = vst [vmem:[%s3762_s4 + $0x48] sm:$0xff] %v1713_v46   ;;  %v1748_v47 = vpack.c.bf16 %v3426_v39, %v3420_v60  ;;  %v1753_v29 = vpack.c.bf16 %v3438_v10, %v3432_v57  ;;  %v1758_v17 = vpack.c.bf16 %v3450_v7, %v3444_v28 }
 0x1f0   :  { %1831 = vst [vmem:[%s3762_s4 + $0x38] sm:$0xff] %v1703_v34   ;;  %1832 = vst [vmem:[%s3762_s4 + $0x40] sm:$0xff] %v1708_v32   ;;  %v1763_v3 = vpack.c.bf16 %v3462_v48, %v3456_v41  ;;  %v1768_v36 = vpack.c.bf16 %v3474_v51, %v3468_v24  ;;  %v1773_v26 = vpack.c.bf16 %v3486_v16, %v3480_v18 }
 0x1f1   :  { %1834 = vst [vmem:[%s3762_s4 + $0x50] sm:$0xff] %v1718_v38   ;;  %1835 = vst [vmem:[%s3762_s4 + $0x58] sm:$0xff] %v1723_v44   ;;  %v1778_v35 = vpack.c.bf16 %v3498_v19, %v3492_v61  ;;  %v1783_v21 = vpack.c.bf16 %v3510_v6, %v3504_v27  ;;  %v1788_v30 = vpack.c.bf16 %v3522_v8, %v3516_v11  ;;  %v4041_v41 = vld [vmem:[#allocation3_spill] sm:$0xff] }
 0x1f2   :  { %1836 = vst [vmem:[%s3762_s4 + $0x60] sm:$0xff] %v1728_v49   ;;  %1837 = vst [vmem:[%s3762_s4 + $0x68] sm:$0xff] %v1733_v22   ;;  %v1793_v52 = vpack.c.bf16 %v3534_v20, %v3528_v1  ;;  %v1798_v60 = vpack.c.bf16 %v3546_v56, %v3540_v5  ;;  %v1803_v39 = vpack.c.bf16 %v3556_v33, %v3551_v53  ;;  %v4040_v28 = vld [vmem:[#allocation8_spill] sm:$0xff] }
 0x1f3   :  { %1838 = vst [vmem:[%s3762_s4 + $0x70] sm:$0xff] %v1738_v13   ;;  %1839 = vst [vmem:[%s3762_s4 + $0x78] sm:$0xff] %v1743_v58   ;;  %v1808_v57 = vpack.c.bf16 %v3566_v23, %v3561_v50  ;;  %v1813_v10 = vpack.c.bf16 %v3576_v62, %v3571_v40  ;;  %v1818_v7 = vpack.c.bf16 %v4040_v28, %v3581_v14 }
 0x1f4   :  { %1840 = vst [vmem:[%s3762_s4 + $0x80] sm:$0xff] %v1748_v47   ;;  %1841 = vst [vmem:[%s3762_s4 + $0x88] sm:$0xff] %v1753_v29   ;;  %v1823_v48 = vpack.c.bf16 %v3596_v9, %v4041_v41 }
 0x1f5   :  { %1842 = vst [vmem:[%s3762_s4 + $0x90] sm:$0xff] %v1758_v17   ;;  %1843 = vst [vmem:[%s3762_s4 + $0x98] sm:$0xff] %v1763_v3  }
 0x1f6   :  { %1844 = vst [vmem:[%s3762_s4 + $0xa0] sm:$0xff] %v1768_v36   ;;  %1845 = vst [vmem:[%s3762_s4 + $0xa8] sm:$0xff] %v1773_v26  }
 0x1f7   :  { %1846 = vst [vmem:[%s3762_s4 + $0xb0] sm:$0xff] %v1778_v35   ;;  %1847 = vst [vmem:[%s3762_s4 + $0xb8] sm:$0xff] %v1783_v21  }
 0x1f8   :  { %1848 = vst [vmem:[%s3762_s4 + $0xc0] sm:$0xff] %v1788_v30   ;;  %1849 = vst [vmem:[%s3762_s4 + $0xc8] sm:$0xff] %v1793_v52  }
 0x1f9   :  { %1850 = vst [vmem:[%s3762_s4 + $0xd0] sm:$0xff] %v1798_v60   ;;  %1851 = vst [vmem:[%s3762_s4 + $0xd8] sm:$0xff] %v1803_v39  }
 0x1fa   :  { %1852 = vst [vmem:[%s3762_s4 + $0xe0] sm:$0xff] %v1808_v57   ;;  %1853 = vst [vmem:[%s3762_s4 + $0xe8] sm:$0xff] %v1813_v10  }
 0x1fb   :  { %1854 = vst [vmem:[%s3762_s4 + $0xf0] sm:$0xff] %v1818_v7   ;;  %1855 = vst [vmem:[%s3762_s4 + $0xf8] sm:$0xff] %v1823_v48  }

// kernel: discriminator_forward.6
= control target key start
LH: loop header
LB: loop body
LE: loop exit
PB: predicated region body
PF: predicated region fallthrough
CT: control target
= control target key end

     0   :  { %s1069_s1 = inlined_call_operand.vmem [shape: bf16[256,128], index: 1, kind: input, shape index: {}]   ;;  %s1070_s0 = inlined_call_operand.vmem [shape: bf16[128,256], index: 0, kind: input, shape index: {}]   ;;  %s1071_s2 = inlined_call_operand.vmem [shape: f32[1,128], index: 2, kind: input, shape index: {}]   ;;  %s1072_s3 = inlined_call_operand.vmem [shape: f32[1,128], index: 3, kind: input, shape index: {}]   ;;  %s1073_s4 = inlined_call_operand.vmem [shape: bf16[128,128], index: 4, kind: output, shape index: {}]  }
   0x1   :  { %v776_v0 = vld [vmem:[%s1069_s1 + $0x78] sm:$0xff]   ;;  %v778_v2 = vld [vmem:[%s1069_s1 + $0x70] sm:$0xff]   ;;  %v780_v4 = vld [vmem:[%s1069_s1 + $0x68] sm:$0xff]  }
   0x2   :  { %v777_v1 = vld [vmem:[%s1069_s1 + $0x38] sm:$0xff]   ;;  %696 = vmatprep.subr.bf16.mxu0 %v776_v0  ;;  %760 = vmatprep.subr.bf16.mxu1 %v776_v0  ;;  %v779_v3 = vld [vmem:[%s1069_s1 + $0x30] sm:$0xff]   ;;  %v781_v5 = vld [vmem:[%s1069_s1 + $0x28] sm:$0xff]  }
   0x3   :  { %697 = vmatpush3.bf16.msra.mxu0 %v777_v1  ;;  %768 = vmatpush3.bf16.msra.mxu1 %v777_v1  ;;  %v782_v6 = vld [vmem:[%s1069_s1 + $0x60] sm:$0xff]   ;;  %v784_v8 = vld [vmem:[%s1069_s1 + $0x58] sm:$0xff]   ;;  %v786_v10 = vld [vmem:[%s1069_s1 + $0x50] sm:$0xff]  }
   0x4   :  { %698 = vmatprep.subr.bf16.mxu0 %v778_v2  ;;  %761 = vmatprep.subr.bf16.mxu1 %v778_v2  ;;  %v783_v7 = vld [vmem:[%s1069_s1 + $0x20] sm:$0xff]   ;;  %v785_v9 = vld [vmem:[%s1069_s1 + $0x18] sm:$0xff]   ;;  %v787_v12 = vld [vmem:[%s1069_s1 + $0x10] sm:$0xff]  }
   0x5   :  { %v794_v11 = vld [vmem:[%s1070_s0 + $0x4] ss:$8 sps:$4 sm:$0xff]   ;;  %v792_v18 = vld [vmem:[%s1070_s0] ss:$8 sps:$4 sm:$0xff]   ;;  %v795_v20 = vld [vmem:[%s1070_s0 + $0x14] ss:$8 sps:$4 sm:$0xff]  }
   0x6   :  { %v800_v13 = vld [vmem:[%s1070_s0 + $0x44] ss:$8 sps:$4 sm:$0xff]   ;;  %274 = vmatprep.mubr.bf16.mxu0 %v794_v11  ;;  %v798_v19 = vld [vmem:[%s1070_s0 + $0x40] ss:$8 sps:$4 sm:$0xff]   ;;  %v804_v21 = vld [vmem:[%s1070_s0 + $0x54] ss:$8 sps:$4 sm:$0xff]  }
   0x7   :  { %699 = vmatpush3.bf16.msra.mxu0 %v779_v3  ;;  %769 = vmatpush3.bf16.msra.mxu1 %v779_v3  ;;  %v788_v14 = vld [vmem:[%s1069_s1 + $0x48] sm:$0xff]   ;;  %v790_v16 = vld [vmem:[%s1069_s1 + $0x40] sm:$0xff]   ;;  %v797_v22 = vld [vmem:[%s1070_s0 + $0x10] ss:$8 sps:$4 sm:$0xff]  }
   0x8   :  { %700 = vmatprep.subr.bf16.mxu0 %v780_v4  ;;  %762 = vmatprep.subr.bf16.mxu1 %v780_v4  ;;  %v789_v15 = vld [vmem:[%s1069_s1 + $0x8] sm:$0xff]   ;;  %v791_v17 = vld [vmem:[%s1069_s1] sm:$0xff]   ;;  %v806_v23 = vld [vmem:[%s1070_s0 + $0x50] ss:$8 sps:$4 sm:$0xff]  }
   0x9   :  { %306 = vmatprep.mubr.bf16.mxu1 %v800_v13  ;;  %v801_v24 = vld [vmem:[%s1070_s0 + $0x24] ss:$8 sps:$4 sm:$0xff]   ;;  %v803_v26 = vld [vmem:[%s1070_s0 + $0x20] ss:$8 sps:$4 sm:$0xff]   ;;  %v807_v28 = vld [vmem:[%s1070_s0 + $0x34] ss:$8 sps:$4 sm:$0xff]  }
   0xa   :  { %v810_v25 = vld [vmem:[%s1070_s0 + $0x64] ss:$8 sps:$4 sm:$0xff]   ;;  %v812_v27 = vld [vmem:[%s1070_s0 + $0x60] ss:$8 sps:$4 sm:$0xff]   ;;  %v813_v29 = vld [vmem:[%s1070_s0 + $0x74] ss:$8 sps:$4 sm:$0xff]  }
   0xb   :  { %701 = vmatpush3.bf16.msra.mxu0 %v781_v5  ;;  %770 = vmatpush3.bf16.msra.mxu1 %v781_v5  ;;  %v809_v30 = vld [vmem:[%s1070_s0 + $0x30] ss:$8 sps:$4 sm:$0xff]  }
   0xc   :  { %702 = vmatprep.subr.bf16.mxu0 %v782_v6  ;;  %763 = vmatprep.subr.bf16.mxu1 %v782_v6  ;;  %v815_v31 = vld [vmem:[%s1070_s0 + $0x70] ss:$8 sps:$4 sm:$0xff]  }
   0xf   :  { %703 = vmatpush3.bf16.msra.mxu0 %v783_v7  ;;  %771 = vmatpush3.bf16.msra.mxu1 %v783_v7 }
  0x10   :  { %704 = vmatprep.subr.bf16.mxu0 %v784_v8  ;;  %764 = vmatprep.subr.bf16.mxu1 %v784_v8 }
  0x13   :  { %705 = vmatpush3.bf16.msra.mxu0 %v785_v9  ;;  %772 = vmatpush3.bf16.msra.mxu1 %v785_v9 }
  0x14   :  { %706 = vmatprep.subr.bf16.mxu0 %v786_v10  ;;  %765 = vmatprep.subr.bf16.mxu1 %v786_v10 }
  0x17   :  { %707 = vmatpush3.bf16.msra.mxu0 %v787_v12  ;;  %773 = vmatpush3.bf16.msra.mxu1 %v787_v12 }
  0x18   :  { %708 = vmatprep.subr.bf16.mxu0 %v788_v14  ;;  %766 = vmatprep.subr.bf16.mxu1 %v788_v14 }
  0x1b   :  { %709 = vmatpush3.bf16.msra.mxu0 %v789_v15  ;;  %774 = vmatpush3.bf16.msra.mxu1 %v789_v15 }
  0x1c   :  { %710 = vmatprep.subr.bf16.mxu0 %v790_v16  ;;  %767 = vmatprep.subr.bf16.mxu1 %v790_v16 }
  0x1f   :  { %711 = vmatpush3.bf16.msra.mxu0 %v791_v17  ;;  %775 = vmatpush3.bf16.msra.mxu1 %v791_v17 }
  0x22   :  { %275 = vmatmul.mubr.bf16.vlgmr.msra.gmra.mxu0 %v792_v18  ;;  %307 = vmatmul.mubr.bf16.vlgmr.msra.gmra.mxu1 %v798_v19 }
  0x23   :  { %282 = vmatprep.mubr.bf16.mxu0 %v795_v20  ;;  %314 = vmatprep.mubr.bf16.mxu1 %v804_v21 }
  0x2a   :  { %283 = vmatmul.mubr.bf16.gmra.mxu0 %v797_v22  ;;  %315 = vmatmul.mubr.bf16.gmra.mxu1 %v806_v23 }
  0x2b   :  { %290 = vmatprep.mubr.bf16.mxu0 %v801_v24  ;;  %322 = vmatprep.mubr.bf16.mxu1 %v810_v25 }
  0x32   :  { %291 = vmatmul.mubr.bf16.gmra.mxu0 %v803_v26  ;;  %323 = vmatmul.mubr.bf16.gmra.mxu1 %v812_v27 }
  0x33   :  { %298 = vmatprep.mubr.bf16.mxu0 %v807_v28  ;;  %330 = vmatprep.mubr.bf16.mxu1 %v813_v29 }
  0x3a   :  { %299 = vmatmul.mubr.bf16.gmra.mxu0 %v809_v30  ;;  %331 = vmatmul.mubr.bf16.gmra.mxu1 %v815_v31 }
  0xe2   :  { %v712_v32 = vpop.f32.mrf.mxu0  ;;  %v736_v33 = vpop.f32.mrf.mxu1 }
  0xe4   :  { %v713_v34 = vpop.f32.mrf.mxu0  ;;  %v737_v35 = vpop.f32.mrf.mxu1 }
  0xe5   :  { %v941_v51 = vadd.f32 %v713_v34, %v712_v32  ;;  %v973_v20 = vadd.f32 %v737_v35, %v736_v33 }
  0xe6   :  { %v715_v36 = vpop.f32.mrf.mxu0  ;;  %v739_v37 = vpop.f32.mrf.mxu1 }
  0xe7   :  { %v361_v58 = vmul.f32 %v941_v51, %v941_v51  ;;  %v369_v29 = vmul.f32 %v973_v20, %v973_v20 }
  0xe8   :  { %v716_v38 = vpop.f32.mrf.mxu0  ;;  %v740_v39 = vpop.f32.mrf.mxu1 }
  0xe9   :  { %v939_v48 = vadd.f32 %v716_v38, %v715_v36  ;;  %v978_v24 = vadd.f32 %v740_v39, %v739_v37 }
  0xea   :  { %v718_v40 = vpop.f32.mrf.mxu0  ;;  %v742_v41 = vpop.f32.mrf.mxu1 }
  0xeb   :  { %v362_v55 = vmul.f32 %v939_v48, %v939_v48  ;;  %v339_v59 = vadd.f32 %v939_v48, %v941_v51  ;;  %v370_v33 = vmul.f32 %v978_v24, %v978_v24 }
  0xec   :  { %v719_v42 = vpop.f32.mrf.mxu0  ;;  %v743_v43 = vpop.f32.mrf.mxu1 }
  0xed   :  { %v943_v52 = vadd.f32 %v719_v42, %v718_v40  ;;  %v377_v0 = vadd.f32 %v362_v55, %v361_v58  ;;  %v985_v30 = vadd.f32 %v743_v43, %v742_v41 }
  0xee   :  { %v721_v44 = vpop.f32.mrf.mxu0  ;;  %v745_v45 = vpop.f32.mrf.mxu1 }
  0xef   :  { %v363_v60 = vmul.f32 %v943_v52, %v943_v52  ;;  %v340_v1 = vadd.f32 %v943_v52, %v339_v59  ;;  %v371_v38 = vmul.f32 %v985_v30, %v985_v30 }
  0xf0   :  { %v722_v46 = vpop.f32.mrf.mxu0  ;;  %v746_v47 = vpop.f32.mrf.mxu1 }
  0xf1   :  { %v947_v56 = vadd.f32 %v722_v46, %v721_v44  ;;  %v378_v5 = vadd.f32 %v377_v0, %v363_v60  ;;  %v990_v34 = vadd.f32 %v746_v47, %v745_v45 }
  0xf2   :  { %v724_v49 = vpop.f32.mrf.mxu0  ;;  %v748_v50 = vpop.f32.mrf.mxu1 }
  0xf3   :  { %v364_v2 = vmul.f32 %v947_v56, %v947_v56  ;;  %v341_v6 = vadd.f32 %v947_v56, %v340_v1  ;;  %v372_v42 = vmul.f32 %v990_v34, %v990_v34 }
  0xf4   :  { %v725_v53 = vpop.f32.mrf.mxu0  ;;  %v749_v54 = vpop.f32.mrf.mxu1 }
  0xf5   :  { %v955_v61 = vadd.f32 %v725_v53, %v724_v49  ;;  %v379_v10 = vadd.f32 %v378_v5, %v364_v2  ;;  %v995_v39 = vadd.f32 %v749_v54, %v748_v50 }
  0xf6   :  { %v727_v57 = vpop.f32.mrf.mxu0  ;;  %v751_v63 = vpop.f32.mrf.mxu1 }
  0xf7   :  { %v365_v7 = vmul.f32 %v955_v61, %v955_v61  ;;  %v342_v11 = vadd.f32 %v955_v61, %v341_v6  ;;  %v373_v47 = vmul.f32 %v995_v39, %v995_v39 }
  0xf8   :  { %v728_v62 = vpop.f32.mrf.mxu0  ;;  %v752_v9 = vpop.f32.mrf.mxu1 }
  0xf9   :  { %v960_v3 = vadd.f32 %v728_v62, %v727_v57  ;;  %v380_v15 = vadd.f32 %v379_v10, %v365_v7  ;;  %v1000_v43 = vadd.f32 %v752_v9, %v751_v63 }
  0xfa   :  { %v730_v4 = vpop.f32.mrf.mxu0  ;;  %v754_v19 = vpop.f32.mrf.mxu1 }
  0xfb   :  { %v366_v12 = vmul.f32 %v960_v3, %v960_v3  ;;  %v343_v16 = vadd.f32 %v960_v3, %v342_v11  ;;  %v374_v55 = vmul.f32 %v1000_v43, %v1000_v43 }
  0xfc   :  { %v731_v8 = vpop.f32.mrf.mxu0  ;;  %v755_v28 = vpop.f32.mrf.mxu1 }
  0xfd   :  { %v968_v13 = vadd.f32 %v731_v8, %v730_v4  ;;  %v381_v21 = vadd.f32 %v380_v15, %v366_v12  ;;  %v756_v50 = vadd.f32 %v755_v28, %v754_v19  ;;  %v402_v28 = vld [vmem:[%s1071_s2] sm:$0x1] }
  0xfe   :  { %v733_v14 = vpop.f32.mrf.mxu0  ;;  %v757_v37 = vpop.f32.mrf.mxu1 }
  0xff   :  { %v367_v17 = vmul.f32 %v968_v13, %v968_v13  ;;  %v344_v22 = vadd.f32 %v968_v13, %v343_v16  ;;  %v375_v62 = vmul.f32 %v756_v50, %v756_v50 }
 0x100   :  { %v734_v18 = vpop.f32.mrf.mxu0  ;;  %v758_v46 = vpop.f32.mrf.mxu1 }
 0x101   :  { %v976_v23 = vadd.f32 %v734_v18, %v733_v14  ;;  %v382_v25 = vadd.f32 %v381_v21, %v367_v17  ;;  %v759_v58 = vadd.f32 %v758_v46, %v757_v37 }
 0x103   :  { %v345_v26 = vadd.f32 %v976_v23, %v344_v22  ;;  %v368_v27 = vmul.f32 %v976_v23, %v976_v23  ;;  %v376_v1 = vmul.f32 %v759_v58, %v759_v58 }
 0x105   :  { %v346_v31 = vadd.f32 %v973_v20, %v345_v26  ;;  %v383_v32 = vadd.f32 %v382_v25, %v368_v27  ;;  %v410_v26 = vlaneseq }
 0x107   :  { %v347_v35 = vadd.f32 %v978_v24, %v346_v31  ;;  %v384_v36 = vadd.f32 %v383_v32, %v369_v29  ;;  %v411_v27 = vshrl.u32 %v410_v26, 7 }
 0x109   :  { %v385_v40 = vadd.f32 %v384_v36, %v370_v33  ;;  %v348_v41 = vadd.f32 %v985_v30, %v347_v35  ;;  %v412_v29 = vsub.s32 0, %v411_v27  ;;  %v406_v33 = vld [vmem:[%s1072_s3] sm:$0x1] }
 0x10b   :  { %v349_v44 = vadd.f32 %v990_v34, %v348_v41  ;;  %v386_v45 = vadd.f32 %v385_v40, %v371_v38 }
 0x10d   :  { %v350_v49 = vadd.f32 %v995_v39, %v349_v44  ;;  %v387_v53 = vadd.f32 %v386_v45, %v372_v42 }
 0x10f   :  { %v351_v54 = vadd.f32 %v1000_v43, %v350_v49  ;;  %v388_v57 = vadd.f32 %v387_v53, %v373_v47 }
 0x111   :  { %v389_v59 = vadd.f32 %v388_v57, %v374_v55  ;;  %v352_v60 = vadd.f32 %v756_v50, %v351_v54 }
 0x113   :  { %v390_v63 = vadd.f32 %v389_v59, %v375_v62  ;;  %v353_v0 = vadd.f32 %v759_v58, %v352_v60 }
 0x115   :  { %v354_v2 = vrot.slane %v353_v0, 4  ;;  %v391_v4 = vadd.f32 %v390_v63, %v376_v1 }
 0x117   :  { %v355_v5 = vadd.f32 %v354_v2, %v353_v0  ;;  %v392_v6 = vrot.slane %v391_v4, 4 }
 0x119   :  { %v356_v7 = vrot.slane %v355_v5, 2  ;;  %v393_v8 = vadd.f32 %v392_v6, %v391_v4 }
 0x11b   :  { %v357_v9 = vadd.f32 %v356_v7, %v355_v5  ;;  %v394_v10 = vrot.slane %v393_v8, 2 }
 0x11d   :  { %v358_v11 = vrot.slane %v357_v9, 1  ;;  %v395_v12 = vadd.f32 %v394_v10, %v393_v8 }
 0x11f   :  { %v359_v14 = vadd.f32 %v358_v11, %v357_v9  ;;  %v396_v15 = vrot.slane %v395_v12, 1 }
 0x121   :  { %v360_v16 = vmul.f32 0.0078125, %v359_v14  ;;  %v397_v17 = vadd.f32 %v396_v15, %v395_v12 }
 0x123   :  { %v398_v18 = vmul.f32 0.0078125, %v397_v17  ;;  %v399_v19 = vmul.f32 %v360_v16, %v360_v16 }
 0x125   :  { %v400_v21 = vsub.f32 %v398_v18, %v399_v19 }
 0x127   :  { %v401_v22 = vmax.f32 %v400_v21, 0.0 }
 0x129   :  { %v403_v25 = vadd.f32 1e-05, %v401_v22 }
 0x12b   :  { %816 = vrsqrt.f32 %v403_v25 }
 0x138   :  { %v817_v31 = vpop.eup %816 }
 0x139   :  { %v405_v32 = vmul.f32 %v817_v31, %v402_v28 }
 0x13b   :  { %v407_v35 = vmul.f32 %v405_v32, %v360_v16  ;;  %v413_v36 = vrot.slane %v405_v32, %v412_v29 }
 0x13d   :  { %v408_v37 = vsub.f32 %v406_v33, %v407_v35  ;;  %v415_v38 = vmul.f32 %v941_v51, %v413_v36  ;;  %v416_v40 = vmul.f32 %v939_v48, %v413_v36  ;;  %v417_v41 = vmul.f32 %v943_v52, %v413_v36 }
 0x13e   :  { %v418_v42 = vmul.f32 %v947_v56, %v413_v36  ;;  %v419_v44 = vmul.f32 %v955_v61, %v413_v36  ;;  %v420_v45 = vmul.f32 %v960_v3, %v413_v36  ;;  %v421_v46 = vmul.f32 %v968_v13, %v413_v36 }
 0x13f   :  { %v422_v47 = vmul.f32 %v976_v23, %v413_v36  ;;  %v423_v49 = vmul.f32 %v973_v20, %v413_v36  ;;  %v424_v53 = vmul.f32 %v978_v24, %v413_v36  ;;  %v425_v51 = vmul.f32 %v985_v30, %v413_v36 }
 0x140   :  { %v426_v48 = vmul.f32 %v990_v34, %v413_v36  ;;  %v435_v54 = vrot.slane %v408_v37, %v412_v29  ;;  %v427_v52 = vmul.f32 %v995_v39, %v413_v36  ;;  %v428_v56 = vmul.f32 %v1000_v43, %v413_v36 }
 0x141   :  { %v429_v61 = vmul.f32 %v756_v50, %v413_v36  ;;  %v430_v55 = vmul.f32 %v759_v58, %v413_v36 }
 0x142   :  { %v437_v3 = vadd.f32 %v435_v54, %v415_v38  ;;  %v438_v57 = vadd.f32 %v435_v54, %v416_v40  ;;  %v439_v13 = vadd.f32 %v435_v54, %v417_v41  ;;  %v440_v59 = vadd.f32 %v435_v54, %v418_v42 }
 0x143   :  { %v441_v23 = vadd.f32 %v435_v54, %v419_v44  ;;  %v442_v60 = vadd.f32 %v435_v54, %v420_v45  ;;  %v443_v20 = vadd.f32 %v435_v54, %v421_v46  ;;  %v444_v62 = vadd.f32 %v435_v54, %v422_v47 }
 0x144   :  { %v445_v24 = vadd.f32 %v435_v54, %v423_v49  ;;  %v446_v63 = vadd.f32 %v435_v54, %v424_v53  ;;  %v447_v30 = vadd.f32 %v435_v54, %v425_v51  ;;  %v448_v0 = vadd.f32 %v435_v54, %v426_v48 }
 0x145   :  { %v449_v34 = vadd.f32 %v435_v54, %v427_v52  ;;  %v450_v1 = vadd.f32 %v435_v54, %v428_v56  ;;  %v451_v2 = vadd.f32 %v435_v54, %v429_v61  ;;  %v452_v39 = vadd.f32 %v435_v54, %v430_v55 }
 0x146   :  { %vm453_vm0 = vcmp.gt.f32.partialorder %v437_v3, 0.0  ;;  %vm454_vm1 = vcmp.gt.f32.partialorder %v438_v57, 0.0  ;;  %vm455_vm2 = vcmp.gt.f32.partialorder %v439_v13, 0.0  ;;  %vm456_vm3 = vcmp.gt.f32.partialorder %v440_v59, 0.0 }
 0x147   :  { %vm457_vm4 = vcmp.gt.f32.partialorder %v441_v23, 0.0  ;;  %vm458_vm5 = vcmp.gt.f32.partialorder %v442_v60, 0.0  ;;  %vm459_vm6 = vcmp.gt.f32.partialorder %v443_v20, 0.0  ;;  %vm460_vm7 = vcmp.gt.f32.partialorder %v444_v62, 0.0 }
 0x148   :  { %vm461_vm8 = vcmp.gt.f32.partialorder %v445_v24, 0.0  ;;  %vm462_vm9 = vcmp.gt.f32.partialorder %v446_v63, 0.0  ;;  %vm463_vm10 = vcmp.gt.f32.partialorder %v447_v30, 0.0  ;;  %vm464_vm11 = vcmp.gt.f32.partialorder %v448_v0, 0.0 }
 0x149   :  { %vm465_vm12 = vcmp.gt.f32.partialorder %v449_v34, 0.0  ;;  %vm466_vm13 = vcmp.gt.f32.partialorder %v450_v1, 0.0  ;;  %vm467_vm14 = vcmp.gt.f32.partialorder %v451_v2, 0.0  ;;  %vm468_vm15 = vcmp.gt.f32.partialorder %v452_v39, 0.0 }
 0x14a   :  { %v469_v43 = vmul.f32 0.2, %v437_v3  ;;  %v470_v50 = vmul.f32 0.2, %v438_v57  ;;  %v471_v58 = vmul.f32 0.2, %v439_v13 }
 0x14b   :  { %v472_v4 = vmul.f32 0.2, %v440_v59  ;;  %v473_v5 = vmul.f32 0.2, %v441_v23  ;;  %v474_v6 = vmul.f32 0.2, %v442_v60 }
 0x14c   :  { %v475_v7 = vmul.f32 0.2, %v443_v20  ;;  %v476_v8 = vmul.f32 0.2, %v444_v62  ;;  %v477_v9 = vmul.f32 0.2, %v445_v24  ;;  %v485_v10 = vsel %vm453_vm0, %v437_v3, %v469_v43 }
 0x14d   :  { %v478_v11 = vmul.f32 0.2, %v446_v63  ;;  %v479_v12 = vmul.f32 0.2, %v447_v30  ;;  %v480_v14 = vmul.f32 0.2, %v448_v0  ;;  %v486_v15 = vsel %vm454_vm1, %v438_v57, %v470_v50 }
 0x14e   :  { %v481_v16 = vmul.f32 0.2, %v449_v34  ;;  %v482_v17 = vmul.f32 0.2, %v450_v1  ;;  %v483_v18 = vmul.f32 0.2, %v451_v2  ;;  %v487_v19 = vsel %vm455_vm2, %v439_v13, %v471_v58 }
 0x14f   :  { %v484_v21 = vmul.f32 0.2, %v452_v39  ;;  %v488_v22 = vsel %vm456_vm3, %v440_v59, %v472_v4  ;;  %v489_v25 = vsel %vm457_vm4, %v441_v23, %v473_v5  ;;  %v490_v26 = vsel %vm458_vm5, %v442_v60, %v474_v6 }
 0x150   :  { %v491_v27 = vsel %vm459_vm6, %v443_v20, %v475_v7  ;;  %v492_v28 = vsel %vm460_vm7, %v444_v62, %v476_v8  ;;  %v493_v29 = vsel %vm461_vm8, %v445_v24, %v477_v9  ;;  %v494_v31 = vsel %vm462_vm9, %v446_v63, %v478_v11 }
 0x151   :  { %v495_v32 = vsel %vm463_vm10, %v447_v30, %v479_v12  ;;  %v496_v33 = vsel %vm464_vm11, %v448_v0, %v480_v14  ;;  %v497_v35 = vsel %vm465_vm12, %v449_v34, %v481_v16  ;;  %v498_v36 = vsel %vm466_vm13, %v450_v1, %v482_v17 }
 0x152   :  { %v499_v37 = vsel %vm467_vm14, %v451_v2, %v483_v18  ;;  %v500_v38 = vsel %vm468_vm15, %v452_v39, %v484_v21  ;;  %v652_v40 = vpack.c.bf16 %v486_v15, %v485_v10  ;;  %v657_v41 = vpack.c.bf16 %v488_v22, %v487_v19 }
 0x153   :  { %v662_v42 = vpack.c.bf16 %v490_v26, %v489_v25  ;;  %v667_v44 = vpack.c.bf16 %v492_v28, %v491_v27  ;;  %v672_v45 = vpack.c.bf16 %v494_v31, %v493_v29  ;;  %v677_v46 = vpack.c.bf16 %v496_v33, %v495_v32 }
 0x154   :  { %653 = vst [vmem:[%s1073_s4] sm:$0xff] %v652_v40   ;;  %689 = vst [vmem:[%s1073_s4 + $0x8] sm:$0xff] %v657_v41   ;;  %v682_v47 = vpack.c.bf16 %v498_v36, %v497_v35  ;;  %v687_v49 = vpack.c.bf16 %v500_v38, %v499_v37 }
 0x155   :  { %690 = vst [vmem:[%s1073_s4 + $0x10] sm:$0xff] %v662_v42   ;;  %691 = vst [vmem:[%s1073_s4 + $0x18] sm:$0xff] %v667_v44  }
 0x156   :  { %692 = vst [vmem:[%s1073_s4 + $0x20] sm:$0xff] %v672_v45   ;;  %693 = vst [vmem:[%s1073_s4 + $0x28] sm:$0xff] %v677_v46  }
 0x157   :  { %694 = vst [vmem:[%s1073_s4 + $0x30] sm:$0xff] %v682_v47   ;;  %695 = vst [vmem:[%s1073_s4 + $0x38] sm:$0xff] %v687_v49  }

// kernel: discriminator_forward.7
= control target key start
LH: loop header
LB: loop body
LE: loop exit
PB: predicated region body
PF: predicated region fallthrough
CT: control target
= control target key end

     0   :  { %s828_s1 = inlined_call_operand.vmem [shape: bf16[512,128], index: 1, kind: input, shape index: {}]   ;;  %s829_s0 = inlined_call_operand.vmem [shape: bf16[32,512], index: 0, kind: input, shape index: {}]   ;;  %s830_s2 = inlined_call_operand.vmem [shape: f32[1,128], index: 2, kind: input, shape index: {}]   ;;  %s831_s3 = inlined_call_operand.vmem [shape: f32[1,128], index: 3, kind: input, shape index: {}]   ;;  %s832_s4 = inlined_call_operand.vmem [shape: bf16[32,128], index: 4, kind: output, shape index: {}]  }
   0x1   :  { %v625_v0 = vld [vmem:[%s828_s1 + $0x78] sm:$0xff]   ;;  %v629_v4 = vld [vmem:[%s828_s1 + $0x70] sm:$0xff]   ;;  %v633_v8 = vld [vmem:[%s828_s1 + $0x68] sm:$0xff]  }
   0x2   :  { %v626_v1 = vld [vmem:[%s828_s1 + $0xf8] sm:$0xff]   ;;  %569 = vmatprep.subr.bf16.mxu0 %v625_v0  ;;  %v630_v5 = vld [vmem:[%s828_s1 + $0xf0] sm:$0xff]   ;;  %v634_v9 = vld [vmem:[%s828_s1 + $0xe8] sm:$0xff]  }
   0x3   :  { %v627_v2 = vld [vmem:[%s828_s1 + $0x38] sm:$0xff]   ;;  %597 = vmatprep.subr.bf16.mxu1 %v626_v1  ;;  %v631_v6 = vld [vmem:[%s828_s1 + $0x30] sm:$0xff]   ;;  %v635_v10 = vld [vmem:[%s828_s1 + $0x28] sm:$0xff]  }
   0x4   :  { %v628_v3 = vld [vmem:[%s828_s1 + $0xb8] sm:$0xff]   ;;  %570 = vmatpush3.bf16.msra.mxu0 %v627_v2  ;;  %v632_v7 = vld [vmem:[%s828_s1 + $0xb0] sm:$0xff]   ;;  %v636_v11 = vld [vmem:[%s828_s1 + $0xa8] sm:$0xff]  }
   0x5   :  { %598 = vmatpush3.bf16.msra.mxu1 %v628_v3  ;;  %571 = vmatprep.subr.bf16.mxu0 %v629_v4  ;;  %v637_v12 = vld [vmem:[%s828_s1 + $0x60] sm:$0xff]   ;;  %v641_v16 = vld [vmem:[%s828_s1 + $0x58] sm:$0xff]   ;;  %v645_v20 = vld [vmem:[%s828_s1 + $0x50] sm:$0xff]  }
   0x6   :  { %599 = vmatprep.subr.bf16.mxu1 %v630_v5  ;;  %v638_v13 = vld [vmem:[%s828_s1 + $0xe0] sm:$0xff]   ;;  %v642_v17 = vld [vmem:[%s828_s1 + $0xd8] sm:$0xff]   ;;  %v646_v21 = vld [vmem:[%s828_s1 + $0xd0] sm:$0xff]  }
   0x7   :  { %v639_v14 = vld [vmem:[%s828_s1 + $0x20] sm:$0xff]   ;;  %v643_v18 = vld [vmem:[%s828_s1 + $0x18] sm:$0xff]   ;;  %v647_v22 = vld [vmem:[%s828_s1 + $0x10] sm:$0xff]  }
   0x8   :  { %572 = vmatpush3.bf16.msra.mxu0 %v631_v6  ;;  %v640_v15 = vld [vmem:[%s828_s1 + $0xa0] sm:$0xff]   ;;  %v644_v19 = vld [vmem:[%s828_s1 + $0x98] sm:$0xff]   ;;  %v648_v23 = vld [vmem:[%s828_s1 + $0x90] sm:$0xff]  }
   0x9   :  { %600 = vmatpush3.bf16.msra.mxu1 %v632_v7  ;;  %573 = vmatprep.subr.bf16.mxu0 %v633_v8  ;;  %v649_v24 = vld [vmem:[%s828_s1 + $0x48] sm:$0xff]   ;;  %v653_v28 = vld [vmem:[%s828_s1 + $0x40] sm:$0xff]  }
   0xa   :  { %601 = vmatprep.subr.bf16.mxu1 %v634_v9  ;;  %v650_v25 = vld [vmem:[%s828_s1 + $0xc8] sm:$0xff]   ;;  %v654_v29 = vld [vmem:[%s828_s1 + $0xc0] sm:$0xff]  }
   0xb   :  { %v651_v26 = vld [vmem:[%s828_s1 + $0x8] sm:$0xff]   ;;  %v655_v30 = vld [vmem:[%s828_s1] sm:$0xff]  }
   0xc   :  { %574 = vmatpush3.bf16.msra.mxu0 %v635_v10  ;;  %v652_v27 = vld [vmem:[%s828_s1 + $0x88] sm:$0xff]   ;;  %v656_v31 = vld [vmem:[%s828_s1 + $0x80] sm:$0xff]  }
   0xd   :  { %602 = vmatpush3.bf16.msra.mxu1 %v636_v11  ;;  %575 = vmatprep.subr.bf16.mxu0 %v637_v12  ;;  %v657_v32 = vld [vmem:[%s829_s0] ss:$16 sps:$4 sm:$0xff]   ;;  %v659_v33 = vld [vmem:[%s829_s0 + $0x4] ss:$16 sps:$4 sm:$0xff]   ;;  %v660_v34 = vld [vmem:[%s829_s0 + $0x8] ss:$16 sps:$4 sm:$0xff]  }
   0xe   :  { %603 = vmatprep.subr.bf16.mxu1 %v638_v13  ;;  %v662_v35 = vld [vmem:[%s829_s0 + $0xc] ss:$16 sps:$4 sm:$0xff]   ;;  %354 = vmatprep.mubr.bf16.mxu0 %v659_v33  ;;  %v663_v36 = vld [vmem:[%s829_s0 + $0x24] ss:$16 sps:$4 sm:$0xff]   ;;  %v667_v38 = vld [vmem:[%s829_s0 + $0x20] ss:$16 sps:$4 sm:$0xff]  }
   0xf   :  { %403 = vmatprep.mubr.bf16.mxu1 %v662_v35  ;;  %v665_v37 = vld [vmem:[%s829_s0 + $0x2c] ss:$16 sps:$4 sm:$0xff]   ;;  %v668_v39 = vld [vmem:[%s829_s0 + $0x28] ss:$16 sps:$4 sm:$0xff]  }
  0x10   :  { %576 = vmatpush3.bf16.msra.mxu0 %v639_v14 }
  0x11   :  { %604 = vmatpush3.bf16.msra.mxu1 %v640_v15  ;;  %577 = vmatprep.subr.bf16.mxu0 %v641_v16 }
  0x12   :  { %605 = vmatprep.subr.bf16.mxu1 %v642_v17 }
  0x14   :  { %578 = vmatpush3.bf16.msra.mxu0 %v643_v18 }
  0x15   :  { %606 = vmatpush3.bf16.msra.mxu1 %v644_v19  ;;  %579 = vmatprep.subr.bf16.mxu0 %v645_v20 }
  0x16   :  { %607 = vmatprep.subr.bf16.mxu1 %v646_v21 }
  0x18   :  { %580 = vmatpush3.bf16.msra.mxu0 %v647_v22 }
  0x19   :  { %608 = vmatpush3.bf16.msra.mxu1 %v648_v23  ;;  %581 = vmatprep.subr.bf16.mxu0 %v649_v24 }
  0x1a   :  { %609 = vmatprep.subr.bf16.mxu1 %v650_v25 }
  0x1c   :  { %582 = vmatpush3.bf16.msra.mxu0 %v651_v26 }
  0x1d   :  { %610 = vmatpush3.bf16.msra.mxu1 %v652_v27  ;;  %583 = vmatprep.subr.bf16.mxu0 %v653_v28 }
  0x1e   :  { %611 = vmatprep.subr.bf16.mxu1 %v654_v29 }
  0x20   :  { %584 = vmatpush3.bf16.msra.mxu0 %v655_v30 }
  0x21   :  { %612 = vmatpush3.bf16.msra.mxu1 %v656_v31 }
  0x23   :  { %355 = vmatmul.mubr.bf16.vlgmr.msra.gmra.mxu0 %v657_v32  ;;  %v455_v32 = vlaneseq }
  0x24   :  { %404 = vmatmul.mubr.bf16.vlgmr.msra.gmra.mxu1 %v660_v34  ;;  %362 = vmatprep.mubr.bf16.mxu0 %v663_v36  ;;  %v447_v34 = vld [vmem:[%s830_s2] sm:$0x1] }
  0x25   :  { %411 = vmatprep.mubr.bf16.mxu1 %v665_v37  ;;  %v456_v33 = vshrl.u32 %v455_v32, 7 }
  0x27   :  { %v457_v35 = vsub.s32 0, %v456_v33 }
  0x2b   :  { %363 = vmatmul.mubr.bf16.gmra.mxu0 %v667_v38  ;;  %v451_v38 = vld [vmem:[%s831_s3] sm:$0x1] }
  0x2c   :  { %412 = vmatmul.mubr.bf16.gmra.mxu1 %v668_v39 }
  0xe3   :  { %v585_v40 = vpop.f32.mrf.mxu0 }
  0xe4   :  { %v613_v41 = vpop.f32.mrf.mxu1 }
  0xe5   :  { %v586_v42 = vpop.f32.mrf.mxu0 }
  0xe6   :  { %v614_v43 = vpop.f32.mrf.mxu1  ;;  %v587_v49 = vadd.f32 %v586_v42, %v585_v40 }
  0xe7   :  { %v588_v44 = vpop.f32.mrf.mxu0  ;;  %v615_v50 = vadd.f32 %v614_v43, %v613_v41 }
  0xe8   :  { %v616_v45 = vpop.f32.mrf.mxu1 }
  0xe9   :  { %v589_v46 = vpop.f32.mrf.mxu0  ;;  %v406_v58 = vadd.f32 %v615_v50, %v587_v49 }
  0xea   :  { %v590_v47 = vadd.f32 %v589_v46, %v588_v44  ;;  %v617_v48 = vpop.f32.mrf.mxu1 }
  0xeb   :  { %v618_v51 = vadd.f32 %v617_v48, %v616_v45  ;;  %v591_v52 = vpop.f32.mrf.mxu0  ;;  %v430_v3 = vmul.f32 %v406_v58, %v406_v58 }
  0xec   :  { %v619_v53 = vpop.f32.mrf.mxu1 }
  0xed   :  { %v409_v54 = vadd.f32 %v618_v51, %v590_v47  ;;  %v592_v55 = vpop.f32.mrf.mxu0 }
  0xee   :  { %v593_v56 = vadd.f32 %v592_v55, %v591_v52  ;;  %v620_v57 = vpop.f32.mrf.mxu1 }
  0xef   :  { %v621_v59 = vadd.f32 %v620_v57, %v619_v53  ;;  %v594_v60 = vpop.f32.mrf.mxu0  ;;  %v431_v62 = vmul.f32 %v409_v54, %v409_v54  ;;  %v420_v4 = vadd.f32 %v409_v54, %v406_v58 }
  0xf0   :  { %v622_v61 = vpop.f32.mrf.mxu1 }
  0xf1   :  { %v414_v63 = vadd.f32 %v621_v59, %v593_v56  ;;  %v595_v0 = vpop.f32.mrf.mxu0  ;;  %v434_v7 = vadd.f32 %v431_v62, %v430_v3 }
  0xf2   :  { %v596_v1 = vadd.f32 %v595_v0, %v594_v60  ;;  %v623_v2 = vpop.f32.mrf.mxu1 }
  0xf3   :  { %v432_v5 = vmul.f32 %v414_v63, %v414_v63  ;;  %v624_v6 = vadd.f32 %v623_v2, %v622_v61  ;;  %v421_v8 = vadd.f32 %v420_v4, %v414_v63 }
  0xf5   :  { %v417_v9 = vadd.f32 %v624_v6, %v596_v1  ;;  %v435_v10 = vadd.f32 %v434_v7, %v432_v5 }
  0xf7   :  { %v422_v11 = vadd.f32 %v421_v8, %v417_v9  ;;  %v433_v12 = vmul.f32 %v417_v9, %v417_v9 }
  0xf9   :  { %v423_v13 = vrot.slane %v422_v11, 4  ;;  %v436_v14 = vadd.f32 %v435_v10, %v433_v12 }
  0xfb   :  { %v424_v15 = vadd.f32 %v423_v13, %v422_v11  ;;  %v437_v16 = vrot.slane %v436_v14, 4 }
  0xfd   :  { %v425_v17 = vrot.slane %v424_v15, 2  ;;  %v438_v18 = vadd.f32 %v437_v16, %v436_v14 }
  0xff   :  { %v426_v19 = vadd.f32 %v425_v17, %v424_v15  ;;  %v439_v20 = vrot.slane %v438_v18, 2 }
 0x101   :  { %v427_v21 = vrot.slane %v426_v19, 1  ;;  %v440_v22 = vadd.f32 %v439_v20, %v438_v18 }
 0x103   :  { %v428_v23 = vadd.f32 %v427_v21, %v426_v19  ;;  %v441_v24 = vrot.slane %v440_v22, 1 }
 0x105   :  { %v429_v25 = vmul.f32 0.03125, %v428_v23  ;;  %v442_v26 = vadd.f32 %v441_v24, %v440_v22 }
 0x107   :  { %v443_v27 = vmul.f32 0.03125, %v442_v26  ;;  %v444_v28 = vmul.f32 %v429_v25, %v429_v25 }
 0x109   :  { %v445_v29 = vsub.f32 %v443_v27, %v444_v28 }
 0x10b   :  { %v446_v30 = vmax.f32 %v445_v29, 0.0 }
 0x10d   :  { %v448_v31 = vadd.f32 1e-05, %v446_v30 }
 0x10f   :  { %669 = vrsqrt.f32 %v448_v31 }
 0x11c   :  { %v670_v36 = vpop.eup %669 }
 0x11d   :  { %v450_v37 = vmul.f32 %v670_v36, %v447_v34 }
 0x11f   :  { %v452_v39 = vmul.f32 %v450_v37, %v429_v25  ;;  %v458_v40 = vrot.slane %v450_v37, %v457_v35 }
 0x121   :  { %v453_v41 = vsub.f32 %v451_v38, %v452_v39  ;;  %v460_v42 = vmul.f32 %v458_v40, %v406_v58  ;;  %v461_v43 = vmul.f32 %v458_v40, %v409_v54  ;;  %v462_v44 = vmul.f32 %v458_v40, %v414_v63 }
 0x122   :  { %v463_v45 = vmul.f32 %v458_v40, %v417_v9 }
 0x123   :  { %v468_v46 = vrot.slane %v453_v41, %v457_v35 }
 0x125   :  { %v470_v47 = vadd.f32 %v468_v46, %v460_v42  ;;  %v471_v48 = vadd.f32 %v468_v46, %v461_v43  ;;  %v472_v49 = vadd.f32 %v468_v46, %v462_v44  ;;  %v473_v50 = vadd.f32 %v468_v46, %v463_v45 }
 0x127   :  { %vm474_vm0 = vcmp.gt.f32.partialorder %v470_v47, 0.0  ;;  %vm475_vm1 = vcmp.gt.f32.partialorder %v471_v48, 0.0  ;;  %vm476_vm2 = vcmp.gt.f32.partialorder %v472_v49, 0.0  ;;  %vm477_vm3 = vcmp.gt.f32.partialorder %v473_v50, 0.0 }
 0x128   :  { %v478_v51 = vmul.f32 0.2, %v470_v47  ;;  %v479_v52 = vmul.f32 0.2, %v471_v48  ;;  %v480_v53 = vmul.f32 0.2, %v472_v49 }
 0x129   :  { %v481_v55 = vmul.f32 0.2, %v473_v50 }
 0x12a   :  { %v482_v56 = vsel %vm474_vm0, %v470_v47, %v478_v51  ;;  %v483_v57 = vsel %vm475_vm1, %v471_v48, %v479_v52  ;;  %v484_v59 = vsel %vm476_vm2, %v472_v49, %v480_v53 }
 0x12b   :  { %v485_v58 = vsel %vm477_vm3, %v473_v50, %v481_v55  ;;  %v561_v54 = vpack.c.bf16 %v483_v57, %v482_v56 }
 0x12c   :  { %v566_v60 = vpack.c.bf16 %v485_v58, %v484_v59 }
 0x12d   :  { %562 = vst [vmem:[%s832_s4] sm:$0xff] %v561_v54  }
 0x12e   :  { %568 = vst [vmem:[%s832_s4 + $0x8] sm:$0xff] %v566_v60  }

</bundles_post_ra>
